<compile_context>
chip_gen: v7x
topology: tpu7x:2x2x1
jax: 0.10.0
libtpu: 0.0.40
codegen_flags: <defaults>
</compile_context>

<pallas_src>
import functools
import math

import jax
import jax.numpy as jnp
from jax.experimental import pallas as pl
from jax.experimental.pallas import tpu as pltpu

MIN_NORM = 1e-15
EPS_F32 = 4e-3          # PoincareBall.eps[torch.float32]
ARTANH_EPS = 1e-7       # f32-meaningful clamp (reference's 1e-15 is a no-op in f32)


def _round_up(v, m):
    return ((v + m - 1) // m) * m


def _artanh(u):
    u = jnp.clip(u, -1.0 + ARTANH_EPS, 1.0 - ARTANH_EPS)
    return 0.5 * jnp.log((1.0 + u) / (1.0 - u))


def _proj_ref(y, sqrt_c):
    """Project onto the Poincare ball (plain-JAX version, wrapper / reference)."""
    norm = jnp.maximum(jnp.linalg.norm(y, axis=-1, keepdims=True), MIN_NORM)
    maxnorm = (1.0 - EPS_F32) / sqrt_c
    return jnp.where(norm > maxnorm, y / norm * maxnorm, y)


def _device_info():
    """Generation-aware knobs: (per-TC VMEM bytes, MXU tile width, 2-TC?, is_v5e)."""
    try:
        kind = jax.devices()[0].device_kind.lower()
    except Exception:  # pragma: no cover - keeps the wrapper importable anywhere
        kind = ""
    is_v5e = ("v5e" in kind) or ("v5 lite" in kind) or ("v5lite" in kind)
    is_v7 = "v7" in kind
    two_tc = is_v7 or ("v4" in kind) or ("v5p" in kind)     # chips with 2 TCs / megacore
    vmem_phys = (64 if is_v7 else 128) * 1024 * 1024        # per-TensorCore VMEM
    mxu_align = 128 if is_v5e else 256                      # v5e MXU 128x128, v6e/v7x 256x256
    return vmem_phys, mxu_align, two_tc, is_v5e


# --------------------------------- kernel ------------------------------------
def hyp_linear_kernel(x_ref, w_ref, b_ref, y2_ref, o_ref, acc_ref, x2_ref, *, c):
    """Grid = (row tiles, K tiles). K (in_features) is the reduction axis (last)."""
    k = pl.program_id(1)

    # --- matmul + ||x||^2 partials for this K chunk ---------------------------
    x = x_ref[...]                                   # (TM, TK), MXU operand dtype
    xf = x.astype(jnp.float32)
    x2_part = jnp.sum(xf * xf, axis=-1, keepdims=True)
    mx_part = jnp.dot(x, w_ref[...], preferred_element_type=jnp.float32)

    # fold accumulator init into the first K step (no zero-fill + read-add)
    @pl.when(k == 0)
    def _init():
        acc_ref[...] = mx_part
        x2_ref[...] = x2_part

    @pl.when(k > 0)
    def _accum():
        acc_ref[...] += mx_part
        x2_ref[...] += x2_part

    # --- nonlinear epilogue on the last K step --------------------------------
    @pl.when(k == pl.num_programs(1) - 1)
    def _epilogue():
        sqrt_c = c ** 0.5
        maxnorm = (1.0 - EPS_F32) / sqrt_c

        mx = acc_ref[...]                            # (TM, OUT_Fp)  f32
        hb = b_ref[...].astype(jnp.float32)          # (1, OUT_Fp)   hyperbolic bias
        y2 = y2_ref[0]                               # scalar sum(hb*hb), hoisted (SMEM)

        x_norm = jnp.maximum(jnp.sqrt(x2_ref[...]), MIN_NORM)        # (TM, 1)
        mx2 = jnp.sum(mx * mx, axis=-1, keepdims=True)               # (TM, 1)
        mx_norm = jnp.maximum(jnp.sqrt(mx2), MIN_NORM)

        # mobius_matvec row scale: tanh(|Wx|/|x| * artanh(sqrt_c*|x|)) / (sqrt_c*|Wx|)
        scale = (jnp.tanh(mx_norm * pl.reciprocal(x_norm, approx=True)
                          * _artanh(sqrt_c * x_norm))
                 * pl.reciprocal(mx_norm * sqrt_c, approx=True))
        scale = jnp.where(mx2 > 0.0, scale, 0.0)     # all-zero Wx rows -> origin

        # proj(mv): ||mv|| = scale * ||mx|| (scale >= 0), so it's a row rescale only.
        # Exact divide for the clip factor: keeps points strictly inside the ball.
        mv_norm = jnp.maximum(scale * mx_norm, MIN_NORM)
        s = scale * jnp.where(mv_norm > maxnorm, maxnorm / mv_norm, 1.0)
        # res = s * mx  (folded into the mobius_add below, never materialized)

        res_norm = s * mx_norm
        r2 = res_norm * res_norm                                     # sum(res*res)
        xy = s * jnp.sum(mx * hb, axis=-1, keepdims=True)            # sum(res*hb)

        a_coef = (1.0 + 2.0 * c * xy + c * y2) * s                   # (TM, 1)
        b_coef = 1.0 - c * r2                                        # (TM, 1)
        denom = jnp.maximum(1.0 + 2.0 * c * xy + (c * c) * r2 * y2, MIN_NORM)
        # reuse the accumulator as scratch for the mobius_add numerator
        acc_ref[...] = (a_coef * mx + b_coef * hb) * pl.reciprocal(denom, approx=True)
        pre = acc_ref[...]

        # final proj (exact divide for the row factor -> stays inside the ball)
        p_norm = jnp.maximum(
            jnp.sqrt(jnp.sum(pre * pre, axis=-1, keepdims=True)), MIN_NORM)
        factor = jnp.where(p_norm > maxnorm, maxnorm / p_norm, 1.0)
        o_ref[...] = (pre * factor).astype(o_ref.dtype)


# --------------------------------- wrapper -----------------------------------
def hyp_linear(x, weight, bias, c, *, tm=None, tk=None, mxu_dtype=None):
    """x: (N, in_f), weight: (out_f, in_f), bias: (out_f,) -> (N, out_f).

    mxu_dtype: optionally jnp.bfloat16 to run the MXU operands at native rate
    (epilogue math stays f32); default keeps the input dtype (exact).
    """
    n, in_f = x.shape
    out_f = weight.shape[0]
    c = float(c)
    sqrt_c = c ** 0.5
    out_dtype = x.dtype

    vmem_phys, mxu_align, two_tc, is_v5e = _device_info()
    vmem_budget = int(vmem_phys * 0.80)        # headroom for compiler scratch/semaphores

    if mxu_dtype is None:
        mxu_dtype = x.dtype
    mxu_dtype = jnp.dtype(mxu_dtype)

    # ---- per-layer precompute (hoisted out of the kernel) --------------------
    # hyperbolic bias = proj(expmap0(proj_tan0(b, c), c), c): depends only on (b, c).
    b = bias.astype(jnp.float32).reshape(1, out_f)
    b_norm = jnp.maximum(jnp.linalg.norm(b, axis=-1, keepdims=True), MIN_NORM)
    hyp_bias = _proj_ref(jnp.tanh(sqrt_c * b_norm) * b / (sqrt_c * b_norm), sqrt_c)

    # pre-transpose weight to (in_f, out_f): MXU contracts directly, no in-kernel .T
    w_t = weight.T.astype(mxu_dtype)
    x_mxu = x.astype(mxu_dtype)

    # MXU/lane-dense output: pad out_features to the MXU tile width (zero columns
    # are exactly neutral to every norm / mobius op).
    out_f_pad = _round_up(out_f, mxu_align)
    if out_f_pad != out_f:
        w_t = jnp.pad(w_t, ((0, 0), (0, out_f_pad - out_f)))
        hyp_bias = jnp.pad(hyp_bias, ((0, 0), (0, out_f_pad - out_f)))
    # sum(hb*hb) hoisted: one XLU lane-reduction total instead of one per row tile.
    y2 = jnp.sum(hyp_bias * hyp_bias, axis=-1).reshape(1).astype(jnp.float32)

    x_isz = mxu_dtype.itemsize
    o_isz = jnp.dtype(out_dtype).itemsize

    def ws_bytes(tm_, tk_):
        """Estimated VMEM working set (double-buffered tiles + f32 scratch)."""
        return (tm_ * out_f_pad * 4             # f32 accumulator scratch
                + tm_ * 4                       # sum(x*x) scratch
                + 2 * tm_ * tk_ * x_isz         # x tile (double-buffered)
                + 2 * tk_ * out_f_pad * x_isz   # weight tile (double-buffered)
                + 2 * tm_ * out_f_pad * o_isz   # output tile (double-buffered)
                + 2 * out_f_pad * 4             # bias row
                + (1 << 20))                    # misc slack

    n_rows = _round_up(max(n, 1), 8)

    # ---- K (in_features) tiling ----------------------------------------------
    # Prefer a fully-resident weight: its block index is then constant across the
    # whole grid, so it is DMA'd from HBM exactly once (no re-stream per row tile).
    if tk is None:
        if ws_bytes(min(n_rows, 64), in_f) <= vmem_budget:
            tk = in_f
        else:
            k_align = 128 if is_v5e else 256          # full MXU passes on 256-wide MXUs
            tk = 512
            while tk > k_align and ws_bytes(min(n_rows, 256), tk) > vmem_budget:
                tk //= 2
            tk = max(tk, k_align)
    if tk >= in_f:
        tk = in_f
        in_f_pad = in_f
    else:
        tk = _round_up(tk, 128)                       # lane-dense K slices of x
        in_f_pad = _round_up(in_f, tk)                # zero K columns are exactly neutral
    if in_f_pad != in_f:
        x_mxu = jnp.pad(x_mxu, ((0, 0), (0, in_f_pad - in_f)))
        w_t = jnp.pad(w_t, ((0, in_f_pad - in_f), (0, 0)))
    k_steps = in_f_pad // tk

    # ---- row (N) tiling --------------------------------------------------------
    if tm is None:
        # big tiles amortize the ~0.35us/step overhead; smaller default on 64 MiB VMEM
        tm = 512 if vmem_phys <= (64 << 20) else 1024
    tm = _round_up(max(8, min(int(tm), n_rows)), 8)
    while tm > 8 and ws_bytes(tm, tk) > vmem_budget:
        tm = max(8, _round_up(tm // 2, 8))
    # only 2-TC chips (v7x/v4/v5p) benefit from keeping the parallel row axis >= 2
    if two_tc and pl.cdiv(n, tm) < 2 and tm >= 16:
        tm = _round_up(tm // 2, 8)
    n_pad = _round_up(n, tm)
    if n_pad != n:
        x_mxu = jnp.pad(x_mxu, ((0, n_pad - n), (0, 0)))   # zero rows -> zero-row path

    # VMEM limit derived from actual tile bytes, capped at the per-generation budget.
    vmem_limit = int(min(vmem_budget, max(ws_bytes(tm, tk) + (8 << 20), 32 << 20)))

    kernel = functools.partial(hyp_linear_kernel, c=c)
    out = pl.pallas_call(
        kernel,
        out_shape=jax.ShapeDtypeStruct((n_pad, out_f_pad), out_dtype),
        grid_spec=pltpu.PrefetchScalarGridSpec(
            num_scalar_prefetch=0,
            grid=(n_pad // tm, k_steps),
            in_specs=[
                pl.BlockSpec((tm, tk), lambda i, k: (i, k)),           # x row/K tile
                pl.BlockSpec((tk, out_f_pad), lambda i, k: (k, 0)),    # weight.T K tile
                pl.BlockSpec((1, out_f_pad), lambda i, k: (0, 0)),     # hyperbolic bias
                pl.BlockSpec(memory_space=pltpu.MemorySpace.SMEM),     # sum(hb*hb) scalar
            ],
            out_specs=pl.BlockSpec((tm, out_f_pad), lambda i, k: (i, 0)),
            scratch_shapes=[
                pltpu.VMEM((tm, out_f_pad), jnp.float32),   # matmul accumulator
                pltpu.VMEM((tm, 1), jnp.float32),           # sum(x*x) accumulator
            ],
        ),
        compiler_params=pltpu.CompilerParams(
            dimension_semantics=("parallel", "arbitrary"),
            vmem_limit_bytes=vmem_limit,
        ),
    )(x_mxu, w_t, hyp_bias, y2)
    return out[:n, :out_f]


# ---------------- pure-JAX reference (for correctness check) -----------------
def hyp_linear_ref(x, weight, bias, c):
    sqrt_c = c ** 0.5
    x = x.astype(jnp.float32)
    w = weight.astype(jnp.float32)
    b = bias.astype(jnp.float32).reshape(1, -1)

    x_norm = jnp.maximum(jnp.linalg.norm(x, axis=-1, keepdims=True), MIN_NORM)
    mx = jnp.dot(x, w.T, precision=jax.lax.Precision.HIGHEST)
    mx_norm = jnp.maximum(jnp.linalg.norm(mx, axis=-1, keepdims=True), MIN_NORM)
    res_c = jnp.tanh(mx_norm / x_norm * _artanh(sqrt_c * x_norm)) * mx / (
        mx_norm * sqrt_c)
    mv = jnp.where(jnp.all(mx == 0, axis=-1, keepdims=True), 0.0, res_c)
    res = _proj_ref(mv, sqrt_c)

    b_norm = jnp.maximum(jnp.linalg.norm(b, axis=-1, keepdims=True), MIN_NORM)
    hb = _proj_ref(jnp.tanh(sqrt_c * b_norm) * b / (sqrt_c * b_norm), sqrt_c)

    x2 = jnp.sum(res * res, axis=-1, keepdims=True)
    y2 = jnp.sum(hb * hb, axis=-1, keepdims=True)
    xy = jnp.sum(res * hb, axis=-1, keepdims=True)
    num = (1 + 2 * c * xy + c * y2) * res + (1 - c * x2) * hb
    denom = jnp.maximum(1 + 2 * c * xy + c * c * x2 * y2, MIN_NORM)
    return _proj_ref(num / denom, sqrt_c)


if __name__ == "__main__":
    key = jax.random.PRNGKey(0)
    k_x, k_w, k_b = jax.random.split(key, 3)

    N, IN_F, OUT_F = 200, 16, 32          # N not a multiple of the tile -> exercises padding
    C = 1.0

    # xavier_uniform_(weight, gain=sqrt(2)); bias = 0 in the module — use a small
    # nonzero bias here so the bias path is actually exercised.
    gain = math.sqrt(2.0)
    bound = gain * math.sqrt(6.0 / (IN_F + OUT_F))
    weight = jax.random.uniform(
        k_w, (OUT_F, IN_F), jnp.float32, minval=-bound, maxval=bound)
    bias = 0.01 * jax.random.normal(k_b, (OUT_F,), jnp.float32)

    # inputs: points inside the unit Poincare ball
    x = 0.1 * jax.random.normal(k_x, (N, IN_F), jnp.float32)

    out = hyp_linear(x, weight, bias, C)
    out = jax.block_until_ready(out)

    ref = hyp_linear_ref(x, weight, bias, C)
    assert out.shape == (N, OUT_F)
    max_err = float(jnp.max(jnp.abs(out - ref)))
    # tolerance covers the EUP approximate reciprocals (pl.reciprocal(approx=True))
    assert jnp.allclose(out, ref, rtol=5e-3, atol=1e-3), max_err

    print("KERNEL_OK")
</pallas_src>

<mosaic_0001>
module attributes {stable_mosaic.version = 11 : i64} {
  func.func @hyp_linear_kernel(%arg0: i32, %arg1: i32, %arg2: memref<200x16xf32, #tpu.memory_space<vmem>>, %arg3: memref<16x256xf32, #tpu.memory_space<vmem>>, %arg4: memref<1x256xf32, #tpu.memory_space<vmem>>, %arg5: memref<1xf32, #tpu.memory_space<smem>>, %arg6: memref<200x256xf32, #tpu.memory_space<vmem>>, %arg7: memref<200x256xf32, #tpu.memory_space<vmem>>, %arg8: memref<200x1xf32, #tpu.memory_space<vmem>>) attributes {dimension_semantics = [#tpu.dimension_semantics<parallel>, #tpu.dimension_semantics<arbitrary>], iteration_bounds = array<i64: 1, 1>, scalar_prefetch = 0 : i64, scratch_operands = 2 : i64, tpu.core_type = #tpu.core_type<tc>, window_params = [{transform_indices = @transform_0, window_bounds = array<i64: 200, 16>}, {transform_indices = @transform_1, window_bounds = array<i64: 16, 256>}, {pipeline_mode = #tpu.pipeline_mode<synchronous>, transform_indices = @transform_2, window_bounds = array<i64: 1, 256>}, {transform_indices = @transform_3, window_bounds = array<i64: 1>}, {transform_indices = @transform_4, window_bounds = array<i64: 200, 256>}]} {
    %c0 = arith.constant 0 : index
    %c0_0 = arith.constant 0 : index
    %0 = vector.load %arg2[%c0, %c0_0] : memref<200x16xf32, #tpu.memory_space<vmem>>, vector<200x16xf32>
    %1 = arith.mulf %0, %0 : vector<200x16xf32>
    %cst = arith.constant dense<0.000000e+00> : vector<200xf32>
    %2 = vector.multi_reduction <add>, %1, %cst [1] : vector<200x16xf32> to vector<200xf32>
    %3 = vector.shape_cast %2 : vector<200xf32> to vector<200x1xf32>
    %c0_1 = arith.constant 0 : index
    %c0_2 = arith.constant 0 : index
    %4 = vector.load %arg3[%c0_1, %c0_2] : memref<16x256xf32, #tpu.memory_space<vmem>>, vector<16x256xf32>
    %cst_3 = arith.constant dense<0.000000e+00> : vector<200x256xf32>
    %5 = tpu.matmul %0, %4, %cst_3 {dimension_numbers = #tpu.dot_dimension_numbers<[1], [0], [0], [1], [0, 0, 1, 1], [], []>} : vector<200x16xf32>, vector<16x256xf32>, vector<200x256xf32> -> vector<200x256xf32>
    %c0_i32 = arith.constant 0 : i32
    %6 = arith.cmpi eq, %arg1, %c0_i32 : i32
    %7 = arith.extui %6 : i1 to i32
    %c0_i32_4 = arith.constant 0 : i32
    %8 = arith.cmpi ne, %7, %c0_i32_4 : i32
    scf.if %8 {
      %c0_9 = arith.constant 0 : index
      %c0_10 = arith.constant 0 : index
      %15 = vector.load %arg7[%c0_9, %c0_10] : memref<200x256xf32, #tpu.memory_space<vmem>>, vector<200x256xf32>
      tpu.vector_store %arg7[%c0_9, %c0_10], %5 {strides = array<i32>} : memref<200x256xf32, #tpu.memory_space<vmem>>, vector<200x256xf32>,
      %c0_11 = arith.constant 0 : index
      %c0_12 = arith.constant 0 : index
      %16 = vector.load %arg8[%c0_11, %c0_12] : memref<200x1xf32, #tpu.memory_space<vmem>>, vector<200x1xf32>
      tpu.vector_store %arg8[%c0_11, %c0_12], %3 {strides = array<i32>} : memref<200x1xf32, #tpu.memory_space<vmem>>, vector<200x1xf32>,
    } else {
    }
    %c0_i32_5 = arith.constant 0 : i32
    %9 = arith.cmpi sgt, %arg1, %c0_i32_5 : i32
    %10 = arith.extui %9 : i1 to i32
    %c0_i32_6 = arith.constant 0 : i32
    %11 = arith.cmpi ne, %10, %c0_i32_6 : i32
    scf.if %11 {
      %c0_9 = arith.constant 0 : index
      %c0_10 = arith.constant 0 : index
      %15 = vector.load %arg7[%c0_9, %c0_10] : memref<200x256xf32, #tpu.memory_space<vmem>>, vector<200x256xf32>
      %16 = arith.addf %15, %5 : vector<200x256xf32>
      %c0_11 = arith.constant 0 : index
      %c0_12 = arith.constant 0 : index
      %17 = vector.load %arg7[%c0_11, %c0_12] : memref<200x256xf32, #tpu.memory_space<vmem>>, vector<200x256xf32>
      tpu.vector_store %arg7[%c0_11, %c0_12], %16 {strides = array<i32>} : memref<200x256xf32, #tpu.memory_space<vmem>>, vector<200x256xf32>,
      %c0_13 = arith.constant 0 : index
      %c0_14 = arith.constant 0 : index
      %18 = vector.load %arg8[%c0_13, %c0_14] : memref<200x1xf32, #tpu.memory_space<vmem>>, vector<200x1xf32>
      %19 = arith.addf %18, %3 : vector<200x1xf32>
      %c0_15 = arith.constant 0 : index
      %c0_16 = arith.constant 0 : index
      %20 = vector.load %arg8[%c0_15, %c0_16] : memref<200x1xf32, #tpu.memory_space<vmem>>, vector<200x1xf32>
      tpu.vector_store %arg8[%c0_15, %c0_16], %19 {strides = array<i32>} : memref<200x1xf32, #tpu.memory_space<vmem>>, vector<200x1xf32>,
    } else {
    }
    %c0_i32_7 = arith.constant 0 : i32
    %12 = arith.cmpi eq, %arg1, %c0_i32_7 : i32
    %13 = arith.extui %12 : i1 to i32
    %c0_i32_8 = arith.constant 0 : i32
    %14 = arith.cmpi ne, %13, %c0_i32_8 : i32
    scf.if %14 {
      %c0_9 = arith.constant 0 : index
      %c0_10 = arith.constant 0 : index
      %15 = vector.load %arg7[%c0_9, %c0_10] : memref<200x256xf32, #tpu.memory_space<vmem>>, vector<200x256xf32>
      %c0_11 = arith.constant 0 : index
      %c0_12 = arith.constant 0 : index
      %16 = vector.load %arg4[%c0_11, %c0_12] : memref<1x256xf32, #tpu.memory_space<vmem>>, vector<1x256xf32>
      %c0_13 = arith.constant 0 : index
      %17 = memref.load %arg5[%c0_13] : memref<1xf32, #tpu.memory_space<smem>>
      %c0_14 = arith.constant 0 : index
      %c0_15 = arith.constant 0 : index
      %18 = vector.load %arg8[%c0_14, %c0_15] : memref<200x1xf32, #tpu.memory_space<vmem>>, vector<200x1xf32>
      %19 = math.sqrt %18 : vector<200x1xf32>
      %cst_16 = arith.constant 1.000000e-15 : f32
      %20 = vector.broadcast %cst_16 : f32 to vector<200x1xf32>
      %21 = arith.maximumf %19, %20 : vector<200x1xf32>
      %22 = arith.mulf %15, %15 : vector<200x256xf32>
      %cst_17 = arith.constant dense<0.000000e+00> : vector<200xf32>
      %23 = vector.multi_reduction <add>, %22, %cst_17 [1] : vector<200x256xf32> to vector<200xf32>
      %24 = vector.shape_cast %23 : vector<200xf32> to vector<200x1xf32>
      %25 = math.sqrt %24 : vector<200x1xf32>
      %cst_18 = arith.constant 1.000000e-15 : f32
      %26 = vector.broadcast %cst_18 : f32 to vector<200x1xf32>
      %27 = arith.maximumf %25, %26 : vector<200x1xf32>
      %28 = tpu.reciprocal %21 {approx = true} : vector<200x1xf32> -> vector<200x1xf32>
      %29 = arith.mulf %27, %28 : vector<200x1xf32>
      %cst_19 = arith.constant 1.000000e+00 : f32
      %30 = vector.broadcast %cst_19 : f32 to vector<200x1xf32>
      %31 = arith.mulf %30, %21 : vector<200x1xf32>
      %cst_20 = arith.constant -0.99999988 : f32
      %cst_21 = arith.constant 0.99999988 : f32
      %32 = vector.broadcast %cst_20 : f32 to vector<200x1xf32>
      %33 = arith.maximumf %32, %31 : vector<200x1xf32>
      %34 = vector.broadcast %cst_21 : f32 to vector<200x1xf32>
      %35 = arith.minimumf %34, %33 : vector<200x1xf32>
      %cst_22 = arith.constant 1.000000e+00 : f32
      %36 = vector.broadcast %cst_22 : f32 to vector<200x1xf32>
      %37 = arith.addf %36, %35 : vector<200x1xf32>
      %cst_23 = arith.constant 1.000000e+00 : f32
      %38 = vector.broadcast %cst_23 : f32 to vector<200x1xf32>
      %39 = arith.subf %38, %35 : vector<200x1xf32>
      %40 = arith.divf %37, %39 : vector<200x1xf32>
      %41 = math.log %40 : vector<200x1xf32>
      %cst_24 = arith.constant 5.000000e-01 : f32
      %42 = vector.broadcast %cst_24 : f32 to vector<200x1xf32>
      %43 = arith.mulf %42, %41 : vector<200x1xf32>
      %44 = arith.mulf %29, %43 : vector<200x1xf32>
      %45 = math.tanh %44 : vector<200x1xf32>
      %cst_25 = arith.constant 1.000000e+00 : f32
      %46 = vector.broadcast %cst_25 : f32 to vector<200x1xf32>
      %47 = arith.mulf %27, %46 : vector<200x1xf32>
      %48 = tpu.reciprocal %47 {approx = true} : vector<200x1xf32> -> vector<200x1xf32>
      %49 = arith.mulf %45, %48 : vector<200x1xf32>
      %cst_26 = arith.constant 0.000000e+00 : f32
      %50 = vector.broadcast %cst_26 : f32 to vector<200x1xf32>
      %51 = arith.cmpf ogt, %24, %50 : vector<200x1xf32>
      %cst_27 = arith.constant 0.000000e+00 : f32
      %52 = vector.broadcast %cst_27 : f32 to vector<200x1xf32>
      %53 = arith.select %51, %49, %52 : vector<200x1xi1>, vector<200x1xf32>
      %54 = arith.mulf %53, %27 : vector<200x1xf32>
      %cst_28 = arith.constant 1.000000e-15 : f32
      %55 = vector.broadcast %cst_28 : f32 to vector<200x1xf32>
      %56 = arith.maximumf %54, %55 : vector<200x1xf32>
      %cst_29 = arith.constant 0.995999991 : f32
      %57 = vector.broadcast %cst_29 : f32 to vector<200x1xf32>
      %58 = arith.cmpf ogt, %56, %57 : vector<200x1xf32>
      %cst_30 = arith.constant 0.995999991 : f32
      %59 = vector.broadcast %cst_30 : f32 to vector<200x1xf32>
      %60 = arith.divf %59, %56 : vector<200x1xf32>
      %cst_31 = arith.constant 1.000000e+00 : f32
      %61 = vector.broadcast %cst_31 : f32 to vector<200x1xf32>
      %62 = arith.select %58, %60, %61 : vector<200x1xi1>, vector<200x1xf32>
      %63 = arith.mulf %53, %62 : vector<200x1xf32>
      %64 = arith.mulf %63, %27 : vector<200x1xf32>
      %65 = arith.mulf %64, %64 : vector<200x1xf32>
      %66 = vector.broadcast %16 : vector<1x256xf32> to vector<200x256xf32>
      %67 = arith.mulf %15, %66 : vector<200x256xf32>
      %cst_32 = arith.constant dense<0.000000e+00> : vector<200xf32>
      %68 = vector.multi_reduction <add>, %67, %cst_32 [1] : vector<200x256xf32> to vector<200xf32>
      %69 = vector.shape_cast %68 : vector<200xf32> to vector<200x1xf32>
      %70 = arith.mulf %63, %69 : vector<200x1xf32>
      %cst_33 = arith.constant 2.000000e+00 : f32
      %71 = vector.broadcast %cst_33 : f32 to vector<200x1xf32>
      %72 = arith.mulf %71, %70 : vector<200x1xf32>
      %cst_34 = arith.constant 1.000000e+00 : f32
      %73 = vector.broadcast %cst_34 : f32 to vector<200x1xf32>
      %74 = arith.addf %73, %72 : vector<200x1xf32>
      %cst_35 = arith.constant 1.000000e+00 : f32
      %75 = arith.mulf %cst_35, %17 : f32
      %76 = vector.broadcast %75 : f32 to vector<200x1xf32>
      %77 = arith.addf %74, %76 : vector<200x1xf32>
      %78 = arith.mulf %77, %63 : vector<200x1xf32>
      %cst_36 = arith.constant 1.000000e+00 : f32
      %79 = vector.broadcast %cst_36 : f32 to vector<200x1xf32>
      %80 = arith.mulf %79, %65 : vector<200x1xf32>
      %cst_37 = arith.constant 1.000000e+00 : f32
      %81 = vector.broadcast %cst_37 : f32 to vector<200x1xf32>
      %82 = arith.subf %81, %80 : vector<200x1xf32>
      %cst_38 = arith.constant 2.000000e+00 : f32
      %83 = vector.broadcast %cst_38 : f32 to vector<200x1xf32>
      %84 = arith.mulf %83, %70 : vector<200x1xf32>
      %cst_39 = arith.constant 1.000000e+00 : f32
      %85 = vector.broadcast %cst_39 : f32 to vector<200x1xf32>
      %86 = arith.addf %85, %84 : vector<200x1xf32>
      %cst_40 = arith.constant 1.000000e+00 : f32
      %87 = vector.broadcast %cst_40 : f32 to vector<200x1xf32>
      %88 = arith.mulf %87, %65 : vector<200x1xf32>
      %89 = vector.broadcast %17 : f32 to vector<200x1xf32>
      %90 = arith.mulf %88, %89 : vector<200x1xf32>
      %91 = arith.addf %86, %90 : vector<200x1xf32>
      %cst_41 = arith.constant 1.000000e-15 : f32
      %92 = vector.broadcast %cst_41 : f32 to vector<200x1xf32>
      %93 = arith.maximumf %91, %92 : vector<200x1xf32>
      %94 = vector.broadcast %78 : vector<200x1xf32> to vector<200x256xf32>
      %95 = arith.mulf %94, %15 : vector<200x256xf32>
      %96 = vector.broadcast %82 : vector<200x1xf32> to vector<200x256xf32>
      %97 = vector.broadcast %16 : vector<1x256xf32> to vector<200x256xf32>
      %98 = arith.mulf %96, %97 : vector<200x256xf32>
      %99 = arith.addf %95, %98 : vector<200x256xf32>
      %100 = tpu.reciprocal %93 {approx = true} : vector<200x1xf32> -> vector<200x1xf32>
      %101 = vector.broadcast %100 : vector<200x1xf32> to vector<200x256xf32>
      %102 = arith.mulf %99, %101 : vector<200x256xf32>
      %c0_42 = arith.constant 0 : index
      %c0_43 = arith.constant 0 : index
      %103 = vector.load %arg7[%c0_42, %c0_43] : memref<200x256xf32, #tpu.memory_space<vmem>>, vector<200x256xf32>
      tpu.vector_store %arg7[%c0_42, %c0_43], %102 {strides = array<i32>} : memref<200x256xf32, #tpu.memory_space<vmem>>, vector<200x256xf32>,
      %c0_44 = arith.constant 0 : index
      %c0_45 = arith.constant 0 : index
      %104 = vector.load %arg7[%c0_44, %c0_45] : memref<200x256xf32, #tpu.memory_space<vmem>>, vector<200x256xf32>
      %105 = arith.mulf %104, %104 : vector<200x256xf32>
      %cst_46 = arith.constant dense<0.000000e+00> : vector<200xf32>
      %106 = vector.multi_reduction <add>, %105, %cst_46 [1] : vector<200x256xf32> to vector<200xf32>
      %107 = vector.shape_cast %106 : vector<200xf32> to vector<200x1xf32>
      %108 = math.sqrt %107 : vector<200x1xf32>
      %cst_47 = arith.constant 1.000000e-15 : f32
      %109 = vector.broadcast %cst_47 : f32 to vector<200x1xf32>
      %110 = arith.maximumf %108, %109 : vector<200x1xf32>
      %cst_48 = arith.constant 0.995999991 : f32
      %111 = vector.broadcast %cst_48 : f32 to vector<200x1xf32>
      %112 = arith.cmpf ogt, %110, %111 : vector<200x1xf32>
      %cst_49 = arith.constant 0.995999991 : f32
      %113 = vector.broadcast %cst_49 : f32 to vector<200x1xf32>
      %114 = arith.divf %113, %110 : vector<200x1xf32>
      %cst_50 = arith.constant 1.000000e+00 : f32
      %115 = vector.broadcast %cst_50 : f32 to vector<200x1xf32>
      %116 = arith.select %112, %114, %115 : vector<200x1xi1>, vector<200x1xf32>
      %117 = vector.broadcast %116 : vector<200x1xf32> to vector<200x256xf32>
      %118 = arith.mulf %104, %117 : vector<200x256xf32>
      %c0_51 = arith.constant 0 : index
      %c0_52 = arith.constant 0 : index
      %119 = vector.load %arg6[%c0_51, %c0_52] : memref<200x256xf32, #tpu.memory_space<vmem>>, vector<200x256xf32>
      tpu.vector_store %arg6[%c0_51, %c0_52], %118 {strides = array<i32>} : memref<200x256xf32, #tpu.memory_space<vmem>>, vector<200x256xf32>,
    } else {
    }
    return
  }
  func.func @transform_0(%arg0: i32, %arg1: i32) -> (i32, i32) {
    %c0_i32 = arith.constant 0 : i32
    return %arg0, %arg1 : i32, i32
  }
  func.func @transform_1(%arg0: i32, %arg1: i32) -> (i32, i32) {
    %c0_i32 = arith.constant 0 : i32
    %c0_i32_0 = arith.constant 0 : i32
    return %arg1, %c0_i32 : i32, i32
  }
  func.func @transform_2(%arg0: i32, %arg1: i32) -> (i32, i32) {
    %c0_i32 = arith.constant 0 : i32
    %c0_i32_0 = arith.constant 0 : i32
    %c0_i32_1 = arith.constant 0 : i32
    return %c0_i32, %c0_i32_0 : i32, i32
  }
  func.func @transform_3(%arg0: i32, %arg1: i32) -> i32 {
    %c0_i32 = arith.constant 0 : i32
    %c0_i32_0 = arith.constant 0 : i32
    return %c0_i32 : i32
  }
  func.func @transform_4(%arg0: i32, %arg1: i32) -> (i32, i32) {
    %c0_i32 = arith.constant 0 : i32
    %c0_i32_0 = arith.constant 0 : i32
    return %arg0, %c0_i32 : i32, i32
  }
}

</mosaic_0001>

<bundles_post_ra>
// kernel: tpu_custom_call.1
= control target key start
LH: loop header
LB: loop body
LE: loop exit
PB: predicated region body
PF: predicated region fallthrough
CT: control target
= control target key end

     0   :  { %v4244_v5 = vmov 0.0   ;;  %vm69_vm0 = vcmask 130048   ;;  %s7434_s0 = inlined_call_operand.vmem [shape: f32[200,16], index: 0, kind: input, shape index: {}]   ;;  %s7435_s1 = inlined_call_operand.vmem [shape: f32[16,256], index: 1, kind: input, shape index: {}]   ;;  %s7436_s2 = inlined_call_operand.vmem [shape: f32[1,256], index: 2, kind: input, shape index: {}]   ;;  %s7437_s3 = inlined_call_operand.<no memory space> [shape: f32[1], index: 3, kind: input, shape index: {}]   ;;  %s7438_s4 = inlined_call_operand.hbm [shape: f32[200,256], index: 4, kind: output, shape index: {}]  }
   0x1   :  { %v146_v0 = vld [vmem:[%s7435_s1 + $0x8] sm:$0xff]  ;;  %v148_v1 = vld [vmem:[%s7435_s1 + $0x18] sm:$0xff]  ;;  %v145_v2 = vld [vmem:[%s7435_s1] sm:$0xff]  ;;  %288 = vmatprep.mubr.f32.mxu0 %v4244_v5  ;;  %366 = vmatprep.mubr.f32.mxu1 %v4244_v5 }
   0x2   :  { %v3657_v3 = vpack.c.bf16 %v148_v1, %v146_v0  ;;  %v147_v4 = vld [vmem:[%s7435_s1 + $0x10] sm:$0xff]  ;;  %v19_v6 = vld [vmem:[%s7434_s0] sm:$0xff]  ;;  %v20_v8 = vld [vmem:[%s7434_s0 + $0x8] sm:$0xff] }
   0x3   :  { %v3659_v7 = vpack.c.bf16 %v147_v4, %v145_v2  ;;  %v21_v9 = vld [vmem:[%s7434_s0 + $0x10] sm:$0xff]  ;;  %v44_v10 = vmul.f32 %v19_v6, %v19_v6  ;;  %v22_v11 = vld [vmem:[%s7434_s0 + $0x18] sm:$0xff]  ;;  %v45_v13 = vmul.f32 %v20_v8, %v20_v8  ;;  %v4303_v14 = vld [vmem:[%s7434_s0 + $0x68] sm:$0xff] }
   0x4   :  { %3658 = vmatprep.subr.bf16.mxu0 %v3657_v3  ;;  %3661 = vmatprep.subr.bf16.mxu1 %v3657_v3  ;;  %v46_v12 = vmul.f32 %v21_v9, %v21_v9  ;;  %v47_v15 = vmul.f32 %v22_v11, %v22_v11  ;;  %v23_v17 = vld [vmem:[%s7434_s0 + $0x20] sm:$0xff]  ;;  %v4313_v19 = vld [vmem:[%s7434_s0 + $0x28] sm:$0xff]  ;;  %v33_v24 = vld [vmem:[%s7434_s0 + $0x70] sm:$0xff] }
   0x5   :  { %3660 = vmatpush1.bf16.msra.mxu0 %v3659_v7  ;;  %3662 = vmatpush1.bf16.msra.mxu1 %v3659_v7  ;;  %v70_v16 = vsel %vm69_vm0, %v44_v10, 0.0  ;;  %v73_v20 = vsel %vm69_vm0, %v45_v13, 0.0  ;;  %v48_v21 = vmul.f32 %v23_v17, %v23_v17  ;;  %v49_v23 = vmul.f32 %v4313_v19, %v4313_v19  ;;  %v4330_v25 = vld [vmem:[%s7434_s0 + $0x30] sm:$0xff] }
   0x6   :  { %v76_v18 = vsel %vm69_vm0, %v46_v12, 0.0  ;;  %71 = vadd.xlane.f32.xlu0 %v70_v16  ;;  %v79_v22 = vsel %vm69_vm0, %v47_v15, 0.0 }
   0x7   :  { %77 = vadd.xlane.f32.xlu1 %v76_v18 }
   0x8   :  { %3607 = vmatmul.mubr.msk.f32.vlgmr.msra.gmra.mrb[0].mxu0 %vm69_vm0, %v19_v6  ;;  %3620 = vmatmul.mubr.msk.f32.vlgmr.msra.gmra.mrb[0].mxu1 %vm69_vm0, %v4303_v14 }
   0x9   :  { %372 = vmatprep.mubr.f32.mxu1 %v4244_v5  ;;  %294 = vmatprep.mubr.f32.mxu0 %v4244_v5 }
   0xa   :  { %74 = vadd.xlane.f32.xlu0 %v73_v20 }
   0xb   :  { %10 = vsyncpa [#allocation6], 0  ;;  %v4335_v26 = vld [vmem:[%s7434_s0 + $0x38] sm:$0xff]  ;;  %80 = vadd.xlane.f32.xlu1 %v79_v22  ;;  %v82_v27 = vsel %vm69_vm0, %v48_v21, 0.0  ;;  %v50_v28 = vmul.f32 %v4330_v25, %v4330_v25  ;;  %v85_v29 = vsel %vm69_vm0, %v49_v23, 0.0  ;;  %v4353_v32 = vld [vmem:[%s7434_s0 + $0x40] sm:$0xff]  ;;  %v57_v50 = vmul.f32 %v4303_v14, %v4303_v14 }
   0xc   :  { %3621 = vmatmul.mubr.msk.f32.gmra.mrb[2].mxu1 %vm69_vm0, %v33_v24  ;;  %3608 = vmatmul.mubr.msk.f32.gmra.mrb[2].mxu0 %vm69_vm0, %v20_v8  ;;  %v51_v30 = vmul.f32 %v4335_v26, %v4335_v26  ;;  %v34_v31 = vld [vmem:[%s7434_s0 + $0x78] sm:$0xff]  ;;  %v4358_v33 = vld [vmem:[%s7434_s0 + $0x48] sm:$0xff]  ;;  %v52_v35 = vmul.f32 %v4353_v32, %v4353_v32  ;;  %v35_v38 = vld [vmem:[%s7434_s0 + $0x80] sm:$0xff]  ;;  %v58_v53 = vmul.f32 %v33_v24, %v33_v24  ;;  %vm493_vm1 = vcmask 7168  }
   0xd   :  { %300 = vmatprep.mubr.f32.mxu0 %v4244_v5  ;;  %378 = vmatprep.mubr.f32.mxu1 %v4244_v5  ;;  %v88_v34 = vsel %vm69_vm0, %v50_v28, 0.0  ;;  %v53_v37 = vmul.f32 %v4358_v33, %v4358_v33  ;;  %v4376_v39 = vld [vmem:[%s7434_s0 + $0x50] sm:$0xff]  ;;  %v4381_v40 = vld [vmem:[%s7434_s0 + $0x58] sm:$0xff]  ;;  %v36_v45 = vld [vmem:[%s7434_s0 + $0x88] sm:$0xff]  ;;  %v109_v54 = vsel %vm69_vm0, %v57_v50, 0.0  ;;  %v59_v55 = vmul.f32 %v34_v31, %v34_v31 }
   0xe   :  { %83 = vadd.xlane.f32.xlu0 %v82_v27  ;;  %v91_v36 = vsel %vm69_vm0, %v51_v30, 0.0  ;;  %v94_v41 = vsel %vm69_vm0, %v52_v35, 0.0  ;;  %v54_v42 = vmul.f32 %v4376_v39, %v4376_v39  ;;  %v55_v44 = vmul.f32 %v4381_v40, %v4381_v40  ;;  %v4399_v46 = vld [vmem:[%s7434_s0 + $0x60] sm:$0xff]  ;;  %v37_v51 = vld [vmem:[%s7434_s0 + $0x90] sm:$0xff]  ;;  %v38_v56 = vld [vmem:[%s7434_s0 + $0x98] sm:$0xff] }
   0xf   :  { %86 = vadd.xlane.f32.xlu1 %v85_v29  ;;  %v97_v43 = vsel %vm69_vm0, %v53_v37, 0.0  ;;  %v56_v48 = vmul.f32 %v4399_v46, %v4399_v46  ;;  %v112_v57 = vsel %vm69_vm0, %v58_v53, 0.0  ;;  %v60_v58 = vmul.f32 %v35_v38, %v35_v38  ;;  %v39_v61 = vld [vmem:[%s7434_s0 + $0xa0] sm:$0xff]  ;;  %v40_v2 = vld [vmem:[%s7434_s0 + $0xa8] sm:$0xff]  ;;  %v41_v8 = vld [vmem:[%s7434_s0 + $0xb0] sm:$0xff] }
  0x10   :  { %3609 = vmatmul.mubr.msk.f32.gmra.mrb[4].mxu0 %vm69_vm0, %v21_v9  ;;  %3622 = vmatmul.mubr.msk.f32.gmra.mrb[4].mxu1 %vm69_vm0, %v34_v31  ;;  %v100_v47 = vsel %vm69_vm0, %v54_v42, 0.0  ;;  %v103_v49 = vsel %vm69_vm0, %v55_v44, 0.0  ;;  %v115_v59 = vsel %vm69_vm0, %v59_v55, 0.0  ;;  %v61_v60 = vmul.f32 %v36_v45, %v36_v45  ;;  %v42_v9 = vld [vmem:[%s7434_s0 + $0xb8] sm:$0xff]  ;;  %v43_v14 = vld [vmem:[%s7434_s0 + $0xc0] sm:$0xff] }
  0x11   :  { %306 = vmatprep.mubr.f32.mxu0 %v4244_v5  ;;  %384 = vmatprep.mubr.f32.mxu1 %v4244_v5  ;;  %v106_v52 = vsel %vm69_vm0, %v56_v48, 0.0  ;;  %v118_v62 = vsel %vm69_vm0, %v60_v58, 0.0  ;;  %v62_v63 = vmul.f32 %v37_v51, %v37_v51  ;;  %v63_v1 = vmul.f32 %v38_v56, %v38_v56 }
  0x12   :  { %89 = vadd.xlane.f32.xlu0 %v88_v34  ;;  %v121_v0 = vsel %vm69_vm0, %v61_v60, 0.0  ;;  %v64_v4 = vmul.f32 %v39_v61, %v39_v61  ;;  %v65_v7 = vmul.f32 %v40_v2, %v40_v2  ;;  %v67_v13 = vmul.f32 %v42_v9, %v42_v9 }
  0x13   :  { %92 = vadd.xlane.f32.xlu1 %v91_v36  ;;  %v124_v3 = vsel %vm69_vm0, %v62_v63, 0.0  ;;  %v127_v6 = vsel %vm69_vm0, %v63_v1, 0.0  ;;  %v68_v16 = vmul.f32 %v43_v14, %v43_v14 }
  0x14   :  { %3610 = vmatmul.mubr.msk.f32.gmra.mrb[6].mxu0 %vm69_vm0, %v22_v11  ;;  %3623 = vmatmul.mubr.msk.f32.gmra.mrb[6].mxu1 %vm69_vm0, %v35_v38  ;;  %v130_v10 = vsel %vm69_vm0, %v64_v4, 0.0  ;;  %v66_v11 = vmul.f32 %v41_v8, %v41_v8  ;;  %v133_v12 = vsel %vm69_vm0, %v65_v7, 0.0 }
  0x15   :  { %312 = vmatprep.mubr.f32.mxu0 %v4244_v5  ;;  %390 = vmatprep.mubr.f32.mxu1 %v4244_v5  ;;  %v142_v18 = vsel %vm69_vm0, %v68_v16, 0.0 }
  0x16   :  { %95 = vadd.xlane.f32.xlu0 %v94_v41  ;;  %v136_v15 = vsel %vm69_vm0, %v66_v11, 0.0 }
  0x17   :  { %98 = vadd.xlane.f32.xlu1 %v97_v43 }
  0x18   :  { %3611 = vmatmul.mubr.msk.f32.gmra.mrb[8].mxu0 %vm69_vm0, %v23_v17  ;;  %3624 = vmatmul.mubr.msk.f32.gmra.mrb[8].mxu1 %vm69_vm0, %v36_v45  ;;  %v139_v17 = vsel %vm69_vm0, %v67_v13, 0.0 }
  0x19   :  { %318 = vmatprep.mubr.f32.mxu0 %v4244_v5  ;;  %396 = vmatprep.mubr.f32.mxu1 %v4244_v5 }
  0x1a   :  { %101 = vadd.xlane.f32.xlu0 %v100_v47 }
  0x1b   :  { %104 = vadd.xlane.f32.xlu1 %v103_v49 }
  0x1c   :  { %3612 = vmatmul.mubr.msk.f32.gmra.mrb[10].mxu0 %vm69_vm0, %v4313_v19  ;;  %3625 = vmatmul.mubr.msk.f32.gmra.mrb[10].mxu1 %vm69_vm0, %v37_v51 }
  0x1d   :  { %324 = vmatprep.mubr.f32.mxu0 %v4244_v5  ;;  %402 = vmatprep.mubr.f32.mxu1 %v4244_v5 }
  0x1e   :  { %107 = vadd.xlane.f32.xlu0 %v106_v52 }
  0x1f   :  { %110 = vadd.xlane.f32.xlu1 %v109_v54 }
  0x20   :  { %3613 = vmatmul.mubr.msk.f32.gmra.mrb[12].mxu0 %vm69_vm0, %v4330_v25  ;;  %3626 = vmatmul.mubr.msk.f32.gmra.mrb[12].mxu1 %vm69_vm0, %v38_v56 }
  0x21   :  { %330 = vmatprep.mubr.f32.mxu0 %v4244_v5  ;;  %408 = vmatprep.mubr.f32.mxu1 %v4244_v5 }
  0x22   :  { %113 = vadd.xlane.f32.xlu0 %v112_v57 }
  0x23   :  { %116 = vadd.xlane.f32.xlu1 %v115_v59 }
  0x24   :  { %3614 = vmatmul.mubr.msk.f32.gmra.mrb[14].mxu0 %vm69_vm0, %v4335_v26  ;;  %3627 = vmatmul.mubr.msk.f32.gmra.mrb[14].mxu1 %vm69_vm0, %v39_v61 }
  0x25   :  { %336 = vmatprep.mubr.f32.mxu0 %v4244_v5  ;;  %414 = vmatprep.mubr.f32.mxu1 %v4244_v5 }
  0x26   :  { %119 = vadd.xlane.f32.xlu0 %v118_v62 }
  0x27   :  { %122 = vadd.xlane.f32.xlu1 %v121_v0 }
  0x28   :  { %3615 = vmatmul.mubr.msk.f32.gmra.mrb[16].mxu0 %vm69_vm0, %v4353_v32  ;;  %3628 = vmatmul.mubr.msk.f32.gmra.mrb[16].mxu1 %vm69_vm0, %v40_v2 }
  0x29   :  { %342 = vmatprep.mubr.f32.mxu0 %v4244_v5  ;;  %420 = vmatprep.mubr.f32.mxu1 %v4244_v5 }
  0x2a   :  { %125 = vadd.xlane.f32.xlu0 %v124_v3 }
  0x2b   :  { %128 = vadd.xlane.f32.xlu1 %v127_v6 }
  0x2c   :  { %3616 = vmatmul.mubr.msk.f32.gmra.mrb[18].mxu0 %vm69_vm0, %v4358_v33  ;;  %3629 = vmatmul.mubr.msk.f32.gmra.mrb[18].mxu1 %vm69_vm0, %v41_v8 }
  0x2d   :  { %348 = vmatprep.mubr.f32.mxu0 %v4244_v5  ;;  %426 = vmatprep.mubr.f32.mxu1 %v4244_v5 }
  0x2e   :  { %131 = vadd.xlane.f32.xlu0 %v130_v10 }
  0x2f   :  { %134 = vadd.xlane.f32.xlu1 %v133_v12 }
  0x30   :  { %3617 = vmatmul.mubr.msk.f32.gmra.mrb[20].mxu0 %vm69_vm0, %v4376_v39  ;;  %3630 = vmatmul.mubr.msk.f32.gmra.mrb[20].mxu1 %vm69_vm0, %v42_v9  ;;  %v2005_v39 = vlaneseq }
  0x31   :  { %354 = vmatprep.mubr.f32.mxu0 %v4244_v5  ;;  %432 = vmatprep.mubr.f32.mxu1 %v4244_v5 }
  0x32   :  { %137 = vadd.xlane.f32.xlu0 %v136_v15  ;;  %v2006_v42 = vshrl.u32 %v2005_v39, 7 }
  0x33   :  { %140 = vadd.xlane.f32.xlu1 %v139_v17 }
  0x34   :  { %3618 = vmatmul.mubr.msk.f32.gmra.mrb[22].mxu0 %vm69_vm0, %v4381_v40  ;;  %3631 = vmatmul.mubr.msk.f32.gmra.mrb[22].mxu1 %vm69_vm0, %v43_v14  ;;  %v2007_v45 = vsub.s32 0, %v2006_v42  ;;  %v2011_v47 = vsub.s32 1, %v2006_v42 }
  0x35   :  { %360 = vmatprep.mubr.f32.mxu0 %v4244_v5 }
  0x36   :  { %143 = vadd.xlane.f32.xlu0 %v142_v18 }
  0x38   :  { %3619 = vmatmul.mubr.msk.f32.gmra.mrb[24].mxu0 %vm69_vm0, %v4399_v46  ;;  %v802_v46 = vld [vmem:[%s7436_s2] sm:$0x3] }
  0x39   :  { %v4509_v48 = vrot.slane %v802_v46, %v2007_v45  ;;  %v4511_v49 = vrot.slane %v802_v46, %v2011_v47 }
  0x3b   :  { %7531 = vst [vmem:[#allocation8_spill] sm:$0xff] %v4509_v48  ;;  %7532 = vst [vmem:[#allocation9_spill] sm:$0xff] %v4511_v49 }
  0x93   :  { %v72_v21 = vpop.xlane.xlu0 %71 }
  0x94   :  { %v78_v19 = vpop.xlane.xlu1 %77  ;;  %494 = vst.msk [vmem:[#allocation3] sm:$0xff] %vm493_vm1, %v72_v21 }
  0x95   :  { %496 = vst.msk [vmem:[#allocation3 + $0x10] sm:$0xff] %vm493_vm1, %v78_v19 }
  0x97   :  { %v75_v23 = vpop.xlane.xlu0 %74 }
  0x98   :  { %v81_v20 = vpop.xlane.xlu1 %80  ;;  %495 = vst.msk [vmem:[#allocation3 + $0x8] sm:$0xff] %vm493_vm1, %v75_v23 }
  0x99   :  { %497 = vst.msk [vmem:[#allocation3 + $0x18] sm:$0xff] %vm493_vm1, %v81_v20 }
  0x9b   :  { %v84_v24 = vpop.xlane.xlu0 %83 }
  0x9c   :  { %v87_v22 = vpop.xlane.xlu1 %86  ;;  %498 = vst.msk [vmem:[#allocation3 + $0x20] sm:$0xff] %vm493_vm1, %v84_v24 }
  0x9d   :  { %499 = vst.msk [vmem:[#allocation3 + $0x28] sm:$0xff] %vm493_vm1, %v87_v22 }
  0x9f   :  { %v90_v26 = vpop.xlane.xlu0 %89 }
  0xa0   :  { %v93_v5 = vpop.xlane.xlu1 %92  ;;  %500 = vst.msk [vmem:[#allocation3 + $0x30] sm:$0xff] %vm493_vm1, %v90_v26 }
  0xa1   :  { %501 = vst.msk [vmem:[#allocation3 + $0x38] sm:$0xff] %vm493_vm1, %v93_v5 }
  0xa3   :  { %v96_v28 = vpop.xlane.xlu0 %95 }
  0xa4   :  { %v99_v25 = vpop.xlane.xlu1 %98  ;;  %502 = vst.msk [vmem:[#allocation3 + $0x40] sm:$0xff] %vm493_vm1, %v96_v28 }
  0xa5   :  { %503 = vst.msk [vmem:[#allocation3 + $0x48] sm:$0xff] %vm493_vm1, %v99_v25 }
  0xa7   :  { %v102_v30 = vpop.xlane.xlu0 %101 }
  0xa8   :  { %v105_v27 = vpop.xlane.xlu1 %104  ;;  %504 = vst.msk [vmem:[#allocation3 + $0x50] sm:$0xff] %vm493_vm1, %v102_v30 }
  0xa9   :  { %505 = vst.msk [vmem:[#allocation3 + $0x58] sm:$0xff] %vm493_vm1, %v105_v27 }
  0xab   :  { %v108_v31 = vpop.xlane.xlu0 %107 }
  0xac   :  { %v111_v29 = vpop.xlane.xlu1 %110  ;;  %506 = vst.msk [vmem:[#allocation3 + $0x60] sm:$0xff] %vm493_vm1, %v108_v31 }
  0xad   :  { %507 = vst.msk [vmem:[#allocation3 + $0x68] sm:$0xff] %vm493_vm1, %v111_v29 }
  0xaf   :  { %v114_v32 = vpop.xlane.xlu0 %113 }
  0xb0   :  { %508 = vst.msk [vmem:[#allocation3 + $0x70] sm:$0xff] %vm493_vm1, %v114_v32  ;;  %v117_v33 = vpop.xlane.xlu1 %116 }
  0xb1   :  { %509 = vst.msk [vmem:[#allocation3 + $0x78] sm:$0xff] %vm493_vm1, %v117_v33 }
  0xb3   :  { %v120_v34 = vpop.xlane.xlu0 %119 }
  0xb4   :  { %510 = vst.msk [vmem:[#allocation3 + $0x80] sm:$0xff] %vm493_vm1, %v120_v34  ;;  %v123_v35 = vpop.xlane.xlu1 %122 }
  0xb5   :  { %511 = vst.msk [vmem:[#allocation3 + $0x88] sm:$0xff] %vm493_vm1, %v123_v35 }
  0xb7   :  { %v126_v36 = vpop.xlane.xlu0 %125 }
  0xb8   :  { %512 = vst.msk [vmem:[#allocation3 + $0x90] sm:$0xff] %vm493_vm1, %v126_v36  ;;  %v129_v37 = vpop.xlane.xlu1 %128 }
  0xb9   :  { %513 = vst.msk [vmem:[#allocation3 + $0x98] sm:$0xff] %vm493_vm1, %v129_v37 }
  0xbb   :  { %v132_v38 = vpop.xlane.xlu0 %131 }
  0xbc   :  { %514 = vst.msk [vmem:[#allocation3 + $0xa0] sm:$0xff] %vm493_vm1, %v132_v38  ;;  %v135_v40 = vpop.xlane.xlu1 %134 }
  0xbd   :  { %515 = vst.msk [vmem:[#allocation3 + $0xa8] sm:$0xff] %vm493_vm1, %v135_v40 }
  0xbf   :  { %v138_v41 = vpop.xlane.xlu0 %137 }
  0xc0   :  { %516 = vst.msk [vmem:[#allocation3 + $0xb0] sm:$0xff] %vm493_vm1, %v138_v41  ;;  %v141_v43 = vpop.xlane.xlu1 %140 }
  0xc1   :  { %517 = vst.msk [vmem:[#allocation3 + $0xb8] sm:$0xff] %vm493_vm1, %v141_v43 }
  0xc3   :  { %v144_v44 = vpop.xlane.xlu0 %143 }
  0xc4   :  { %518 = vst.msk [vmem:[#allocation3 + $0xc0] sm:$0xff] %vm493_vm1, %v144_v44 }
  0xdb   :  { %v4513_v50 = vpop.f32.mrb[0].mxu0  ;;  %v4515_v51 = vpop.f32.mrb[0].mxu1 }
  0xdc   :  { %7533 = vst [vmem:[#allocation10_spill] sm:$0xff] %v4513_v50  ;;  %7534 = vst [vmem:[#allocation11_spill] sm:$0xff] %v4515_v51  ;;  %v4517_v52 = vpop.f32.mrb[1].mxu0  ;;  %v4519_v53 = vpop.f32.mrb[1].mxu1  ;;  %v1029_v54 = vmul.f32 %v4513_v50, %v4513_v50  ;;  %v1055_v55 = vmul.f32 %v4515_v51, %v4515_v51  ;;  %v2041_v56 = vmul.f32 %v4509_v48, %v4515_v51 }
  0xdd   :  { %7535 = vst [vmem:[#allocation12_spill] sm:$0xff] %v4517_v52  ;;  %7536 = vst [vmem:[#allocation13_spill] sm:$0xff] %v4519_v53  ;;  %v2015_v57 = vmul.f32 %v4509_v48, %v4513_v50  ;;  %v1030_v58 = vmul.f32 %v4517_v52, %v4517_v52  ;;  %v1056_v59 = vmul.f32 %v4519_v53, %v4519_v53 }
  0xde   :  { %v2042_v60 = vmul.f32 %v4511_v49, %v4519_v53  ;;  %v2016_v61 = vmul.f32 %v4511_v49, %v4517_v52 }
  0xdf   :  { %v1079_v62 = vadd.f32 %v1030_v58, %v1029_v54  ;;  %v1118_v63 = vadd.f32 %v1056_v59, %v1055_v55  ;;  %v4537_v0 = vpop.f32.mrb[2].mxu1  ;;  %v4539_v1 = vpop.f32.mrb[2].mxu0 }
  0xe0   :  { %7537 = vst [vmem:[#allocation14_spill] sm:$0xff] %v4537_v0  ;;  %7538 = vst [vmem:[#allocation15_spill] sm:$0xff] %v4539_v1  ;;  %v2104_v2 = vadd.f32 %v2042_v60, %v2041_v56  ;;  %v2065_v3 = vadd.f32 %v2016_v61, %v2015_v57  ;;  %v4541_v4 = vpop.f32.mrb[3].mxu1  ;;  %v4543_v6 = vpop.f32.mrb[3].mxu0  ;;  %v1057_v7 = vmul.f32 %v4537_v0, %v4537_v0 }
  0xe1   :  { %7539 = vst [vmem:[#allocation16_spill] sm:$0xff] %v4541_v4  ;;  %7540 = vst [vmem:[#allocation17_spill] sm:$0xff] %v4543_v6  ;;  %v1031_v8 = vmul.f32 %v4539_v1, %v4539_v1  ;;  %v2017_v9 = vmul.f32 %v4509_v48, %v4539_v1  ;;  %v2043_v10 = vmul.f32 %v4509_v48, %v4537_v0  ;;  %1080 = vadd.xlane.f32.xlu1 %v1079_v62 }
  0xe2   :  { %1119 = vadd.xlane.f32.xlu0 %v1118_v63  ;;  %v1058_v11 = vmul.f32 %v4541_v4, %v4541_v4  ;;  %v1032_v12 = vmul.f32 %v4543_v6, %v4543_v6  ;;  %v2018_v13 = vmul.f32 %v4511_v49, %v4543_v6  ;;  %v2044_v14 = vmul.f32 %v4511_v49, %v4541_v4 }
  0xe3   :  { %v4561_v17 = vpop.f32.mrb[4].mxu0  ;;  %v4563_v18 = vpop.f32.mrb[4].mxu1 }
  0xe4   :  { %v1121_v15 = vadd.f32 %v1058_v11, %v1057_v7  ;;  %v1082_v16 = vadd.f32 %v1032_v12, %v1031_v8  ;;  %7541 = vst [vmem:[#allocation18_spill] sm:$0xff] %v4561_v17  ;;  %7542 = vst [vmem:[#allocation19_spill] sm:$0xff] %v4563_v18  ;;  %v2068_v19 = vadd.f32 %v2018_v13, %v2017_v9  ;;  %v4565_v20 = vpop.f32.mrb[5].mxu0  ;;  %v4567_v21 = vpop.f32.mrb[5].mxu1 }
  0xe5   :  { %7543 = vst [vmem:[#allocation20_spill] sm:$0xff] %v4565_v20  ;;  %7544 = vst [vmem:[#allocation21_spill] sm:$0xff] %v4567_v21  ;;  %v2107_v22 = vadd.f32 %v2044_v14, %v2043_v10  ;;  %v1033_v23 = vmul.f32 %v4561_v17, %v4561_v17  ;;  %v1059_v5 = vmul.f32 %v4563_v18, %v4563_v18  ;;  %2105 = vadd.xlane.f32.xlu1 %v2104_v2 }
  0xe6   :  { %v2045_v24 = vmul.f32 %v4509_v48, %v4563_v18  ;;  %2066 = vadd.xlane.f32.xlu0 %v2065_v3  ;;  %v1034_v25 = vmul.f32 %v4565_v20, %v4565_v20  ;;  %v1060_v26 = vmul.f32 %v4567_v21, %v4567_v21  ;;  %v2046_v27 = vmul.f32 %v4511_v49, %v4567_v21 }
  0xe7   :  { %v2019_v28 = vmul.f32 %v4509_v48, %v4561_v17  ;;  %v2020_v29 = vmul.f32 %v4511_v49, %v4565_v20  ;;  %v4585_v32 = vpop.f32.mrb[6].mxu0  ;;  %v4587_v33 = vpop.f32.mrb[6].mxu1 }
  0xe8   :  { %v1085_v30 = vadd.f32 %v1034_v25, %v1033_v23  ;;  %v1124_v31 = vadd.f32 %v1060_v26, %v1059_v5  ;;  %7545 = vst [vmem:[#allocation22_spill] sm:$0xff] %v4585_v32  ;;  %7546 = vst [vmem:[#allocation23_spill] sm:$0xff] %v4587_v33  ;;  %v2110_v34 = vadd.f32 %v2046_v27, %v2045_v24  ;;  %v4589_v35 = vpop.f32.mrb[7].mxu0  ;;  %v4591_v36 = vpop.f32.mrb[7].mxu1 }
  0xe9   :  { %7547 = vst [vmem:[#allocation24_spill] sm:$0xff] %v4589_v35  ;;  %7548 = vst [vmem:[#allocation25_spill] sm:$0xff] %v4591_v36  ;;  %v2071_v37 = vadd.f32 %v2020_v29, %v2019_v28  ;;  %v1061_v38 = vmul.f32 %v4587_v33, %v4587_v33  ;;  %v1035_v39 = vmul.f32 %v4585_v32, %v4585_v32  ;;  %1122 = vadd.xlane.f32.xlu1 %v1121_v15 }
  0xea   :  { %v2021_v40 = vmul.f32 %v4509_v48, %v4585_v32  ;;  %1083 = vadd.xlane.f32.xlu0 %v1082_v16  ;;  %v1062_v41 = vmul.f32 %v4591_v36, %v4591_v36  ;;  %v1036_v42 = vmul.f32 %v4589_v35, %v4589_v35  ;;  %v2022_v43 = vmul.f32 %v4511_v49, %v4589_v35  ;;  %v5152_v32 = vld [vmem:[#allocation3 + $0xc0] sm:$0xff] }
  0xeb   :  { %v2047_v44 = vmul.f32 %v4509_v48, %v4587_v33  ;;  %v2048_v45 = vmul.f32 %v4511_v49, %v4591_v36  ;;  %v4613_v54 = vpop.f32.mrb[8].mxu0  ;;  %v4615_v55 = vpop.f32.mrb[8].mxu1 }
  0xec   :  { %v4609_v46 = vadd.f32 %v1062_v41, %v1061_v38  ;;  %v4611_v47 = vadd.f32 %v1036_v42, %v1035_v39  ;;  %7549 = vst [vmem:[#allocation26_spill] sm:$0xff] %v4613_v54  ;;  %7550 = vst [vmem:[#allocation27_spill] sm:$0xff] %v4615_v55  ;;  %v4617_v56 = vadd.f32 %v2022_v43, %v2021_v40  ;;  %v4619_v57 = vpop.f32.mrb[9].mxu0  ;;  %v4621_v58 = vpop.f32.mrb[9].mxu1 }
  0xed   :  { %7551 = vst [vmem:[#allocation28_spill] sm:$0xff] %v4619_v57  ;;  %7552 = vst [vmem:[#allocation29_spill] sm:$0xff] %v4621_v58  ;;  %v4623_v59 = vadd.f32 %v2048_v45, %v2047_v44  ;;  %v1037_v60 = vmul.f32 %v4613_v54, %v4613_v54  ;;  %v1063_v61 = vmul.f32 %v4615_v55, %v4615_v55  ;;  %2069 = vadd.xlane.f32.xlu1 %v2068_v19 }
  0xee   :  { %v2049_v62 = vmul.f32 %v4509_v48, %v4615_v55  ;;  %2108 = vadd.xlane.f32.xlu0 %v2107_v22  ;;  %v1038_v63 = vmul.f32 %v4619_v57, %v4619_v57  ;;  %v1064_v2 = vmul.f32 %v4621_v58, %v4621_v58  ;;  %v2050_v3 = vmul.f32 %v4511_v49, %v4621_v58 }
  0xef   :  { %v2023_v7 = vmul.f32 %v4509_v48, %v4613_v54  ;;  %v2024_v8 = vmul.f32 %v4511_v49, %v4619_v57  ;;  %v4645_v11 = vpop.f32.mrb[10].mxu0  ;;  %v4647_v12 = vpop.f32.mrb[10].mxu1 }
  0xf0   :  { %v4641_v9 = vadd.f32 %v1038_v63, %v1037_v60  ;;  %v4643_v10 = vadd.f32 %v1064_v2, %v1063_v61  ;;  %7553 = vst [vmem:[#allocation30_spill] sm:$0xff] %v4645_v11  ;;  %7554 = vst [vmem:[#allocation31_spill] sm:$0xff] %v4647_v12  ;;  %v4649_v13 = vadd.f32 %v2050_v3, %v2049_v62  ;;  %v4651_v14 = vpop.f32.mrb[11].mxu0  ;;  %v4653_v15 = vpop.f32.mrb[11].mxu1 }
  0xf1   :  { %7555 = vst [vmem:[#allocation32_spill] sm:$0xff] %v4651_v14  ;;  %7556 = vst [vmem:[#allocation33_spill] sm:$0xff] %v4653_v15  ;;  %v4655_v16 = vadd.f32 %v2024_v8, %v2023_v7  ;;  %v1065_v19 = vmul.f32 %v4647_v12, %v4647_v12  ;;  %v1039_v22 = vmul.f32 %v4645_v11, %v4645_v11  ;;  %1086 = vadd.xlane.f32.xlu1 %v1085_v30 }
  0xf2   :  { %v2025_v23 = vmul.f32 %v4509_v48, %v4645_v11  ;;  %1125 = vadd.xlane.f32.xlu0 %v1124_v31  ;;  %v1066_v5 = vmul.f32 %v4653_v15, %v4653_v15  ;;  %v1040_v24 = vmul.f32 %v4651_v14, %v4651_v14  ;;  %v2026_v25 = vmul.f32 %v4511_v49, %v4651_v14 }
  0xf3   :  { %v2051_v26 = vmul.f32 %v4509_v48, %v4647_v12  ;;  %v2052_v27 = vmul.f32 %v4511_v49, %v4653_v15  ;;  %v4677_v30 = vpop.f32.mrb[12].mxu0  ;;  %v4679_v31 = vpop.f32.mrb[12].mxu1  ;;  %v5025_v12 = vld [vmem:[#allocation3 + $0x98] sm:$0xff] }
  0xf4   :  { %v4673_v28 = vadd.f32 %v1066_v5, %v1065_v19  ;;  %v4675_v29 = vadd.f32 %v1040_v24, %v1039_v22  ;;  %7557 = vst [vmem:[#allocation34_spill] sm:$0xff] %v4677_v30  ;;  %7558 = vst [vmem:[#allocation35_spill] sm:$0xff] %v4679_v31  ;;  %v4681_v38 = vadd.f32 %v2026_v25, %v2025_v23  ;;  %v4683_v39 = vpop.f32.mrb[13].mxu0  ;;  %v4685_v40 = vpop.f32.mrb[13].mxu1 }
  0xf5   :  { %7559 = vst [vmem:[#allocation36_spill] sm:$0xff] %v4683_v39  ;;  %7560 = vst [vmem:[#allocation37_spill] sm:$0xff] %v4685_v40  ;;  %v4687_v41 = vadd.f32 %v2052_v27, %v2051_v26  ;;  %v1041_v42 = vmul.f32 %v4677_v30, %v4677_v30  ;;  %v1067_v43 = vmul.f32 %v4679_v31, %v4679_v31  ;;  %2111 = vadd.xlane.f32.xlu1 %v2110_v34 }
  0xf6   :  { %v2053_v44 = vmul.f32 %v4509_v48, %v4679_v31  ;;  %2072 = vadd.xlane.f32.xlu0 %v2071_v37  ;;  %v1042_v45 = vmul.f32 %v4683_v39, %v4683_v39  ;;  %v1068_v60 = vmul.f32 %v4685_v40, %v4685_v40  ;;  %v2054_v61 = vmul.f32 %v4511_v49, %v4685_v40 }
  0xf7   :  { %v2027_v62 = vmul.f32 %v4509_v48, %v4677_v30  ;;  %v2028_v63 = vmul.f32 %v4511_v49, %v4683_v39  ;;  %v4709_v34 = vpop.f32.mrb[14].mxu0  ;;  %v4711_v37 = vpop.f32.mrb[14].mxu1 }
  0xf8   :  { %v4705_v2 = vadd.f32 %v1042_v45, %v1041_v42  ;;  %v4707_v3 = vadd.f32 %v1068_v60, %v1067_v43  ;;  %7561 = vst [vmem:[#allocation38_spill] sm:$0xff] %v4709_v34  ;;  %7562 = vst [vmem:[#allocation39_spill] sm:$0xff] %v4711_v37  ;;  %v4713_v7 = vadd.f32 %v2054_v61, %v2053_v44  ;;  %v4715_v8 = vpop.f32.mrb[15].mxu0  ;;  %v4717_v19 = vpop.f32.mrb[15].mxu1 }
  0xf9   :  { %7563 = vst [vmem:[#allocation40_spill] sm:$0xff] %v4715_v8  ;;  %7564 = vst [vmem:[#allocation41_spill] sm:$0xff] %v4717_v19  ;;  %v4719_v22 = vadd.f32 %v2028_v63, %v2027_v62  ;;  %v1069_v23 = vmul.f32 %v4711_v37, %v4711_v37  ;;  %v1043_v5 = vmul.f32 %v4709_v34, %v4709_v34  ;;  %1128 = vadd.xlane.f32.xlu1 %v4609_v46 }
  0xfa   :  { %v2029_v24 = vmul.f32 %v4509_v48, %v4709_v34  ;;  %1089 = vadd.xlane.f32.xlu0 %v4611_v47  ;;  %v1070_v25 = vmul.f32 %v4717_v19, %v4717_v19  ;;  %v1044_v26 = vmul.f32 %v4715_v8, %v4715_v8  ;;  %v2030_v27 = vmul.f32 %v4511_v49, %v4715_v8 }
  0xfb   :  { %v2055_v42 = vmul.f32 %v4509_v48, %v4711_v37  ;;  %v2056_v43 = vmul.f32 %v4511_v49, %v4717_v19  ;;  %v4743_v47 = vpop.f32.mrb[16].mxu0  ;;  %v4745_v45 = vpop.f32.mrb[16].mxu1 }
  0xfc   :  { %v4739_v44 = vadd.f32 %v1070_v25, %v1069_v23  ;;  %v4741_v46 = vadd.f32 %v1044_v26, %v1043_v5  ;;  %7565 = vst [vmem:[#allocation42_spill] sm:$0xff] %v4743_v47  ;;  %7566 = vst [vmem:[#allocation43_spill] sm:$0xff] %v4745_v45  ;;  %v4747_v60 = vadd.f32 %v2030_v27, %v2029_v24  ;;  %v4749_v61 = vpop.f32.mrb[17].mxu1  ;;  %v4751_v62 = vpop.f32.mrb[17].mxu0 }
  0xfd   :  { %7567 = vst [vmem:[#allocation44_spill] sm:$0xff] %v4749_v61  ;;  %7568 = vst [vmem:[#allocation45_spill] sm:$0xff] %v4751_v62  ;;  %v4753_v63 = vadd.f32 %v2056_v43, %v2055_v42  ;;  %v1045_v8 = vmul.f32 %v4743_v47, %v4743_v47  ;;  %v1071_v23 = vmul.f32 %v4745_v45, %v4745_v45  ;;  %2075 = vadd.xlane.f32.xlu1 %v4617_v56 }
  0xfe   :  { %v2057_v5 = vmul.f32 %v4509_v48, %v4745_v45  ;;  %2114 = vadd.xlane.f32.xlu0 %v4623_v59  ;;  %v1046_v24 = vmul.f32 %v4751_v62, %v4751_v62  ;;  %v1072_v25 = vmul.f32 %v4749_v61, %v4749_v61  ;;  %v2058_v26 = vmul.f32 %v4511_v49, %v4749_v61 }
  0xff   :  { %v2031_v27 = vmul.f32 %v4509_v48, %v4743_v47  ;;  %v2032_v42 = vmul.f32 %v4511_v49, %v4751_v62  ;;  %v4777_v59 = vpop.f32.mrb[18].mxu0  ;;  %v4779_v45 = vpop.f32.mrb[18].mxu1 }
 0x100   :  { %v4773_v43 = vadd.f32 %v1046_v24, %v1045_v8  ;;  %v4775_v56 = vadd.f32 %v1072_v25, %v1071_v23  ;;  %7569 = vst [vmem:[#allocation46_spill] sm:$0xff] %v4777_v59  ;;  %7570 = vst [vmem:[#allocation47_spill] sm:$0xff] %v4779_v45  ;;  %v4781_v34 = vadd.f32 %v2058_v26, %v2057_v5  ;;  %v4783_v40 = vpop.f32.mrb[19].mxu1  ;;  %v4785_v31 = vpop.f32.mrb[19].mxu0 }
 0x101   :  { %7571 = vst [vmem:[#allocation48_spill] sm:$0xff] %v4783_v40  ;;  %7572 = vst [vmem:[#allocation49_spill] sm:$0xff] %v4785_v31  ;;  %v4787_v61 = vadd.f32 %v2032_v42, %v2031_v27  ;;  %v1073_v47 = vmul.f32 %v4779_v45, %v4779_v45  ;;  %v1047_v8 = vmul.f32 %v4777_v59, %v4777_v59  ;;  %1092 = vadd.xlane.f32.xlu1 %v4641_v9 }
 0x102   :  { %v2033_v23 = vmul.f32 %v4509_v48, %v4777_v59  ;;  %1131 = vadd.xlane.f32.xlu0 %v4643_v10  ;;  %v1074_v5 = vmul.f32 %v4783_v40, %v4783_v40  ;;  %v1048_v24 = vmul.f32 %v4785_v31, %v4785_v31  ;;  %v2034_v25 = vmul.f32 %v4511_v49, %v4785_v31 }
 0x103   :  { %v2059_v26 = vmul.f32 %v4509_v48, %v4779_v45  ;;  %v2060_v27 = vmul.f32 %v4511_v49, %v4783_v40  ;;  %v4811_v10 = vpop.f32.mrb[20].mxu0  ;;  %v4813_v59 = vpop.f32.mrb[20].mxu1 }
 0x104   :  { %v4807_v42 = vadd.f32 %v1074_v5, %v1073_v47  ;;  %v4809_v9 = vadd.f32 %v1048_v24, %v1047_v8  ;;  %7573 = vst [vmem:[#allocation50_spill] sm:$0xff] %v4811_v10  ;;  %7574 = vst [vmem:[#allocation51_spill] sm:$0xff] %v4813_v59  ;;  %v4815_v62 = vadd.f32 %v2034_v25, %v2033_v23  ;;  %v4817_v19 = vpop.f32.mrb[21].mxu1  ;;  %v4819_v37 = vpop.f32.mrb[21].mxu0 }
 0x105   :  { %7575 = vst [vmem:[#allocation52_spill] sm:$0xff] %v4817_v19  ;;  %7576 = vst [vmem:[#allocation53_spill] sm:$0xff] %v4819_v37  ;;  %v4821_v31 = vadd.f32 %v2060_v27, %v2059_v26  ;;  %v1049_v45 = vmul.f32 %v4811_v10, %v4811_v10  ;;  %v1075_v47 = vmul.f32 %v4813_v59, %v4813_v59  ;;  %2117 = vadd.xlane.f32.xlu1 %v4649_v13 }
 0x106   :  { %v2061_v8 = vmul.f32 %v4509_v48, %v4813_v59  ;;  %2078 = vadd.xlane.f32.xlu0 %v4655_v16  ;;  %v1050_v23 = vmul.f32 %v4819_v37, %v4819_v37  ;;  %v1076_v5 = vmul.f32 %v4817_v19, %v4817_v19  ;;  %v2062_v24 = vmul.f32 %v4511_v49, %v4817_v19 }
 0x107   :  { %v2035_v25 = vmul.f32 %v4509_v48, %v4811_v10  ;;  %v2036_v26 = vmul.f32 %v4511_v49, %v4819_v37  ;;  %v4845_v16 = vpop.f32.mrb[22].mxu0  ;;  %v4847_v59 = vpop.f32.mrb[22].mxu1  ;;  %v806_v37 = vld [vmem:[#allocation3 + $0x10] sm:$0xff] }
 0x108   :  { %v4841_v27 = vadd.f32 %v1050_v23, %v1049_v45  ;;  %v4843_v13 = vadd.f32 %v1076_v5, %v1075_v47  ;;  %7577 = vst [vmem:[#allocation54_spill] sm:$0xff] %v4845_v16  ;;  %7578 = vst [vmem:[#allocation55_spill] sm:$0xff] %v4847_v59  ;;  %v4849_v40 = vadd.f32 %v2062_v24, %v2061_v8  ;;  %v4851_v14 = vpop.f32.mrb[23].mxu1  ;;  %v4853_v11 = vpop.f32.mrb[23].mxu0  ;;  %vm845_vm3 = vcmp.eq.f32.partialorder %v806_v37, inf }
 0x109   :  { %7579 = vst [vmem:[#allocation56_spill] sm:$0xff] %v4851_v14  ;;  %7580 = vst [vmem:[#allocation57_spill] sm:$0xff] %v4853_v11  ;;  %v4855_v19 = vadd.f32 %v2036_v26, %v2035_v25  ;;  %v1077_v10 = vmul.f32 %v4847_v59, %v4847_v59  ;;  %v1051_v45 = vmul.f32 %v4845_v16, %v4845_v16  ;;  %1134 = vadd.xlane.f32.xlu1 %v4673_v28  ;;  %v804_v26 = vld [vmem:[#allocation3] sm:$0xff] }
 0x10a   :  { %v2037_v47 = vmul.f32 %v4509_v48, %v4845_v16  ;;  %1095 = vadd.xlane.f32.xlu0 %v4675_v29  ;;  %v1078_v8 = vmul.f32 %v4851_v14, %v4851_v14  ;;  %v2064_v23 = vmul.f32 %v4511_v49, %v4851_v14  ;;  %v1052_v5 = vmul.f32 %v4853_v11, %v4853_v11 }
 0x10b   :  { %v2038_v24 = vmul.f32 %v4511_v49, %v4853_v11  ;;  %v2063_v25 = vmul.f32 %v4509_v48, %v4847_v59  ;;  %v4879_v29 = vpop.f32.mrb[24].mxu0  ;;  %3670 = vrsqrt.f32 %v804_v26  ;;  %vm831_vm2 = vcmp.eq.f32.partialorder %v804_v26, inf  ;;  %v5014_v59 = vld [vmem:[#allocation3 + $0x60] sm:$0xff] }
 0x10c   :  { %v4875_v16 = vadd.f32 %v1078_v8, %v1077_v10  ;;  %v4877_v28 = vadd.f32 %v1052_v5, %v1051_v45  ;;  %7581 = vst [vmem:[#allocation58_spill] sm:$0xff] %v4879_v29  ;;  %v4881_v39 = vpop.f32.mrb[25].mxu0  ;;  %v1053_v30 = vmul.f32 %v4879_v29, %v4879_v29  ;;  %v2039_v11 = vmul.f32 %v4509_v48, %v4879_v29 }
 0x10d   :  { %7582 = vst [vmem:[#allocation59_spill] sm:$0xff] %v4881_v39  ;;  %v4883_v14 = vadd.f32 %v2038_v24, %v2037_v47  ;;  %v4887_v15 = vadd.f32 %v2064_v23, %v2063_v25  ;;  %2081 = vadd.xlane.f32.xlu1 %v4681_v38  ;;  %v1054_v10 = vmul.f32 %v4881_v39, %v4881_v39  ;;  %v805_v47 = vld [vmem:[#allocation3 + $0x8] sm:$0xff]  ;;  %3672 = vrsqrt.f32 %v806_v37  ;;  %v807_v38 = vld [vmem:[#allocation3 + $0x18] sm:$0xff] }
 0x10e   :  { %2120 = vadd.xlane.f32.xlu0 %v4687_v41  ;;  %v2040_v45 = vmul.f32 %v4511_v49, %v4881_v39  ;;  %3674 = vrsqrt.f32 %v805_v47  ;;  %vm833_vm4 = vcmp.eq.f32.partialorder %v804_v26, 0.0  ;;  %vm838_vm5 = vcmp.eq.f32.partialorder %v805_v47, inf }
 0x10f   :  { %v4897_v8 = vadd.f32 %v1054_v10, %v1053_v30  ;;  %3676 = vrsqrt.f32 %v807_v38  ;;  %vm847_vm6 = vcmp.eq.f32.partialorder %v806_v37, 0.0  ;;  %vm840_vm7 = vcmp.eq.f32.partialorder %v805_v47, 0.0 }
 0x110   :  { %v4899_v23 = vadd.f32 %v2040_v45, %v2039_v11  ;;  %v4915_v45 = vld [vmem:[#allocation3 + $0x70] sm:$0xff]  ;;  %vm852_vm8 = vcmp.eq.f32.partialorder %v807_v38, inf  ;;  %vm854_vm9 = vcmp.eq.f32.partialorder %v807_v38, 0.0 }
 0x111   :  { %1098 = vadd.xlane.f32.xlu1 %v4705_v2  ;;  %v834_v2 = vand.u32 2147483648, %v804_v26  ;;  %vm929_vm11 = vcmp.eq.f32.partialorder %v4915_v45, inf  ;;  %vm931_vm13 = vcmp.eq.f32.partialorder %v4915_v45, 0.0 }
 0x112   :  { %1137 = vadd.xlane.f32.xlu0 %v4707_v3 }
 0x115   :  { %2123 = vadd.xlane.f32.xlu1 %v4713_v7  ;;  %v3671_v41 = vpop.eup %3670 }
 0x116   :  { %2084 = vadd.xlane.f32.xlu0 %v4719_v22  ;;  %v830_v11 = vmul.f32 %v3671_v41, %v804_v26  ;;  %v848_v22 = vand.u32 2147483648, %v806_v37 }
 0x117   :  { %v3673_v5 = vpop.eup %3672 }
 0x118   :  { %v3675_v30 = vpop.eup %3674  ;;  %v844_v24 = vmul.f32 %v3673_v5, %v806_v37  ;;  %v832_v7 = vsel %vm831_vm2, %v804_v26, %v830_v11  ;;  %v4927_v5 = vld [vmem:[#allocation3 + $0x78] sm:$0xff] }
 0x119   :  { %1140 = vadd.xlane.f32.xlu1 %v4739_v44  ;;  %v837_v3 = vmul.f32 %v3675_v30, %v805_v47  ;;  %v3677_v25 = vpop.eup %3676  ;;  %v4911_v44 = vld [vmem:[#allocation3 + $0x68] sm:$0xff]  ;;  %vm936_vm14 = vcmp.eq.f32.partialorder %v4927_v5, inf  ;;  %vm938_vm15 = vcmp.eq.f32.partialorder %v4927_v5, 0.0 }
 0x11a   :  { %1101 = vadd.xlane.f32.xlu0 %v4741_v46  ;;  %v846_v10 = vsel %vm845_vm3, %v806_v37, %v844_v24  ;;  %v841_v46 = vand.u32 2147483648, %v805_v47  ;;  %v851_v26 = vmul.f32 %v3677_v25, %v807_v38  ;;  %3678 = vrsqrt.f32 %v4911_v44  ;;  %v4930_v24 = vld [vmem:[#allocation3 + $0x28] sm:$0xff] }
 0x11b   :  { %v4917_v41 = vsel %vm847_vm6, %v848_v22, %v846_v10  ;;  %3680 = vrsqrt.f32 %v4915_v45  ;;  %vm922_vm10 = vcmp.eq.f32.partialorder %v4911_v44, inf  ;;  %vm924_vm12 = vcmp.eq.f32.partialorder %v4911_v44, 0.0 }
 0x11c   :  { %v853_v30 = vsel %vm852_vm8, %v807_v38, %v851_v26  ;;  %3682 = vrsqrt.f32 %v4927_v5  ;;  %v4967_v26 = vld [vmem:[#allocation3 + $0x80] sm:$0xff]  ;;  %vm866_vm6 = vcmp.eq.f32.partialorder %v4930_v24, inf  ;;  %vm868_vm8 = vcmp.eq.f32.partialorder %v4930_v24, 0.0 }
 0x11d   :  { %2087 = vadd.xlane.f32.xlu1 %v4747_v60  ;;  %v4913_v60 = vsel %vm833_vm4, %v834_v2, %v832_v7  ;;  %3684 = vrsqrt.f32 %v4930_v24  ;;  %v4957_v7 = vld [vmem:[#allocation3 + $0x30] sm:$0xff]  ;;  %vm943_vm2 = vcmp.eq.f32.partialorder %v4967_v26, inf  ;;  %vm945_vm4 = vcmp.eq.f32.partialorder %v4967_v26, 0.0 }
 0x11e   :  { %2126 = vadd.xlane.f32.xlu0 %v4753_v63  ;;  %v839_v63 = vsel %vm838_vm5, %v805_v47, %v837_v3  ;;  %v7466_v37 = vmax.f32 %v4913_v60, 1e-15  ;;  %v855_v47 = vand.u32 2147483648, %v807_v38  ;;  %v4947_v3 = vld [vmem:[#allocation3 + $0x38] sm:$0xff] }
 0x120   :  { %v4945_v38 = vsel %vm854_vm9, %v855_v47, %v853_v30  ;;  %v4977_v30 = vld [vmem:[#allocation3 + $0x88] sm:$0xff] }
 0x121   :  { %1104 = vadd.xlane.f32.xlu1 %v4773_v43  ;;  %v4923_v43 = vsel %vm840_vm7, %v841_v46, %v839_v63  ;;  %v7467_v25 = vmax.f32 %v4945_v38, 1e-15  ;;  %vm950_vm3 = vcmp.eq.f32.partialorder %v4977_v30, inf  ;;  %vm952_vm5 = vcmp.eq.f32.partialorder %v4977_v30, 0.0 }
 0x122   :  { %1143 = vadd.xlane.f32.xlu0 %v4775_v56  ;;  %v7468_v56 = vmax.f32 %v4917_v41, 1e-15  ;;  %v7465_v11 = vmax.f32 %v4923_v43, 1e-15 }
 0x123   :  { %v4975_v47 = vclamps-f32 %v7467_v25, 0.9999999 }
 0x124   :  { %v4943_v2 = vclamps-f32 %v7468_v56, 0.9999999  ;;  %v3679_v10 = vpop.eup %3678 }
 0x125   :  { %2129 = vadd.xlane.f32.xlu1 %v4781_v34  ;;  %v4936_v34 = vclamps-f32 %v7466_v37, 0.9999999  ;;  %v3681_v63 = vpop.eup %3680 }
 0x126   :  { %2090 = vadd.xlane.f32.xlu0 %v4787_v61  ;;  %v4938_v61 = vld [vmem:[#allocation3 + $0x20] sm:$0xff]  ;;  %v1481_v46 = vsub.f32 1.0, %v4943_v2  ;;  %v3683_v37 = vpop.eup %3682 }
 0x127   :  { %3686 = vrsqrt.f32 %v4938_v61  ;;  %v1479_v22 = vsub.f32 1.0, %v4936_v34  ;;  %v4996_v25 = vpop.eup %3684  ;;  %vm859_vm0 = vcmp.eq.f32.partialorder %v4938_v61, inf  ;;  %vm861_vm1 = vcmp.eq.f32.partialorder %v4938_v61, 0.0 }
 0x128   :  { %3688 = vrsqrt.f32 %v4947_v3 }
 0x129   :  { %1146 = vadd.xlane.f32.xlu1 %v4807_v42  ;;  %v4950_v42 = vld [vmem:[#allocation3 + $0x48] sm:$0xff] }
 0x12a   :  { %1107 = vadd.xlane.f32.xlu0 %v4809_v9  ;;  %v4954_v9 = vclamps-f32 %v7465_v11, 0.9999999  ;;  %3690 = vrsqrt.f32 %v4950_v42  ;;  %v4980_v11 = vld [vmem:[#allocation3 + $0x58] sm:$0xff] }
 0x12b   :  { %3692 = vrsqrt.f32 %v4957_v7 }
 0x12c   :  { %3694 = vrcp.f32 %v1479_v22  ;;  %v925_v22 = vand.u32 2147483648, %v4911_v44 }
 0x12d   :  { %2093 = vadd.xlane.f32.xlu1 %v4815_v62  ;;  %v1480_v62 = vsub.f32 1.0, %v4954_v9  ;;  %3696 = vrcp.f32 %v1481_v46 }
 0x12e   :  { %2132 = vadd.xlane.f32.xlu0 %v4821_v31  ;;  %v921_v31 = vmul.f32 %v3679_v10, %v4911_v44  ;;  %3698 = vrsqrt.f32 %v4967_v26  ;;  %v4988_v10 = vld [vmem:[#allocation3 + $0x50] sm:$0xff] }
 0x12f   :  { %3700 = vrcp.f32 %v1480_v62  ;;  %v932_v62 = vand.u32 2147483648, %v4915_v45 }
 0x130   :  { %3702 = vrsqrt.f32 %v4977_v30  ;;  %v923_v46 = vsel %vm922_vm10, %v4911_v44, %v921_v31  ;;  %v935_v31 = vmul.f32 %v3683_v37, %v4927_v5  ;;  %vm964_vm10 = vcmp.eq.f32.partialorder %v5025_v12, inf }
 0x131   :  { %1110 = vadd.xlane.f32.xlu1 %v4841_v27  ;;  %v928_v27 = vmul.f32 %v3681_v63, %v4915_v45  ;;  %v1482_v63 = vsub.f32 1.0, %v4975_v47  ;;  %3704 = vrsqrt.f32 %v4980_v11  ;;  %v3687_v56 = vpop.eup %3686  ;;  %v5009_v39 = vsel %vm924_vm12, %v925_v22, %v923_v46 }
 0x132   :  { %1149 = vadd.xlane.f32.xlu0 %v4843_v13  ;;  %v4984_v13 = vld [vmem:[#allocation3 + $0x40] sm:$0xff]  ;;  %v5006_v44 = vpop.eup %3688  ;;  %v858_v22 = vmul.f32 %v3687_v56, %v4938_v61  ;;  %v1455_v56 = vadd.f32 1.0, %v4954_v9  ;;  %v7584_v57 = vmax.f32 %v5009_v39, 1e-15  ;;  %vm873_vm12 = vcmp.eq.f32.partialorder %v4957_v7, inf }
 0x133   :  { %3706 = vrsqrt.f32 %v4984_v13  ;;  %v7590_v18 = vmax.f32 %v5009_v39, 1e-15 }
 0x134   :  { %3708 = vrsqrt.f32 %v4988_v10  ;;  %v5012_v29 = vpop.eup %3690  ;;  %v860_v9 = vsel %vm859_vm0, %v4938_v61, %v858_v22 }
 0x135   :  { %2135 = vadd.xlane.f32.xlu1 %v4849_v40  ;;  %v5001_v40 = vld [vmem:[#allocation3 + $0x90] sm:$0xff]  ;;  %3710 = vrcp.f32 %v1482_v63 }
 0x136   :  { %2096 = vadd.xlane.f32.xlu0 %v4855_v19  ;;  %v930_v19 = vsel %vm929_vm11, %v4915_v45, %v928_v27  ;;  %v5018_v45 = vpop.eup %3692  ;;  %3712 = vrsqrt.f32 %v5001_v40  ;;  %v939_v27 = vand.u32 2147483648, %v4927_v5  ;;  %vm957_vm7 = vcmp.eq.f32.partialorder %v5001_v40, inf }
 0x137   :  { %v5021_v37 = vsel %vm931_vm13, %v932_v62, %v930_v19  ;;  %v3695_v46 = vpop.eup %3694  ;;  %3714 = vrsqrt.f32 %v5014_v59  ;;  %v1456_v62 = vadd.f32 1.0, %v4943_v2  ;;  %v862_v2 = vand.u32 2147483648, %v4938_v61 }
 0x138   :  { %v3697_v63 = vpop.eup %3696  ;;  %vm959_vm9 = vcmp.eq.f32.partialorder %v5001_v40, 0.0  ;;  %v872_v35 = vmul.f32 %v5018_v45, %v4957_v7  ;;  %vm966_vm11 = vcmp.eq.f32.partialorder %v5025_v12, 0.0  ;;  %vm875_vm13 = vcmp.eq.f32.partialorder %v4957_v7, 0.0 }
 0x139   :  { %1152 = vadd.xlane.f32.xlu1 %v4875_v16  ;;  %v1454_v16 = vadd.f32 1.0, %v4936_v34  ;;  %v3699_v19 = vpop.eup %3698  ;;  %v7593_v39 = vmax.f32 %v5021_v37, 1e-15 }
 0x13a   :  { %1113 = vadd.xlane.f32.xlu0 %v4877_v28  ;;  %v937_v28 = vsel %vm936_vm14, %v4927_v5, %v935_v31  ;;  %v7583_v31 = vmax.f32 %v4917_v41, 1e-15  ;;  %v3701_v5 = vpop.eup %3700  ;;  %v7585_v41 = vmax.f32 %v4913_v60, 1e-15  ;;  %vm880_vm14 = vcmp.eq.f32.partialorder %v4947_v3, inf }
 0x13b   :  { %v5041_v58 = vsel %vm938_vm15, %v939_v27, %v937_v28  ;;  %v3703_v55 = vpop.eup %3702  ;;  %v942_v27 = vmul.f32 %v3699_v19, %v4967_v26  ;;  %vm882_vm15 = vcmp.eq.f32.partialorder %v4947_v3, 0.0 }
 0x13c   :  { %3716 = vrcp.f32 %v7583_v31  ;;  %v5050_v34 = vpop.eup %3704  ;;  %v1509_v31 = vmul.f32 %v3697_v63, %v1456_v62  ;;  %v7476_v61 = vmax.f32 %v5041_v58, 1e-15  ;;  %v949_v63 = vmul.f32 %v3703_v55, %v4977_v30 }
 0x13d   :  { %2099 = vadd.xlane.f32.xlu1 %v4883_v14  ;;  %3718 = vrsqrt.f32 %v5025_v12  ;;  %v5046_v14 = vclamps-f32 %v7584_v57, 0.9999999  ;;  %v5055_v28 = vpop.eup %3706  ;;  %v1507_v57 = vmul.f32 %v3701_v5, %v1455_v56  ;;  %v5070_v62 = vsel %vm861_vm1, %v862_v2, %v860_v9 }
 0x13e   :  { %2138 = vadd.xlane.f32.xlu0 %v4887_v15  ;;  %v1505_v15 = vmul.f32 %v3695_v46, %v1454_v16  ;;  %3720 = vrcp.f32 %v7585_v41  ;;  %v7586_v46 = vmax.f32 %v5021_v37, 1e-15  ;;  %v5065_v60 = vpop.eup %3708  ;;  %v7587_v16 = vmax.f32 %v4923_v43, 1e-15 }
 0x13f   :  { %v1492_v19 = vsub.f32 1.0, %v5046_v14  ;;  %v946_v56 = vand.u32 2147483648, %v4967_v26  ;;  %v1457_v41 = vadd.f32 1.0, %v4975_v47  ;;  %v944_v43 = vsel %vm943_vm2, %v4967_v26, %v942_v27 }
 0x140   :  { %v5061_v22 = vclamps-f32 %v7586_v46, 0.9999999  ;;  %3722 = vrcp.f32 %v7587_v16  ;;  %v5083_v2 = vclamps-f32 %v7476_v61, 0.9999999  ;;  %v865_v26 = vmul.f32 %v4996_v25, %v4930_v24  ;;  %v5099_v16 = vld [vmem:[#allocation3 + $0xa8] sm:$0xff]  ;;  %v5105_v25 = vld [vmem:[#allocation3 + $0xb0] sm:$0xff] }
 0x141   :  { %1116 = vadd.xlane.f32.xlu1 %v4897_v8  ;;  %v3711_v8 = vpop.eup %3710  ;;  %3724 = vlog2.f32 %v1505_v15  ;;  %v953_v15 = vand.u32 2147483648, %v4977_v30  ;;  %v5095_v27 = vsel %vm945_vm4, %v946_v56, %v944_v43  ;;  %v7588_v61 = vmax.f32 %v4945_v38, 1e-15 }
 0x142   :  { %2102 = vadd.xlane.f32.xlu0 %v4899_v23  ;;  %v5072_v23 = vld [vmem:[#allocation3 + $0xa0] sm:$0xff]  ;;  %v3713_v5 = vpop.eup %3712  ;;  %3726 = vlog2.f32 %v1509_v31  ;;  %v1493_v55 = vsub.f32 1.0, %v5061_v22  ;;  %v951_v31 = vsel %vm950_vm3, %v4977_v30, %v949_v63  ;;  %v1511_v63 = vmul.f32 %v3711_v8, %v1457_v41 }
 0x143   :  { %3728 = vlog2.f32 %v1507_v57  ;;  %v5086_v9 = vpop.eup %3714  ;;  %v956_v57 = vmul.f32 %v3713_v5, %v5001_v40  ;;  %v1008_v54 = vmax.f32 %v5070_v62, 1e-15  ;;  %v5110_v56 = vsel %vm952_vm5, %v953_v15, %v951_v31 }
 0x144   :  { %3730 = vrsqrt.f32 %v5072_v23  ;;  %v869_v5 = vand.u32 2147483648, %v4930_v24  ;;  %v7480_v38 = vmax.f32 %v5095_v27, 1e-15  ;;  %v960_v62 = vand.u32 2147483648, %v5001_v40 }
 0x145   :  { %3732 = vrcp.f32 %v1492_v19  ;;  %v1494_v19 = vsub.f32 1.0, %v5083_v2  ;;  %v958_v8 = vsel %vm957_vm7, %v5001_v40, %v956_v57  ;;  %v5136_v40 = vld [vmem:[#allocation3 + $0xb8] sm:$0xff]  ;;  %v1468_v45 = vadd.f32 1.0, %v5061_v22 }
 0x146   :  { %v5093_v47 = vpop.eup %3716  ;;  %3734 = vrcp.f32 %v7588_v61  ;;  %v867_v61 = vsel %vm866_vm6, %v4930_v24, %v865_v26  ;;  %v5130_v24 = vclamps-f32 %v1008_v54, 0.9999999  ;;  %v5140_v57 = vclamps-f32 %v7480_v38, 0.9999999 }
 0x147   :  { %v3719_v46 = vpop.eup %3718  ;;  %3736 = vrcp.f32 %v1493_v55  ;;  %v5132_v31 = vsel %vm868_vm8, %v869_v5, %v867_v61  ;;  %v967_v55 = vand.u32 2147483648, %v5025_v12  ;;  %v883_v37 = vand.u32 2147483648, %v4947_v3 }
 0x148   :  { %v5113_v43 = vpop.eup %3720  ;;  %3738 = vrsqrt.f32 %v5099_v16  ;;  %v963_v30 = vmul.f32 %v3719_v46, %v5025_v12  ;;  %v5142_v46 = vsel %vm959_vm9, %v960_v62, %v958_v8  ;;  %v1467_v62 = vadd.f32 1.0, %v5046_v14 }
 0x149   :  { %3740 = vrsqrt.f32 %v5105_v25  ;;  %v7589_v8 = vmax.f32 %v5110_v56, 1e-15  ;;  %v1495_v14 = vsub.f32 1.0, %v5140_v57  ;;  %v7591_v51 = vmax.f32 %v5132_v31, 1e-15 }
 0x14a   :  { %v5123_v41 = vpop.eup %3722  ;;  %3742 = vrcp.f32 %v1494_v19  ;;  %v965_v5 = vsel %vm964_vm10, %v5025_v12, %v963_v30  ;;  %v876_v30 = vand.u32 2147483648, %v4957_v7  ;;  %vm971_vm0 = vcmp.eq.f32.partialorder %v5072_v23, inf }
 0x14b   :  { %v5128_v15 = vpop.eup %3724  ;;  %3744 = vlog2.f32 %v1511_v63  ;;  %v5157_v38 = vclamps-f32 %v7589_v8, 0.9999999  ;;  %v1483_v63 = vsub.f32 1.0, %v5130_v24  ;;  %v5167_v21 = vsel %vm966_vm11, %v967_v55, %v965_v5 }
 0x14c   :  { %v5134_v26 = vpop.eup %3726  ;;  %3746 = vrcp.f32 %v1008_v54  ;;  %v874_v8 = vsel %vm873_vm12, %v4957_v7, %v872_v35  ;;  %v5178_v52 = vclamps-f32 %v7591_v51, 0.9999999  ;;  %v7592_v35 = vmax.f32 %v5142_v46, 1e-15 }
 0x14d   :  { %v5147_v19 = vpop.eup %3728  ;;  %3748 = vrsqrt.f32 %v5136_v40  ;;  %v1496_v53 = vsub.f32 1.0, %v5157_v38  ;;  %v7489_v5 = vmax.f32 %v5167_v21, 1e-15  ;;  %v5185_v50 = vsel %vm875_vm13, %v876_v30, %v874_v8 }
 0x14e   :  { %v3731_v61 = vpop.eup %3730  ;;  %3750 = vrsqrt.f32 %v5152_v32  ;;  %v5182_v7 = vclamps-f32 %v7592_v35, 0.9999999  ;;  %v7490_v30 = vmax.f32 %v5185_v50, 1e-15  ;;  %vm978_vm1 = vcmp.eq.f32.partialorder %v5099_v16, inf }
 0x14f   :  { %v3733_v36 = vpop.eup %3732  ;;  %3752 = vrcp.f32 %v7590_v18  ;;  %v1469_v18 = vadd.f32 1.0, %v5083_v2  ;;  %vm973_vm2 = vcmp.eq.f32.partialorder %v5072_v23, 0.0  ;;  %vm980_vm3 = vcmp.eq.f32.partialorder %v5099_v16, 0.0 }
 0x150   :  { %v5164_v33 = vpop.eup %3734  ;;  %v1531_v12 = vmul.f32 %v3733_v36, %v1467_v62  ;;  %3754 = vrcp.f32 %v1483_v63  ;;  %v879_v36 = vmul.f32 %v5006_v44, %v4947_v3  ;;  %v1484_v63 = vsub.f32 1.0, %v5178_v52 }
 0x151   :  { %v3737_v54 = vpop.eup %3736  ;;  %3756 = vrcp.f32 %v1495_v14  ;;  %v1497_v2 = vsub.f32 1.0, %v5182_v7  ;;  %v5202_v44 = vclamps-f32 %v7489_v5, 0.9999999  ;;  %v7598_v20 = vmax.f32 %v5142_v46, 1e-15 }
 0x152   :  { %v3739_v55 = vpop.eup %3738  ;;  %3758 = vrcp.f32 %v7593_v39  ;;  %v1533_v62 = vmul.f32 %v3737_v54, %v1468_v45  ;;  %v7594_v45 = vmax.f32 %v5041_v58, 1e-15  ;;  %v881_v54 = vsel %vm880_vm14, %v4947_v3, %v879_v36 }
 0x153   :  { %v5187_v22 = vpop.eup %3740  ;;  %3760 = vrcp.f32 %v1496_v53  ;;  %v5216_v39 = vclamps-f32 %v7490_v30, 0.9999999  ;;  %v1498_v58 = vsub.f32 1.0, %v5202_v44  ;;  %v977_v3 = vmul.f32 %v3739_v55, %v5099_v16 }
 0x154   :  { %v3743_v51 = vpop.eup %3742  ;;  %3762 = vlog2.f32 %v1531_v12  ;;  %v970_v12 = vmul.f32 %v3731_v61, %v5072_v23  ;;  %v1458_v61 = vadd.f32 1.0, %v5130_v24  ;;  %vm887_vm4 = vcmp.eq.f32.partialorder %v4984_v13, inf }
 0x155   :  { %v5197_v8 = vpop.eup %3744  ;;  %3764 = vrcp.f32 %v7594_v45  ;;  %v1535_v53 = vmul.f32 %v3743_v51, %v1469_v18  ;;  %v5222_v18 = vsel %vm882_vm15, %v883_v37, %v881_v54  ;;  %v974_v51 = vand.u32 2147483648, %v5072_v23 }
 0x156   :  { %v5205_v14 = vpop.eup %3746  ;;  %3766 = vlog2.f32 %v1533_v62  ;;  %v972_v37 = vsel %vm971_vm0, %v5072_v23, %v970_v12  ;;  %v7596_v45 = vmax.f32 %v5110_v56, 1e-15  ;;  %v1485_v24 = vsub.f32 1.0, %v5216_v39 }
 0x157   :  { %v5211_v35 = vpop.eup %3748  ;;  %3768 = vrcp.f32 %v1484_v63  ;;  %v7595_v63 = vmax.f32 %v5095_v27, 1e-15  ;;  %v981_v54 = vand.u32 2147483648, %v5099_v16  ;;  %v1471_v27 = vadd.f32 1.0, %v5157_v38 }
 0x158   :  { %v5219_v5 = vpop.eup %3750  ;;  %3770 = vrcp.f32 %v1497_v2  ;;  %v1470_v2 = vadd.f32 1.0, %v5140_v57  ;;  %v979_v57 = vsel %vm978_vm1, %v5099_v16, %v977_v3  ;;  %v7597_v56 = vmax.f32 %v5132_v31, 1e-15 }
 0x159   :  { %v5225_v36 = vpop.eup %3752  ;;  %3772 = vlog2.f32 %v1535_v53  ;;  %v1011_v53 = vmax.f32 %v5222_v18, 1e-15  ;;  %v5257_v16 = vsel %vm980_vm3, %v981_v54, %v979_v57  ;;  %v886_v31 = vmul.f32 %v5055_v28, %v4984_v13 }
 0x15a   :  { %v3755_v62 = vpop.eup %3754  ;;  %3774 = vrcp.f32 %v7595_v63  ;;  %v5247_v63 = vsel %vm973_vm2, %v974_v51, %v972_v37  ;;  %v1459_v51 = vadd.f32 1.0, %v5178_v52  ;;  %v7493_v37 = vmax.f32 %v5257_v16, 1e-15 }
 0x15b   :  { %v3757_v55 = vpop.eup %3756  ;;  %3776 = vrcp.f32 %v7596_v45  ;;  %v1513_v12 = vmul.f32 %v3755_v62, %v1458_v61  ;;  %v5255_v38 = vclamps-f32 %v1011_v53, 0.9999999  ;;  %v1472_v62 = vadd.f32 1.0, %v5182_v7 }
 0x15c   :  { %v5240_v30 = vpop.eup %3758  ;;  %3778 = vrcp.f32 %v1498_v58  ;;  %v1537_v18 = vmul.f32 %v3757_v55, %v1470_v2  ;;  %v4245_v58 = vmov 0   ;;  %v890_v55 = vand.u32 2147483648, %v4984_v13 }
 0x15d   :  { %v3761_v23 = vpop.eup %3760  ;;  %3780 = vrcp.f32 %v7597_v56  ;;  %3669 = vset.pattern.permute.xlu0 %v4245_v58  ;;  %3668 = vset.pattern.permute.xlu1 %v4245_v58  ;;  %v1486_v52 = vsub.f32 1.0, %v5255_v38  ;;  %v888_v54 = vsel %vm887_vm4, %v4984_v13, %v886_v31  ;;  %vm889_vm5 = vcmp.eq.f32.partialorder %v4984_v13, 0.0 }
 0x15e   :  { %v5249_v45 = vpop.eup %3762  ;;  %3782 = vrcp.f32 %v7598_v20  ;;  %v1539_v61 = vmul.f32 %v3761_v23, %v1471_v27  ;;  %v7494_v20 = vmax.f32 %v5247_v63, 1e-15  ;;  %v1473_v56 = vadd.f32 1.0, %v5202_v44 }
 0x15f   :  { %v5253_v17 = vpop.eup %3764  ;;  %3784 = vrcp.f32 %v1485_v24  ;;  %v7599_v24 = vmax.f32 %v5167_v21, 1e-15  ;;  %v5288_v13 = vclamps-f32 %v7493_v37, 0.9999999  ;;  %v5290_v31 = vsel %vm889_vm5, %v890_v55, %v888_v54 }
 0x160   :  { %v5261_v3 = vpop.eup %3766  ;;  %3786 = vlog2.f32 %v1513_v12  ;;  %v5278_v57 = vclamps-f32 %v7494_v20, 0.9999999  ;;  %v1555_v12 = vmul.f32 0.6931472, %v5128_v15  ;;  %v1557_v15 = vmul.f32 0.6931472, %v5147_v19 }
 0x161   :  { %v3769_v46 = vpop.eup %3768  ;;  %3788 = vlog2.f32 %v1537_v18  ;;  %v7600_v18 = vmax.f32 %v5185_v50, 1e-15  ;;  %v1559_v44 = vmul.f32 0.6931472, %v5134_v26  ;;  %vm894_vm6 = vcmp.eq.f32.partialorder %v4950_v42, inf }
 0x162   :  { %v3771_v2 = vpop.eup %3770  ;;  %3790 = vrcp.f32 %v7599_v24  ;;  %v1515_v7 = vmul.f32 %v3769_v46, %v1459_v51  ;;  %v1460_v46 = vadd.f32 1.0, %v5216_v39  ;;  %v1012_v26 = vmax.f32 %v5290_v31, 1e-15 }
 0x163   :  { %v3773_v28 = vpop.eup %3772  ;;  %3792 = vlog2.f32 %v1539_v61  ;;  %v1541_v21 = vmul.f32 %v3771_v2, %v1472_v62  ;;  %v893_v61 = vmul.f32 %v5012_v29, %v4950_v42  ;;  %v1499_v62 = vsub.f32 1.0, %v5278_v57 }
 0x164   :  { %v5274_v27 = vpop.eup %3774  ;;  %3794 = vrcp.f32 %v7600_v18  ;;  %v897_v24 = vand.u32 2147483648, %v4950_v42  ;;  %vm896_vm7 = vcmp.eq.f32.partialorder %v4950_v42, 0.0  ;;  %v5315_v54 = vmul.f32 0.5, %v1555_v12 }
 0x165   :  { %v5280_v23 = vpop.eup %3776  ;;  %3796 = vrcp.f32 %v1011_v53  ;;  %v1561_v53 = vmul.f32 0.6931472, %v5197_v8  ;;  %v1500_v8 = vsub.f32 1.0, %v5288_v13  ;;  %v1581_v31 = vmul.f32 0.6931472, %v5249_v45 }
 0x166   :  { %v3779_v58 = vpop.eup %3778  ;;  %3798 = vrcp.f32 %v1486_v52  ;;  %v895_v52 = vsel %vm894_vm6, %v4950_v42, %v893_v61  ;;  %v5328_v42 = vclamps-f32 %v1012_v26, 0.9999999  ;;  %vm985_vm8 = vcmp.eq.f32.partialorder %v5105_v25, inf }
 0x167   :  { %v5294_v51 = vpop.eup %3780  ;;  %3800 = vlog2.f32 %v1515_v7  ;;  %v1543_v19 = vmul.f32 %v3779_v58, %v1473_v56  ;;  %v5319_v56 = vmul.f32 0.5, %v1559_v44  ;;  %v5330_v12 = vsel %vm896_vm7, %v897_v24, %v895_v52 }
 0x168   :  { %7601 = vst [vmem:[#allocation60_spill] sm:$0xff] %v5294_v51  ;;  %v5299_v50 = vpop.eup %3782  ;;  %3802 = vlog2.f32 %v1541_v21  ;;  %v5317_v21 = vmul.f32 0.5, %v1557_v15  ;;  %v1583_v15 = vmul.f32 0.6931472, %v5261_v3  ;;  %v5335_v44 = vmul.f32 0.5, %v1561_v53 }
 0x169   :  { %7602 = vst [vmem:[#allocation61_spill] sm:$0xff] %v5299_v50  ;;  %v3785_v2 = vpop.eup %3784  ;;  %v1461_v3 = vadd.f32 1.0, %v5255_v38  ;;  %v1013_v53 = vmax.f32 %v5330_v12, 1e-15  ;;  %v5348_v49 = vmul.f32 0.5, %v1581_v31  ;;  %v5361_v38 = vstv %s7437_s3  ;;  %s4246_s3 = smov [#allocation5]  }
 0x16a   :  { %v3787_v39 = vpop.eup %3786  ;;  %v1517_v18 = vmul.f32 %v3785_v2, %v1460_v46  ;;  %v984_v46 = vmul.f32 %v5187_v22, %v5105_v25  ;;  %7609 = vst [vmem:[#allocation66_spill] sm:$0xff] %v5361_v38  ;;  %vm987_vm9 = vcmp.eq.f32.partialorder %v5105_v25, 0.0  ;;  %v5371_v31 = vmul.f32 0.5, %v1583_v15  ;;  %s3596_s21 = sshll.u32 %s4246_s3, 4  ;;  %s3597_s21 = int_to_ptr.vmem [resolvable:$true] %s3596_s21 }
 0x16b   :  { %v3789_v7 = vpop.eup %3788  ;;  %v1563_v2 = vmul.f32 0.6931472, %v3787_v39  ;;  %v1487_v39 = vsub.f32 1.0, %v5328_v42  ;;  %v5379_v6 = vclamps-f32 %v1013_v53, 0.9999999  ;;  %v900_v15 = vmul.f32 %v5065_v60, %v4988_v10  ;;  %s4220_s22 = scalar_lea.vmem %s3597_s21, 6400  ;;  %p4225_p1 = scmp.lt.s32.totalorder %s3597_s21, %s3597_s21 }
 0x16c   :  { %v5321_v58 = vpop.eup %3790  ;;  %v1587_v52 = vmul.f32 0.6931472, %v3789_v7  ;;  %vm901_vm11 = vcmp.eq.f32.partialorder %v4988_v10, inf  ;;  %v904_v51 = vand.u32 2147483648, %v4988_v10  ;;  %vm903_vm15 = vcmp.eq.f32.partialorder %v4988_v10, 0.0  ;;  %p4221_p0 = scmp.ne.s32.totalorder %s3597_s21, %s4220_s22  ;;  %p4226_p2 = scmp.lt.s32.totalorder %s4220_s22, %s4220_s22 }
 0x16d   :  { %7603 = vst [vmem:[#allocation62_spill] sm:$0xff] %v5321_v58  ;;  %v5332_v20 = vpop.eup %3792  ;;  %vm992_vm4 = vcmp.eq.f32.partialorder %v5136_v40, inf  ;;  %v907_v38 = vmul.f32 %v5050_v34, %v4980_v11  ;;  %vm994_vm5 = vcmp.eq.f32.partialorder %v5136_v40, 0.0  ;;  %vm908_vm6 = vcmp.eq.f32.partialorder %v4980_v11, inf }
 0x16e   :  { %v5304_v29 = vpop.xlane.xlu1 %1080  ;;  %v5339_v45 = vpop.eup %3794  ;;  %v5377_v4 = vmul.f32 0.5, %v1587_v52  ;;  %vm915_vm7 = vcmp.eq.f32.partialorder %v5014_v59, inf  ;;  %p4227_p3 = por %p4226_p2, %p4225_p1 }
 0x16f   :  { %v5306_v55 = vpop.xlane.xlu0 %1119  ;;  %3804 = vrsqrt.f32 %v5304_v29  ;;  %7605 = vst [vmem:[#allocation64_spill] sm:$0xff] %v5339_v45  ;;  %v5344_v24 = vpop.eup %3796  ;;  %vm1156_vm10 = vcmp.eq.f32.partialorder %v5304_v29, inf  ;;  %vm1158_vm13 = vcmp.eq.f32.partialorder %v5304_v29, 0.0 }
 0x170   :  { %3806 = vrsqrt.f32 %v5306_v55  ;;  %7607 = vst [vmem:[#allocation65_spill] sm:$0xff] %v5344_v24  ;;  %vm1247_vm12 = vcmp.eq.f32.partialorder %v5306_v55, inf  ;;  %vm1249_vm14 = vcmp.eq.f32.partialorder %v5306_v55, 0.0  ;;  %p4228_p4 = pnand %p4227_p3, %p4221_p0 }
 0x171   :  { %3808 = vrcp.f32 %v1499_v62  ;;  %v1585_v62 = vmul.f32 0.6931472, %v3773_v28 }
 0x172   :  { %v5324_v37 = vpop.xlane.xlu1 %2105  ;;  %3810 = vlog2.f32 %v1543_v19  ;;  %v7606_v19 = vmax.f32 %v5247_v63, 1e-15  ;;  %v7608_v63 = vmax.f32 %v5257_v16, 1e-15 }
 0x173   :  { %7604 = vst [vmem:[#allocation63_spill] sm:$0xff] %v5324_v37  ;;  %v5326_v61 = vpop.xlane.xlu0 %2066  ;;  %3812 = vrcp.f32 %v1500_v8  ;;  %v3799_v8 = vpop.eup %3798  ;;  %v5373_v12 = vmul.f32 0.5, %v1585_v62 }
 0x174   :  { %3814 = vrcp.f32 %v7606_v19  ;;  %v988_v19 = vand.u32 2147483648, %v5105_v25  ;;  %v3801_v7 = vpop.eup %3800  ;;  %v1519_v0 = vmul.f32 %v3799_v8, %v1461_v3 }
 0x175   :  { %3816 = vlog2.f32 %v1517_v18  ;;  %v986_v18 = vsel %vm985_vm8, %v5105_v25, %v984_v46  ;;  %v5368_v16 = vpop.eup %3802  ;;  %vm910_vm8 = vcmp.eq.f32.partialorder %v4980_v11, 0.0 }
 0x176   :  { %v5350_v22 = vpop.xlane.xlu1 %1122  ;;  %3818 = vrcp.f32 %v7608_v63  ;;  %v5375_v63 = vmul.f32 0.5, %v1563_v2  ;;  %v5384_v24 = vsel %vm987_vm9, %v988_v19, %v986_v18  ;;  %v1159_v2 = vand.u32 2147483648, %v5304_v29 }
 0x177   :  { %v5352_v28 = vpop.xlane.xlu0 %1083  ;;  %3820 = vrsqrt.f32 %v5350_v22  ;;  %v1488_v18 = vsub.f32 1.0, %v5379_v6  ;;  %vm1254_vm0 = vcmp.eq.f32.partialorder %v5350_v22, inf  ;;  %vm1256_vm2 = vcmp.eq.f32.partialorder %v5350_v22, 0.0 }
 0x178   :  { %3822 = vrsqrt.f32 %v5352_v28  ;;  %7610 = vst [vmem:[#allocation67_spill] sm:$0xff] %v5375_v63  ;;  %vm1163_vm1 = vcmp.eq.f32.partialorder %v5352_v28, inf  ;;  %vm1165_vm3 = vcmp.eq.f32.partialorder %v5352_v28, 0.0  ;;  %vm917_vm9 = vcmp.eq.f32.partialorder %v5014_v59, 0.0 }
 0x179   :  { %v3805_v48 = vpop.eup %3804  ;;  %3824 = vrcp.f32 %v1012_v26 }
 0x17a   :  { %v3807_v46 = vpop.eup %3806  ;;  %v1155_v25 = vmul.f32 %v3805_v48, %v5304_v29  ;;  %v5382_v1 = vpop.xlane.xlu1 %2069  ;;  %3826 = vrcp.f32 %v1487_v39  ;;  %v1250_v48 = vand.u32 2147483648, %v5306_v55 }
 0x17b   :  { %7611 = vst [vmem:[#allocation68_spill] sm:$0xff] %v5382_v1  ;;  %v5388_v62 = vpop.eup %3808  ;;  %v1246_v26 = vmul.f32 %v3807_v46, %v5306_v55  ;;  %v5404_v19 = vpop.xlane.xlu0 %2108  ;;  %3828 = vlog2.f32 %v1519_v0  ;;  %v5427_v0 = vmul.f32 0.6931472, %v5332_v20  ;;  %v991_v20 = vmul.f32 %v5211_v35, %v5136_v40 }
 0x17c   :  { %v5394_v52 = vpop.eup %3810  ;;  %v1157_v3 = vsel %vm1156_vm10, %v5304_v29, %v1155_v25  ;;  %7612 = vst [vmem:[#allocation69_spill] sm:$0xff] %v5404_v19  ;;  %v1026_v25 = vmax.f32 %v5384_v24, 1e-15  ;;  %3830 = vrcp.f32 %v1013_v53  ;;  %v5430_v24 = vadd.f32 1.0, %v5328_v42 }
 0x17d   :  { %v5400_v60 = vpop.eup %3812  ;;  %v1248_v8 = vsel %vm1247_vm12, %v5306_v55, %v1246_v26  ;;  %v1160_v39 = vsel %vm1158_vm13, %v1159_v2, %v1157_v3  ;;  %v902_v2 = vsel %vm901_vm11, %v4988_v10, %v900_v15  ;;  %v5432_v53 = vmul.f32 0.6931472, %v3801_v7 }
 0x17e   :  { %v5407_v46 = vpop.eup %3814  ;;  %v1251_v45 = vsel %vm1249_vm14, %v1250_v48, %v1248_v8  ;;  %v5409_v58 = vpop.xlane.xlu1 %1086  ;;  %v5415_v26 = vmax.f32 %v1160_v39, 1e-15  ;;  %v1474_v39 = vadd.f32 1.0, %v5278_v57  ;;  %v1475_v15 = vadd.f32 1.0, %v5288_v13 }
 0x17f   :  { %7613 = vst [vmem:[#allocation70_spill] sm:$0xff] %v5407_v46  ;;  %v5413_v50 = vpop.eup %3816  ;;  %v5423_v48 = vmax.f32 %v1251_v45, 1e-15  ;;  %3832 = vrsqrt.f32 %v5409_v58  ;;  %v5441_v46 = vsel %vm903_vm15, %v904_v51, %v902_v2  ;;  %v1257_v57 = vand.u32 2147483648, %v5350_v22 }
 0x180   :  { %v5421_v3 = vpop.eup %3818  ;;  %3834 = vrcp.f32 %v1488_v18  ;;  %v1379_v7 = vmul.f32 %v5113_v43, %v5415_v26  ;;  %v5450_v18 = vpop.xlane.xlu0 %1125  ;;  %v1166_v43 = vand.u32 2147483648, %v5352_v28  ;;  %vm1170_vm10 = vcmp.eq.f32.partialorder %v5409_v58, inf }
 0x181   :  { %7614 = vst [vmem:[#allocation71_spill] sm:$0xff] %v5421_v3  ;;  %v3821_v8 = vpop.eup %3820  ;;  %v5437_v3 = vclamps-f32 %v1026_v25, 0.9999999  ;;  %v1392_v35 = vmul.f32 %v5225_v36, %v5423_v48  ;;  %3836 = vrsqrt.f32 %v5450_v18  ;;  %vm1172_vm11 = vcmp.eq.f32.partialorder %v5409_v58, 0.0 }
 0x182   :  { %v3823_v10 = vpop.eup %3822  ;;  %v1253_v45 = vmul.f32 %v3821_v8, %v5350_v22  ;;  %v1629_v36 = vmul.f32 %v5315_v54, %v1379_v7  ;;  %3838 = vrcp.f32 %v1026_v25  ;;  %v5478_v37 = vpop.xlane.xlu1 %2111  ;;  %v993_v54 = vsel %vm992_vm4, %v5136_v40, %v991_v20 }
 0x183   :  { %v5443_v42 = vpop.eup %3824  ;;  %v1162_v13 = vmul.f32 %v3823_v10, %v5352_v28  ;;  %v1501_v1 = vsub.f32 1.0, %v5437_v3  ;;  %v995_v10 = vand.u32 2147483648, %v5136_v40  ;;  %7617 = vst [vmem:[#allocation74_spill] sm:$0xff] %v5478_v37  ;;  %v914_v25 = vmul.f32 %v5086_v9, %v5014_v59 }
 0x184   :  { %7615 = vst [vmem:[#allocation72_spill] sm:$0xff] %v5443_v42  ;;  %v5452_v8 = vpop.eup %3826  ;;  %v1255_v51 = vsel %vm1254_vm0, %v5350_v22, %v1253_v45  ;;  %v5494_v20 = vpop.xlane.xlu0 %2072  ;;  %vm999_vm12 = vcmp.eq.f32.partialorder %v5152_v32, inf  ;;  %vm1261_vm13 = vcmp.eq.f32.partialorder %v5450_v18, inf  ;;  %vm1001_vm14 = vcmp.eq.f32.partialorder %v5152_v32, 0.0 }
 0x185   :  { %v1164_v2 = vsel %vm1163_vm1, %v5352_v28, %v1162_v13  ;;  %v1258_v42 = vsel %vm1256_vm2, %v1257_v57, %v1255_v51  ;;  %v5471_v13 = vpop.eup %3828  ;;  %v1642_v57 = vmul.f32 %v5348_v49, %v1392_v35  ;;  %v1545_v51 = vmul.f32 %v5388_v62, %v1474_v39 }
 0x186   :  { %v1167_v45 = vsel %vm1165_vm3, %v1166_v43, %v1164_v2  ;;  %v5467_v19 = vmax.f32 %v1258_v42, 1e-15  ;;  %v5476_v63 = vpop.eup %3830  ;;  %v7618_v42 = vmax.f32 %v5441_v46, 1e-15  ;;  %v1547_v62 = vmul.f32 %v5400_v60, %v1475_v15 }
 0x187   :  { %7616 = vst [vmem:[#allocation73_spill] sm:$0xff] %v5476_v63  ;;  %v5487_v7 = vmax.f32 %v1167_v45, 1e-15  ;;  %3840 = vrcp.f32 %v1501_v1  ;;  %v911_v35 = vand.u32 2147483648, %v4980_v11  ;;  %v5498_v43 = vsel %vm994_vm5, %v995_v10, %v993_v54 }
 0x188   :  { %v5484_v34 = vclamps-f32 %v7618_v42, 0.9999999  ;;  %3842 = vtanh.f32 %v1629_v36  ;;  %v1393_v40 = vmul.f32 %v5240_v30, %v5467_v19  ;;  %v909_v60 = vsel %vm908_vm6, %v4980_v11, %v907_v38  ;;  %v5512_v11 = vpop.xlane.xlu1 %1128  ;;  %v5523_v54 = vpop.xlane.xlu0 %1089 }
 0x189   :  { %v3833_v49 = vpop.eup %3832  ;;  %3844 = vtanh.f32 %v1642_v57  ;;  %v918_v30 = vand.u32 2147483648, %v5014_v59  ;;  %v1380_v15 = vmul.f32 %v5123_v41, %v5487_v7  ;;  %v916_v2 = vsel %vm915_vm7, %v5014_v59, %v914_v25 }
 0x18a   :  { %v3835_v39 = vpop.eup %3834  ;;  %3846 = vrcp.f32 %v5415_v26  ;;  %v1169_v1 = vmul.f32 %v3833_v49, %v5409_v58  ;;  %v1489_v9 = vsub.f32 1.0, %v5484_v34  ;;  %v1643_v38 = vmul.f32 %v5371_v31, %v1393_v40 }
 0x18b   :  { %3848 = vrcp.f32 %v5423_v48  ;;  %v1463_v10 = vadd.f32 1.0, %v5379_v6  ;;  %v5515_v36 = vsel %vm910_vm8, %v911_v35, %v909_v60  ;;  %v3837_v45 = vpop.eup %3836  ;;  %v5519_v57 = vmul.f32 0.6931472, %v5368_v16 }
 0x18c   :  { %3850 = vlog2.f32 %v1545_v51  ;;  %v1476_v41 = vadd.f32 1.0, %v5437_v3  ;;  %v1171_v59 = vsel %vm1170_vm10, %v5409_v58, %v1169_v1  ;;  %v7504_v31 = vmax.f32 %v5498_v43, 1e-15  ;;  %v5528_v6 = vpop.eup %3838 }
 0x18d   :  { %3852 = vlog2.f32 %v1547_v62  ;;  %v5526_v51 = vsel %vm917_vm9, %v918_v30, %v916_v2  ;;  %7619 = vst [vmem:[#allocation75_spill] sm:$0xff] %v5528_v6  ;;  %v1630_v42 = vmul.f32 %v5317_v21, %v1380_v15  ;;  %v1173_v49 = vand.u32 2147483648, %v5409_v58 }
 0x18e   :  { %3854 = vrcp.f32 %v1489_v9  ;;  %v7505_v16 = vmax.f32 %v5515_v36, 1e-15  ;;  %v1260_v3 = vmul.f32 %v3837_v45, %v5450_v18  ;;  %v998_v62 = vmul.f32 %v5219_v5, %v5152_v32 }
 0x18f   :  { %3856 = vrsqrt.f32 %v5512_v11  ;;  %v1174_v40 = vsel %vm1172_vm11, %v1173_v49, %v1171_v59  ;;  %v7506_v21 = vmax.f32 %v5526_v51, 1e-15  ;;  %v1521_v60 = vmul.f32 %v5452_v8, %v5430_v24  ;;  %v5561_v59 = vpop.xlane.xlu0 %2114 }
 0x190   :  { %3858 = vtanh.f32 %v1643_v38  ;;  %v1523_v1 = vmul.f32 %v3835_v39, %v1463_v10  ;;  %v5546_v9 = vclamps-f32 %v7504_v31, 0.9999999  ;;  %v5551_v30 = vclamps-f32 %v7505_v16, 0.9999999  ;;  %7620 = vst [vmem:[#allocation76_spill] sm:$0xff] %v5561_v59 }
 0x191   :  { %v3841_v25 = vpop.eup %3840  ;;  %3860 = vrsqrt.f32 %v5523_v54  ;;  %v1262_v2 = vsel %vm1261_vm13, %v5450_v18, %v1260_v3  ;;  %v5555_v38 = vmax.f32 %v1174_v40, 1e-15  ;;  %v1000_v24 = vsel %vm999_vm12, %v5152_v32, %v998_v62 }
 0x192   :  { %v3843_v35 = vpop.eup %3842  ;;  %3862 = vrcp.f32 %v5467_v19  ;;  %v1002_v8 = vand.u32 2147483648, %v5152_v32  ;;  %v1264_v45 = vand.u32 2147483648, %v5450_v18  ;;  %vm1263_vm15 = vcmp.eq.f32.partialorder %v5450_v18, 0.0 }
 0x193   :  { %v3845_v5 = vpop.eup %3844  ;;  %3864 = vtanh.f32 %v1630_v42  ;;  %v5565_v42 = vclamps-f32 %v7506_v21, 0.9999999  ;;  %v1502_v62 = vsub.f32 1.0, %v5546_v9  ;;  %v7621_v40 = vmax.f32 %v5441_v46, 1e-15 }
 0x194   :  { %v3847_v15 = vpop.eup %3846  ;;  %3866 = vrcp.f32 %v5487_v7  ;;  %v1464_v31 = vadd.f32 1.0, %v5484_v34  ;;  %v1490_v16 = vsub.f32 1.0, %v5551_v30  ;;  %vm1729_vm0 = vcmp.gt.f32.partialorder %v5304_v29, 0.0 }
 0x195   :  { %v3849_v39 = vpop.eup %3848  ;;  %v1704_v10 = vmul.f32 %v3847_v15, %v3843_v35  ;;  %3868 = vrcp.f32 %v7621_v40  ;;  %v1265_v15 = vsel %vm1263_vm15, %v1264_v45, %v1262_v2  ;;  %v1549_v6 = vmul.f32 %v3841_v25, %v1476_v41  ;;  %v5597_v41 = vpop.xlane.xlu0 %1131 }
 0x196   :  { %v5567_v49 = vpop.eup %3850  ;;  %v1717_v3 = vmul.f32 %v3849_v39, %v3845_v5  ;;  %3870 = vlog2.f32 %v1521_v60  ;;  %v1381_v5 = vmul.f32 %v5093_v47, %v5555_v38  ;;  %v5580_v39 = vpop.xlane.xlu1 %2075  ;;  %v5584_v46 = vsel %vm1001_vm14, %v1002_v8, %v1000_v24 }
 0x197   :  { %v5573_v35 = vpop.eup %3852  ;;  %7622 = vst [vmem:[#allocation77_spill] sm:$0xff] %v5580_v39  ;;  %vm1742_vm1 = vcmp.gt.f32.partialorder %v5306_v55, 0.0  ;;  %v5587_v60 = vsel %vm1729_vm0, %v1704_v10, 0.0  ;;  %3872 = vlog2.f32 %v1523_v1  ;;  %v1491_v34 = vsub.f32 1.0, %v5565_v42 }
 0x198   :  { %v3855_v21 = vpop.eup %3854  ;;  %v5590_v29 = vsel %vm1742_vm1, %v1717_v3, 0.0  ;;  %v5592_v45 = vmax.f32 %v1265_v15, 1e-15  ;;  %v5595_v47 = vmul.f32 0.5, %v5427_v0  ;;  %3874 = vrcp.f32 %v1502_v62 }
 0x199   :  { %v3857_v40 = vpop.eup %3856  ;;  %v5600_v25 = vmul.f32 0.5, %v5432_v53  ;;  %v1525_v55 = vmul.f32 %v3855_v21, %v1464_v31  ;;  %3876 = vrcp.f32 %v1490_v16  ;;  %v7507_v1 = vmax.f32 %v5584_v46, 1e-15 }
 0x19a   :  { %v3859_v2 = vpop.eup %3858  ;;  %v5605_v8 = vmul.f32 %v5587_v60, %v5415_v26  ;;  %v1631_v10 = vmul.f32 %v5319_v56, %v1381_v5  ;;  %v5609_v0 = vmul.f32 0.5, %v5519_v57  ;;  %3878 = vlog2.f32 %v1549_v6  ;;  %v5619_v15 = vpop.xlane.xlu1 %1092 }
 0x19b   :  { %v3861_v32 = vpop.eup %3860  ;;  %v5613_v53 = vmul.f32 %v5590_v29, %v5423_v48  ;;  %v1267_v16 = vmul.f32 %v3857_v40, %v5512_v11  ;;  %3880 = vrcp.f32 %v1491_v34  ;;  %v1394_v21 = vmul.f32 %v5253_v17, %v5592_v45 }
 0x19c   :  { %v3863_v24 = vpop.eup %3862  ;;  %v1176_v62 = vmul.f32 %v3861_v32, %v5523_v54  ;;  %3882 = vrsqrt.f32 %v5597_v41  ;;  %v1593_v56 = vmul.f32 0.6931472, %v5394_v52  ;;  %vm1743_vm2 = vcmp.gt.f32.partialorder %v5350_v22, 0.0 }
 0x19d   :  { %v3865_v3 = vpop.eup %3864  ;;  %v1718_v31 = vmul.f32 %v3863_v24, %v3859_v2  ;;  %vm1268_vm3 = vcmp.eq.f32.partialorder %v5512_v11, inf  ;;  %3884 = vlog2.f32 %v1525_v55  ;;  %v5627_v6 = vclamps-f32 %v7507_v1, 0.9999999 }
 0x19e   :  { %v3867_v57 = vpop.eup %3866  ;;  %v7508_v17 = vmax.f32 %v5605_v8, 1e-15  ;;  %3886 = vtanh.f32 %v1631_v10  ;;  %vm1177_vm4 = vcmp.eq.f32.partialorder %v5523_v54, inf  ;;  %v7509_v52 = vmax.f32 %v5613_v53, 1e-15 }
 0x19f   :  { %v5629_v5 = vpop.eup %3868  ;;  %v1705_v40 = vmul.f32 %v3867_v57, %v3865_v3  ;;  %v5634_v2 = vsel %vm1743_vm2, %v1718_v31, 0.0  ;;  %v1269_v22 = vsel %vm1268_vm3, %v5512_v11, %v1267_v16  ;;  %3888 = vrsqrt.f32 %v5619_v15 }
 0x1a0   :  { %7623 = vst [vmem:[#allocation78_spill] sm:$0xff] %v5629_v5  ;;  %v3871_v34 = vpop.eup %3870  ;;  %v1644_v32 = vmul.f32 %v5373_v12, %v1394_v21  ;;  %3890 = vrcp.f32 %v5555_v38  ;;  %v1271_v55 = vand.u32 2147483648, %v5512_v11  ;;  %v1178_v24 = vsel %vm1177_vm4, %v5523_v54, %v1176_v62 }
 0x1a1   :  { %v5642_v10 = vpop.eup %3872  ;;  %vm1730_vm5 = vcmp.gt.f32.partialorder %v5352_v28, 0.0  ;;  %v1180_v3 = vand.u32 2147483648, %v5523_v54  ;;  %vm1179_vm6 = vcmp.eq.f32.partialorder %v5523_v54, 0.0  ;;  %vm1270_vm7 = vcmp.eq.f32.partialorder %v5512_v11, 0.0 }
 0x1a2   :  { %v3875_v31 = vpop.eup %3874  ;;  %3892 = vrcp.f32 %v7508_v17  ;;  %v5650_v12 = vsel %vm1730_vm5, %v1705_v40, 0.0  ;;  %v5654_v16 = vmul.f32 %v5634_v2, %v5467_v19  ;;  %v1272_v21 = vsel %vm1270_vm7, %v1271_v55, %v1269_v22 }
 0x1a3   :  { %v3877_v62 = vpop.eup %3876  ;;  %3894 = vrcp.f32 %v7509_v52  ;;  %v1181_v28 = vsel %vm1179_vm6, %v1180_v3, %v1178_v24  ;;  %v1567_v57 = vmul.f32 0.6931472, %v5413_v50  ;;  %v1477_v1 = vadd.f32 1.0, %v5546_v9  ;;  %v5678_v52 = vpop.xlane.xlu1 %2117 }
 0x1a4   :  { %v3879_v5 = vpop.eup %3878  ;;  %3896 = vtanh.f32 %v1644_v32  ;;  %v1569_v17 = vmul.f32 0.6931472, %v5471_v13  ;;  %v1465_v40 = vadd.f32 1.0, %v5551_v30  ;;  %v1503_v63 = vsub.f32 1.0, %v5627_v6  ;;  %7626 = vst [vmem:[#allocation80_spill] sm:$0xff] %v5678_v52 }
 0x1a5   :  { %v3881_v39 = vpop.eup %3880  ;;  %v5665_v22 = vmul.f32 %v5650_v12, %v5487_v7  ;;  %v5667_v55 = vmax.f32 %v1272_v21, 1e-15  ;;  %v5669_v24 = vmul.f32 0.5, %v1593_v56  ;;  %v7625_v50 = vmax.f32 %v5515_v36, 1e-15 }
 0x1a6   :  { %v3883_v9 = vpop.eup %3882  ;;  %v5675_v13 = vmax.f32 %v1181_v28, 1e-15  ;;  %v1595_v30 = vmul.f32 0.6931472, %v5567_v49  ;;  %v5680_v59 = vmul.f32 0.5, %v1567_v57  ;;  %v1551_v36 = vmul.f32 %v3875_v31, %v1477_v1 }
 0x1a7   :  { %7624 = vst [vmem:[#allocation79_spill] sm:$0xff] %v5669_v24  ;;  %3898 = vrcp.f32 %v7625_v50  ;;  %v3885_v3 = vpop.eup %3884  ;;  %v1597_v56 = vmul.f32 0.6931472, %v5573_v35  ;;  %v7627_v21 = vmax.f32 %v5498_v43, 1e-15  ;;  %v5685_v24 = vmul.f32 0.5, %v1569_v17 }
 0x1a8   :  { %3900 = vrcp.f32 %v5592_v45  ;;  %v3887_v50 = vpop.eup %3886  ;;  %v1571_v32 = vmul.f32 0.6931472, %v3871_v34  ;;  %v1527_v37 = vmul.f32 %v3877_v62, %v1465_v40  ;;  %v1805_v49 = vmax.f32 %v5665_v22, 1e-15  ;;  %v5705_v40 = vpop.xlane.xlu0 %2078 }
 0x1a9   :  { %3902 = vrcp.f32 %v7627_v21  ;;  %v3889_v28 = vpop.eup %3888  ;;  %v1395_v52 = vmul.f32 %v5274_v27, %v5667_v55  ;;  %v1274_v57 = vmul.f32 %v3883_v9, %v5597_v41  ;;  %v7628_v35 = vmax.f32 %v5526_v51, 1e-15  ;;  %v5716_v21 = vpop.xlane.xlu1 %1134 }
 0x1aa   :  { %3904 = vrcp.f32 %v1503_v63  ;;  %v3891_v43 = vpop.eup %3890  ;;  %v7629_v1 = vmax.f32 %v5654_v16, 1e-15  ;;  %v1382_v17 = vmul.f32 %v5164_v33, %v5675_v13  ;;  %vm1275_vm8 = vcmp.eq.f32.partialorder %v5597_v41, inf }
 0x1ab   :  { %3906 = vrcp.f32 %v7628_v35  ;;  %v5698_v63 = vmul.f32 0.5, %v1595_v30  ;;  %v1706_v34 = vmul.f32 %v3891_v43, %v3887_v50  ;;  %v5700_v31 = vmul.f32 0.5, %v1597_v56 }
 0x1ac   :  { %3908 = vrcp.f32 %v7629_v1  ;;  %v1466_v27 = vadd.f32 1.0, %v5565_v42  ;;  %v3893_v62 = vpop.eup %3892  ;;  %v1278_v51 = vand.u32 2147483648, %v5597_v41  ;;  %vm1277_vm9 = vcmp.eq.f32.partialorder %v5597_v41, 0.0 }
 0x1ad   :  { %7630 = vst [vmem:[#allocation81_spill] sm:$0xff] %v5700_v31  ;;  %3910 = vlog2.f32 %v1551_v36  ;;  %v5707_v9 = vmul.f32 0.5, %v1571_v32  ;;  %v3895_v33 = vpop.eup %3894  ;;  %v1645_v30 = vmul.f32 %v5377_v4, %v1395_v52  ;;  %v1183_v56 = vmul.f32 %v3889_v28, %v5619_v15 }
 0x1ae   :  { %3912 = vlog2.f32 %v1527_v37  ;;  %v1276_v42 = vsel %vm1275_vm8, %v5597_v41, %v1274_v57  ;;  %v3897_v36 = vpop.eup %3896  ;;  %vm1731_vm10 = vcmp.gt.f32.partialorder %v5409_v58, 0.0  ;;  %v1632_v32 = vmul.f32 %v5335_v44, %v1382_v17 }
 0x1af   :  { %7631 = vst [vmem:[#allocation82_spill] sm:$0xff] %v5707_v9  ;;  %3914 = vrcp.f32 %v1805_v49  ;;  %v1573_v37 = vmul.f32 0.6931472, %v5642_v10  ;;  %v1599_v50 = vmul.f32 0.6931472, %v3879_v5  ;;  %v5723_v4 = vsel %vm1731_vm10, %v1706_v34, 0.0 }
 0x1b0   :  { %v1855_v43 = vmul.f32 0.996, %v3893_v62  ;;  %v1575_v52 = vmul.f32 0.6931472, %v3885_v3  ;;  %v1529_v28 = vmul.f32 %v3881_v39, %v1466_v27  ;;  %vm1184_vm11 = vcmp.eq.f32.partialorder %v5619_v15, inf  ;;  %v5744_v62 = vpop.xlane.xlu0 %1095 }
 0x1b1   :  { %v5721_v35 = vpop.eup %3898  ;;  %v1279_v57 = vsel %vm1277_vm9, %v1278_v51, %v1276_v42  ;;  %3916 = vrsqrt.f32 %v5716_v21  ;;  %v1478_v58 = vadd.f32 1.0, %v5627_v6  ;;  %v1881_v5 = vmul.f32 0.996, %v3895_v33 }
 0x1b2   :  { %7632 = vst [vmem:[#allocation83_spill] sm:$0xff] %v5721_v35  ;;  %v3901_v1 = vpop.eup %3900  ;;  %3918 = vtanh.f32 %v1645_v30  ;;  %v1185_v17 = vsel %vm1184_vm11, %v5619_v15, %v1183_v56  ;;  %v7634_v39 = vmax.f32 %v5605_v8, 1e-15  ;;  %v5741_v27 = vmul.f32 %v5723_v4, %v5555_v38 }
 0x1b3   :  { %v5730_v44 = vpop.eup %3902  ;;  %v1719_v10 = vmul.f32 %v3901_v1, %v3897_v36  ;;  %3920 = vtanh.f32 %v1632_v32  ;;  %v1187_v6 = vand.u32 2147483648, %v5619_v15  ;;  %v5751_v8 = vmax.f32 %v1279_v57, 1e-15 }
 0x1b4   :  { %7633 = vst [vmem:[#allocation84_spill] sm:$0xff] %v5730_v44  ;;  %v3905_v34 = vpop.eup %3904  ;;  %vm5735_vm12 = vcmp.gt.f32.partialorder %v7634_v39, 0.996  ;;  %3922 = vrcp.f32 %v5667_v55  ;;  %vm1186_vm13 = vcmp.eq.f32.partialorder %v5619_v15, 0.0  ;;  %v7638_v56 = vmax.f32 %v5613_v53, 1e-15  ;;  %v5808_v42 = vpop.xlane.xlu0 %2120 }
 0x1b5   :  { %v5746_v51 = vpop.eup %3906  ;;  %v1904_v33 = vsel %vm5735_vm12, %v1855_v43, 1.0  ;;  %vm1744_vm15 = vcmp.gt.f32.partialorder %v5450_v18, 0.0  ;;  %3924 = vrcp.f32 %v5675_v13  ;;  %v1188_v36 = vsel %vm1186_vm13, %v1187_v6, %v1185_v17  ;;  %7649 = vst [vmem:[#allocation90_spill] sm:$0xff] %v5808_v42 }
 0x1b6   :  { %7637 = vst [vmem:[#allocation85_spill] sm:$0xff] %v5746_v51  ;;  %v3909_v30 = vpop.eup %3908  ;;  %vm5756_vm14 = vcmp.gt.f32.partialorder %v7638_v56, 0.996  ;;  %v5764_v1 = vsel %vm1744_vm15, %v1719_v10, 0.0  ;;  %3926 = vrsqrt.f32 %v5744_v62  ;;  %v1553_v57 = vmul.f32 %v3905_v34, %v1478_v58 }
 0x1b7   :  { %v3911_v32 = vpop.eup %3910  ;;  %v1917_v43 = vsel %vm5756_vm14, %v1881_v5, 1.0  ;;  %v5768_v53 = vmul.f32 %v1904_v33, %v5587_v60  ;;  %v7510_v3 = vmax.f32 %v5741_v27, 1e-15  ;;  %v5771_v56 = vmul.f32 0.5, %v1573_v37 }
 0x1b8   :  { %v3913_v39 = vpop.eup %3912  ;;  %v5773_v18 = vmul.f32 0.5, %v1599_v50  ;;  %v1883_v6 = vmul.f32 0.996, %v3909_v30  ;;  %v1396_v5 = vmul.f32 %v5280_v23, %v5751_v8  ;;  %v5777_v10 = vmax.f32 %v1188_v36, 1e-15 }
 0x1b9   :  { %7641 = vst [vmem:[#allocation86_spill] sm:$0xff] %v5771_v56  ;;  %v3915_v17 = vpop.eup %3914  ;;  %3928 = vlog2.f32 %v1529_v28  ;;  %v5780_v58 = vmul.f32 %v1917_v43, %v5590_v29  ;;  %v5784_v60 = vmul.f32 %v5764_v1, %v5592_v45  ;;  %v5786_v34 = vmul.f32 0.5, %v1575_v52 }
 0x1ba   :  { %7642 = vst [vmem:[#allocation87_spill] sm:$0xff] %v5773_v18  ;;  %v7644_v37 = vmax.f32 %v5584_v46, 1e-15  ;;  %vm1745_vm0 = vcmp.gt.f32.partialorder %v5512_v11, 0.0  ;;  %v5791_v50 = vmul.f32 0.6931472, %v3911_v32  ;;  %v1954_v29 = vmul.f32 %v5768_v53, %v5415_v26  ;;  %v5806_v46 = vpop.xlane.xlu1 %2081 }
 0x1bb   :  { %7643 = vst [vmem:[#allocation88_spill] sm:$0xff] %v5786_v34  ;;  %v5793_v23 = vmul.f32 0.6931472, %v3913_v39  ;;  %v3917_v28 = vpop.eup %3916  ;;  %v1857_v33 = vmul.f32 0.996, %v3915_v17  ;;  %vm1732_vm2 = vcmp.gt.f32.partialorder %v5523_v54, 0.0  ;;  %v1646_v32 = vmul.f32 %v5595_v47, %v1396_v5 }
 0x1bc   :  { %3930 = vrcp.f32 %v7644_v37  ;;  %v7645_v30 = vmax.f32 %v5654_v16, 1e-15  ;;  %7648 = vst [vmem:[#allocation89_spill] sm:$0xff] %v5806_v46  ;;  %v3919_v36 = vpop.eup %3918  ;;  %vm5812_vm3 = vcmp.gt.f32.partialorder %v1805_v49, 0.996  ;;  %v1383_v43 = vmul.f32 %v5205_v14, %v5777_v10  ;;  %v7652_v37 = vld [vmem:[#allocation63_spill] sm:$0xff] }
 0x1bd   :  { %3932 = vlog2.f32 %v1553_v57  ;;  %v3921_v57 = vpop.eup %3920  ;;  %v1967_v39 = vmul.f32 %v5780_v58, %v5423_v48  ;;  %v2140_v17 = vmul.f32 %v5326_v61, %v5768_v53  ;;  %v1281_v47 = vmul.f32 %v3917_v28, %v5716_v21  ;;  %v7658_v54 = vld [vmem:[#allocation68_spill] sm:$0xff] }
 0x1be   :  { %vm5799_vm1 = vcmp.gt.f32.partialorder %v7645_v30, 0.996  ;;  %3934 = vrcp.f32 %v7510_v3  ;;  %v3923_v49 = vpop.eup %3922  ;;  %vm1282_vm4 = vcmp.eq.f32.partialorder %v5716_v21, inf  ;;  %v5832_v5 = vmul.f32 %v1954_v29, %v1954_v29 }
 0x1bf   :  { %v1918_v16 = vsel %vm5799_vm1, %v1883_v6, 1.0  ;;  %3936 = vrcp.f32 %v5777_v10  ;;  %v2153_v6 = vmul.f32 %v7652_v37, %v5780_v58  ;;  %v3925_v14 = vpop.eup %3924  ;;  %v1905_v61 = vsel %vm5812_vm3, %v1857_v33, 1.0  ;;  %v7653_v37 = vld [vmem:[#allocation67_spill] sm:$0xff]  ;;  %v5846_v33 = vpop.xlane.xlu1 %1098 }
 0x1c0   :  { %3938 = vrcp.f32 %v5751_v8  ;;  %v5837_v48 = vmul.f32 %v1918_v16, %v5634_v2  ;;  %v1720_v30 = vmul.f32 %v3923_v49, %v3919_v36  ;;  %v3927_v52 = vpop.eup %3926  ;;  %v1707_v3 = vmul.f32 %v3925_v14, %v3921_v57  ;;  %v5848_v2 = vpop.xlane.xlu0 %1137 }
 0x1c1   :  { %3940 = vtanh.f32 %v1646_v32  ;;  %v1633_v22 = vmul.f32 %v7653_v37, %v1383_v43  ;;  %v1285_v51 = vand.u32 2147483648, %v5716_v21  ;;  %v5841_v28 = vmul.f32 %v1967_v39, %v1967_v39  ;;  %v7656_v39 = vld [vmem:[#allocation66_spill] sm:$0xff] }
 0x1c2   :  { %v2165_v35 = vmul.f32 2.0, %v2140_v17  ;;  %v7654_v29 = vmax.f32 %v5784_v60, 1e-15  ;;  %vm1191_vm5 = vcmp.eq.f32.partialorder %v5744_v62, inf  ;;  %v5851_v26 = vmul.f32 %v1905_v61, %v5650_v12  ;;  %v7657_v61 = vld [vmem:[#allocation69_spill] sm:$0xff] }
 0x1c3   :  { %v3929_v36 = vpop.eup %3928  ;;  %v1190_v16 = vmul.f32 %v3927_v52, %v5744_v62  ;;  %v1283_v32 = vsel %vm1282_vm4, %v5716_v21, %v1281_v47  ;;  %vm1284_vm6 = vcmp.eq.f32.partialorder %v5716_v21, 0.0  ;;  %v2178_v57 = vmul.f32 2.0, %v2153_v6 }
 0x1c4   :  { %3942 = vrcp.f32 %v7654_v29  ;;  %v2291_v17 = vmul.f32 %v7656_v39, %v5832_v5  ;;  %v1968_v49 = vmul.f32 %v5837_v48, %v5467_v19  ;;  %v5866_v12 = vsel %vm1745_vm0, %v1720_v30, 0.0 }
 0x1c5   :  { %v2154_v52 = vmul.f32 %v7657_v61, %v5837_v48  ;;  %v5872_v47 = vsel %vm1732_vm2, %v1707_v3, 0.0  ;;  %v1194_v6 = vand.u32 2147483648, %v5744_v62  ;;  %3944 = vrsqrt.f32 %v5848_v2 }
 0x1c6   :  { %v5858_v43 = vpop.eup %3930  ;;  %v2190_v29 = vadd.f32 1.0, %v2165_v35  ;;  %v1192_v19 = vsel %vm1191_vm5, %v5744_v62, %v1190_v16  ;;  %vm1193_vm7 = vcmp.eq.f32.partialorder %v5744_v62, 0.0  ;;  %v1286_v11 = vsel %vm1284_vm6, %v1285_v51, %v1283_v32 }
 0x1c7   :  { %7655 = vst [vmem:[#allocation63_spill] sm:$0xff] %v5858_v43  ;;  %v3933_v14 = vpop.eup %3932  ;;  %v1955_v30 = vmul.f32 %v5851_v26, %v5487_v7  ;;  %v2141_v3 = vmul.f32 %v7658_v54, %v5851_v26  ;;  %v5886_v61 = vmul.f32 %v5866_v12, %v5667_v55  ;;  %3946 = vtanh.f32 %v1633_v22  ;;  %v5896_v7 = vpop.xlane.xlu1 %2123 }
 0x1c8   :  { %v3935_v37 = vpop.eup %3934  ;;  %v2203_v35 = vadd.f32 1.0, %v2178_v57  ;;  %v2304_v34 = vmul.f32 %v7656_v39, %v5841_v28  ;;  %v5890_v16 = vmul.f32 %v1968_v49, %v1968_v49  ;;  %v5894_v51 = vmul.f32 %v5872_v47, %v5675_v13  ;;  %7659 = vst [vmem:[#allocation67_spill] sm:$0xff] %v5896_v7  ;;  %v5907_v7 = vpop.xlane.xlu0 %2084 }
 0x1c9   :  { %v3937_v43 = vpop.eup %3936  ;;  %v2179_v54 = vmul.f32 2.0, %v2154_v52  ;;  %v1859_v44 = vmul.f32 0.996, %v3935_v37  ;;  %v1195_v42 = vsel %vm1193_vm7, %v1194_v6, %v1192_v19  ;;  %v5898_v46 = vmax.f32 %v1286_v11, 1e-15  ;;  %7661 = vst [vmem:[#allocation69_spill] sm:$0xff] %v5907_v7 }
 0x1ca   :  { %v3939_v32 = vpop.eup %3938  ;;  %v2316_v22 = vadd.f32 %v2291_v17, %v2190_v29  ;;  %3948 = vrsqrt.f32 %v5846_v33  ;;  %v5902_v57 = vmul.f32 0.5, %v5791_v50  ;;  %v1579_v49 = vmul.f32 0.6931472, %v3929_v36 }
 0x1cb   :  { %v3941_v18 = vpop.eup %3940  ;;  %v5904_v56 = vmul.f32 %v1955_v30, %v1955_v30  ;;  %v2166_v9 = vmul.f32 2.0, %v2141_v3  ;;  %v1820_v31 = vmax.f32 %v5886_v61, 1e-15  ;;  %v5910_v52 = vmul.f32 0.5, %v5793_v23  ;;  %v5930_v61 = vpop.xlane.xlu1 %1140 }
 0x1cc   :  { %7660 = vst [vmem:[#allocation66_spill] sm:$0xff] %v5902_v57  ;;  %v2329_v37 = vadd.f32 %v2304_v34, %v2203_v35  ;;  %v7663_v17 = vmax.f32 %v5741_v27, 1e-15  ;;  %v5919_v36 = vmax.f32 %v1195_v42, 1e-15  ;;  %v2305_v11 = vmul.f32 %v7656_v39, %v5890_v16  ;;  %v7666_v34 = vld [vmem:[#allocation61_spill] sm:$0xff] }
 0x1cd   :  { %7662 = vst [vmem:[#allocation68_spill] sm:$0xff] %v5910_v52  ;;  %v5923_v30 = vadd.f32 1.0, %v2179_v54  ;;  %v1397_v3 = vmul.f32 %v7666_v34, %v5898_v46  ;;  %v2341_v27 = vmax.f32 %v2316_v22, 1e-15  ;;  %vm1746_vm9 = vcmp.gt.f32.partialorder %v5597_v41, 0.0 }
 0x1ce   :  { %v3943_v6 = vpop.eup %3942  ;;  %vm5914_vm8 = vcmp.gt.f32.partialorder %v7663_v17, 0.996  ;;  %v5932_v17 = vmul.f32 0.6931472, %v3933_v14  ;;  %v5934_v42 = vmul.f32 0.5, %v1579_v49  ;;  %v5936_v7 = vadd.f32 1.0, %v2166_v9 }
 0x1cf   :  { %v1906_v23 = vsel %vm5914_vm8, %v1859_v44, 1.0  ;;  %v3945_v50 = vpop.eup %3944  ;;  %v2292_v54 = vmul.f32 %v7656_v39, %v5904_v56  ;;  %v1885_v19 = vmul.f32 0.996, %v3943_v6  ;;  %3950 = vrcp.f32 %v1820_v31  ;;  %v7669_v14 = vld [vmem:[#allocation60_spill] sm:$0xff]  ;;  %v5950_v6 = vpop.xlane.xlu0 %1101 }
 0x1d0   :  { %7667 = vst [vmem:[#allocation61_spill] sm:$0xff] %v5934_v42  ;;  %v2354_v44 = vmax.f32 %v2329_v37, 1e-15  ;;  %v5941_v34 = vmul.f32 %v1906_v23, %v5723_v4  ;;  %v7668_v22 = vmax.f32 %v5894_v51, 1e-15  ;;  %v1384_v52 = vmul.f32 %v7669_v14, %v5919_v36 }
 0x1d1   :  { %v3947_v49 = vpop.eup %3946  ;;  %v2330_v42 = vadd.f32 %v2305_v11, %v5923_v30  ;;  %v1721_v9 = vmul.f32 %v3941_v18, %v3939_v32  ;;  %vm1733_vm10 = vcmp.gt.f32.partialorder %v5619_v15, 0.0  ;;  %v1647_v57 = vmul.f32 %v5609_v0, %v1397_v3  ;;  %v5970_v3 = vpop.xlane.xlu1 %2087  ;;  %v7677_v15 = vld [vmem:[#allocation74_spill] sm:$0xff] }
 0x1d2   :  { %3952 = vrcp.f32 %v7668_v22  ;;  %v5953_v37 = vadd.f32 %v7656_v39, %v2203_v35  ;;  %v2216_v4 = vadd.f32 %v7656_v39, %v2190_v29  ;;  %v7670_v23 = vmax.f32 %v5784_v60, 1e-15  ;;  %7673 = vst [vmem:[#allocation60_spill] sm:$0xff] %v5970_v3 }
 0x1d3   :  { %v1288_v11 = vmul.f32 %v3945_v50, %v5848_v2  ;;  %3954 = vrcp.f32 %v2341_v27  ;;  %v2317_v18 = vadd.f32 %v2292_v54, %v5936_v7  ;;  %vm1289_vm12 = vcmp.eq.f32.partialorder %v5848_v2, inf }
 0x1d4   :  { %vm5958_vm11 = vcmp.gt.f32.partialorder %v7670_v23, 0.996  ;;  %v3949_v35 = vpop.eup %3948  ;;  %3956 = vrcp.f32 %v2354_v44  ;;  %v1956_v29 = vmul.f32 %v5941_v34, %v5555_v38  ;;  %v1708_v60 = vmul.f32 %v3947_v49, %v3937_v43 }
 0x1d5   :  { %v1919_v0 = vsel %vm5958_vm11, %v1885_v19, 1.0  ;;  %v1634_v32 = vmul.f32 %v5600_v25, %v1384_v52  ;;  %v2355_v14 = vmax.f32 %v2330_v42, 1e-15  ;;  %v5974_v50 = vsel %vm1746_vm9, %v1721_v9, 0.0 }
 0x1d6   :  { %3958 = vtanh.f32 %v1647_v57  ;;  %v1292_v27 = vand.u32 2147483648, %v5848_v2  ;;  %v5978_v54 = vmul.f32 %v1919_v0, %v5764_v1  ;;  %v1290_v19 = vsel %vm1289_vm12, %v5848_v2, %v1288_v11  ;;  %v5991_v1 = vpop.xlane.xlu0 %2126 }
 0x1d7   :  { %vm1291_vm13 = vcmp.eq.f32.partialorder %v5848_v2, 0.0  ;;  %3960 = vrsqrt.f32 %v5930_v61  ;;  %v2342_v38 = vmax.f32 %v2317_v18, 1e-15  ;;  %v2142_v25 = vmul.f32 %v5494_v20, %v5941_v34  ;;  %7676 = vst [vmem:[#allocation91_spill] sm:$0xff] %v5991_v1  ;;  %v6012_v18 = vpop.xlane.xlu1 %1104 }
 0x1d8   :  { %vm5985_vm14 = vcmp.gt.f32.partialorder %v1820_v31, 0.996  ;;  %3962 = vrcp.f32 %v5919_v36  ;;  %v1197_v43 = vmul.f32 %v3949_v35, %v5846_v33  ;;  %v5993_v57 = vmul.f32 %v1956_v29, %v1956_v29  ;;  %7678 = vst [vmem:[#allocation74_spill] sm:$0xff] %v6012_v18 }
 0x1d9   :  { %v5997_v52 = vsel %vm1733_vm10, %v1708_v60, 0.0  ;;  %3964 = vtanh.f32 %v1634_v32  ;;  %vm1198_vm15 = vcmp.eq.f32.partialorder %v5846_v33, inf  ;;  %v3951_v20 = vpop.eup %3950  ;;  %v6002_v31 = vmul.f32 %v5974_v50, %v5751_v8 }
 0x1da   :  { %3966 = vrcp.f32 %v5898_v46  ;;  %v1293_v42 = vsel %vm1291_vm13, %v1292_v27, %v1290_v19  ;;  %v2266_v44 = vsub.f32 1.0, %v5832_v5  ;;  %v1969_v9 = vmul.f32 %v5978_v54, %v5592_v45 }
 0x1db   :  { %v2155_v23 = vmul.f32 %v7677_v15, %v5978_v54  ;;  %v1201_v22 = vand.u32 2147483648, %v5846_v33  ;;  %v2279_v11 = vsub.f32 1.0, %v5841_v28  ;;  %v6016_v0 = vmul.f32 %v5997_v52, %v5777_v10 }
 0x1dc   :  { %v3953_v49 = vpop.eup %3952  ;;  %v1199_v35 = vsel %vm1198_vm15, %v5846_v33, %v1197_v43  ;;  %vm1200_vm0 = vcmp.eq.f32.partialorder %v5846_v33, 0.0  ;;  %3968 = vrsqrt.f32 %v5950_v6  ;;  %2543 = vperm.xlu1 %3668, %v2266_v44   ;;  %v2167_v45 = vmul.f32 2.0, %v2142_v25  ;;  %v6029_v43 = vpop.xlane.xlu0 %1143 }
 0x1dd   :  { %v1887_v5 = vmul.f32 0.996, %v3951_v20  ;;  %v6021_v29 = vmax.f32 %v1293_v42, 1e-15  ;;  %2608 = vperm.xlu0 %3669, %v2279_v11   ;;  %v2241_v28 = vmul.f32 %v2216_v4, %v5768_v53  ;;  %v6024_v60 = vpop.eup %3954  ;;  %v2217_v32 = vadd.f32 %v7656_v39, %v5936_v7 }
 0x1de   :  { %3970 = vrcp.f32 %v2355_v14  ;;  %v1861_v27 = vmul.f32 0.996, %v3953_v49  ;;  %v1821_v19 = vmax.f32 %v6002_v31, 1e-15  ;;  %v6031_v15 = vpop.eup %3956  ;;  %v6033_v25 = vmul.f32 %v1969_v9, %v1969_v9 }
 0x1df   :  { %7679 = vst [vmem:[#allocation92_spill] sm:$0xff] %v6021_v29  ;;  %v2180_v20 = vmul.f32 2.0, %v2155_v23  ;;  %v1202_v42 = vsel %vm1200_vm0, %v1201_v22, %v1199_v35  ;;  %v2267_v53 = vsub.f32 1.0, %v5904_v56  ;;  %3972 = vrcp.f32 %v2342_v38 }
 0x1e0   :  { %v3959_v4 = vpop.eup %3958  ;;  %v2230_v7 = vadd.f32 %v7656_v39, %v5923_v30  ;;  %v7680_v14 = vmax.f32 %v5894_v51, 1e-15  ;;  %2368 = vperm.xlu1 %3668, %v2241_v28   ;;  %v2293_v23 = vmul.f32 %v7656_v39, %v5993_v57  ;;  %v6049_v22 = vadd.f32 1.0, %v2167_v45  ;;  %v7683_v30 = vld [vmem:[#allocation62_spill] sm:$0xff]  ;;  %v6055_v51 = vpop.xlane.xlu1 %2129 }
 0x1e1   :  { %v3961_v9 = vpop.eup %3960  ;;  %v1920_v56 = vsel %vm5985_vm14, %v1887_v5, 1.0  ;;  %v1398_v38 = vmul.f32 %v7683_v30, %v6021_v29  ;;  %7684 = vst [vmem:[#allocation62_spill] sm:$0xff] %v6055_v51  ;;  %2548 = vperm.xlu0 %3669, %v2267_v53   ;;  %v6059_v28 = vmax.f32 %v1202_v42, 1e-15  ;;  %v2242_v45 = vmul.f32 %v2217_v32, %v5851_v26  ;;  %v6078_v26 = vpop.xlane.xlu0 %2090  ;;  %v7689_v30 = vld [vmem:[#allocation64_spill] sm:$0xff] }
 0x1e2   :  { %vm6042_vm1 = vcmp.gt.f32.partialorder %v7680_v14, 0.996  ;;  %v3963_v11 = vpop.eup %3962  ;;  %v2254_v14 = vmul.f32 %v5953_v37, %v5780_v58  ;;  %v6064_v41 = vadd.f32 1.0, %v2180_v20  ;;  %v2306_v5 = vmul.f32 %v7656_v39, %v6033_v25  ;;  %7687 = vst [vmem:[#allocation94_spill] sm:$0xff] %v6078_v26  ;;  %v7688_v20 = vld [vmem:[#allocation79_spill] sm:$0xff] }
 0x1e3   :  { %v1907_v35 = vsel %vm6042_vm1, %v1861_v27, 1.0  ;;  %7685 = vst [vmem:[#allocation93_spill] sm:$0xff] %v6059_v28  ;;  %v3965_v49 = vpop.eup %3964  ;;  %3974 = vrcp.f32 %v1821_v19  ;;  %vm1734_vm2 = vcmp.gt.f32.partialorder %v5744_v62, 0.0  ;;  %v6072_v27 = vmul.f32 %v1920_v56, %v5866_v12 }
 0x1e4   :  { %v3967_v53 = vpop.eup %3966  ;;  %v7686_v42 = vmax.f32 %v6016_v0, 1e-15  ;;  %vm1747_vm3 = vcmp.gt.f32.partialorder %v5716_v21, 0.0  ;;  %v1295_v58 = vmul.f32 %v3961_v9, %v5930_v61  ;;  %2433 = vperm.xlu1 %3668, %v2254_v14   ;;  %v6081_v37 = vmul.f32 %v1907_v35, %v5872_v47 }
 0x1e5   :  { %v1722_v32 = vmul.f32 %v3967_v53, %v3959_v4  ;;  %v1648_v44 = vmul.f32 %v7688_v20, %v1398_v38  ;;  %vm1296_vm4 = vcmp.eq.f32.partialorder %v5930_v61, inf  ;;  %2373 = vperm.xlu0 %3669, %v2242_v45   ;;  %v1709_v56 = vmul.f32 %v3965_v49, %v3963_v11  ;;  %v6092_v4 = vpop.xlane.xlu1 %1146  ;;  %v7691_v45 = vld [vmem:[#allocation76_spill] sm:$0xff]  ;;  %v6118_v21 = vpop.xlane.xlu0 %1107 }
 0x1e6   :  { %3976 = vrcp.f32 %v7686_v42  ;;  %v3969_v12 = vpop.eup %3968  ;;  %v1385_v42 = vmul.f32 %v7689_v30, %v6059_v28  ;;  %vm1205_vm5 = vcmp.eq.f32.partialorder %v5950_v6, inf  ;;  %v2280_v9 = vsub.f32 1.0, %v5890_v16  ;;  %7690 = vst [vmem:[#allocation79_spill] sm:$0xff] %v6092_v4  ;;  %7693 = vst [vmem:[#allocation76_spill] sm:$0xff] %v6118_v21 }
 0x1e7   :  { %v1299_v14 = vand.u32 2147483648, %v5930_v61  ;;  %v1204_v47 = vmul.f32 %v3969_v12, %v5950_v6  ;;  %3978 = vrsqrt.f32 %v6029_v43  ;;  %v2255_v38 = vmul.f32 %v2230_v7, %v5837_v48 }
 0x1e8   :  { %v6095_v35 = vpop.eup %3970  ;;  %v1208_v49 = vand.u32 2147483648, %v5950_v6  ;;  %v1297_v11 = vsel %vm1296_vm4, %v5930_v61, %v1295_v58  ;;  %vm1298_vm6 = vcmp.eq.f32.partialorder %v5930_v61, 0.0  ;;  %2613 = vperm.xlu1 %3668, %v2280_v9   ;;  %v2268_v16 = vsub.f32 1.0, %v5993_v57 }
 0x1e9   :  { %v2156_v53 = vmul.f32 %v7691_v45, %v6072_v27  ;;  %v6105_v20 = vsel %vm1747_vm3, %v1722_v32, 0.0  ;;  %v1206_v48 = vsel %vm1205_vm5, %v5950_v6, %v1204_v47  ;;  %vm1207_vm7 = vcmp.eq.f32.partialorder %v5950_v6, 0.0  ;;  %2438 = vperm.xlu0 %3669, %v2255_v38   ;;  %v6109_v7 = vpop.eup %3972  ;;  %v7694_v32 = vld [vmem:[#allocation77_spill] sm:$0xff] }
 0x1ea   :  { %7692 = vst [vmem:[#allocation64_spill] sm:$0xff] %v6109_v7  ;;  %v2331_v58 = vadd.f32 %v2306_v5, %v6064_v41  ;;  %v2318_v12 = vadd.f32 %v2293_v23, %v6049_v22  ;;  %v6115_v57 = vsel %vm1734_vm2, %v1709_v56, 0.0  ;;  %3980 = vrsqrt.f32 %v6012_v18 }
 0x1eb   :  { %v2143_v30 = vmul.f32 %v7694_v32, %v6081_v37  ;;  %v1970_v9 = vmul.f32 %v6072_v27, %v5667_v55  ;;  %3982 = vrcp.f32 %v6021_v29  ;;  %v1300_v5 = vsel %vm1298_vm6, %v1299_v14, %v1297_v11  ;;  %v6139_v14 = vpop.xlane.xlu1 %2093 }
 0x1ec   :  { %v6129_v62 = vmul.f32 %v6105_v20, %v5898_v46  ;;  %3984 = vtanh.f32 %v1648_v44  ;;  %v1635_v23 = vmul.f32 %v5680_v59, %v1385_v42  ;;  %v1209_v56 = vsel %vm1207_vm7, %v1208_v49, %v1206_v48  ;;  %2553 = vperm.xlu1 %3668, %v2268_v16   ;;  %7695 = vst [vmem:[#allocation77_spill] sm:$0xff] %v6139_v14  ;;  %v7700_v48 = vld [vmem:[#allocation70_spill] sm:$0xff] }
 0x1ed   :  { %v3975_v47 = vpop.eup %3974  ;;  %v1957_v38 = vmul.f32 %v6081_v37, %v5675_v13  ;;  %v2181_v45 = vmul.f32 2.0, %v2156_v53  ;;  %v6136_v55 = vmul.f32 %v6115_v57, %v5919_v36  ;;  %3986 = vrcp.f32 %v6059_v28 }
 0x1ee   :  { %v2343_v32 = vmax.f32 %v2318_v12, 1e-15  ;;  %v6141_v44 = vmax.f32 %v1300_v5, 1e-15  ;;  %3988 = vrsqrt.f32 %v6118_v21  ;;  %v6145_v59 = vmul.f32 0.5, %v5932_v17  ;;  %v6157_v12 = vpop.xlane.xlu0 %2132 }
 0x1ef   :  { %v2356_v42 = vmax.f32 %v2331_v58, 1e-15  ;;  %v6149_v13 = vadd.f32 %v7656_v39, %v6049_v22  ;;  %v6151_v49 = vmax.f32 %v1209_v56, 1e-15  ;;  %3990 = vrsqrt.f32 %v6092_v4  ;;  %7697 = vst [vmem:[#allocation96_spill] sm:$0xff] %v6157_v12 }
 0x1f0   :  { %v3977_v11 = vpop.eup %3976  ;;  %7696 = vst [vmem:[#allocation95_spill] sm:$0xff] %v6145_v59  ;;  %v2168_v16 = vmul.f32 2.0, %v2143_v30  ;;  %v6154_v53 = vmul.f32 %v1970_v9, %v1970_v9  ;;  %3992 = vtanh.f32 %v1635_v23  ;;  %v6159_v17 = vmul.f32 %v1957_v38, %v1957_v38 }
 0x1f1   :  { %v3979_v5 = vpop.eup %3978  ;;  %v2206_v58 = vadd.f32 1.0, %v2181_v45  ;;  %vm6163_vm8 = vcmp.gt.f32.partialorder %v1821_v19, 0.996  ;;  %3994 = vrcp.f32 %v2343_v32  ;;  %v1889_v30 = vmul.f32 0.996, %v3975_v47  ;;  %v7704_v19 = vld [vmem:[#allocation65_spill] sm:$0xff]  ;;  %v6182_v32 = vpop.xlane.xlu1 %1110 }
 0x1f2   :  { %v1863_v9 = vmul.f32 0.996, %v3977_v11  ;;  %v1399_v23 = vmul.f32 %v7700_v48, %v6141_v44  ;;  %v6172_v14 = vadd.f32 %v7656_v39, %v6064_v41  ;;  %3996 = vrcp.f32 %v2356_v42  ;;  %v6205_v26 = vpop.xlane.xlu0 %1149 }
 0x1f3   :  { %v7701_v38 = vmax.f32 %v6016_v0, 1e-15  ;;  %v1386_v45 = vmul.f32 %v7704_v19, %v6151_v49  ;;  %v6184_v11 = vadd.f32 1.0, %v2168_v16  ;;  %v2307_v48 = vmul.f32 %v7656_v39, %v6154_v53 }
 0x1f4   :  { %v3981_v47 = vpop.eup %3980  ;;  %v7705_v41 = vmax.f32 %v6129_v62, 1e-15  ;;  %v1302_v0 = vmul.f32 %v3979_v5, %v6029_v43  ;;  %v6194_v56 = vadd.f32 %v7656_v39, %v2206_v58  ;;  %v7706_v19 = vmax.f32 %v6136_v55, 1e-15 }
 0x1f5   :  { %vm6176_vm9 = vcmp.gt.f32.partialorder %v7701_v38, 0.996  ;;  %v3983_v42 = vpop.eup %3982  ;;  %v2294_v38 = vmul.f32 %v7656_v39, %v6159_v17  ;;  %vm1303_vm10 = vcmp.eq.f32.partialorder %v6029_v43, inf  ;;  %v1921_v51 = vsel %vm6163_vm8, %v1889_v30, 1.0 }
 0x1f6   :  { %3998 = vrcp.f32 %v7705_v41  ;;  %v3985_v16 = vpop.eup %3984  ;;  %v1908_v41 = vsel %vm6176_vm9, %v1863_v9, 1.0  ;;  %v1649_v5 = vmul.f32 %v5698_v63, %v1399_v23  ;;  %v1636_v3 = vmul.f32 %v5685_v24, %v1386_v45 }
 0x1f7   :  { %4000 = vrcp.f32 %v7706_v19  ;;  %v3987_v12 = vpop.eup %3986  ;;  %v1211_v19 = vmul.f32 %v3981_v47, %v6012_v18  ;;  %v1306_v59 = vand.u32 2147483648, %v6029_v43  ;;  %vm1212_vm11 = vcmp.eq.f32.partialorder %v6012_v18, inf }
 0x1f8   :  { %4002 = vrsqrt.f32 %v6182_v32  ;;  %v3989_v22 = vpop.eup %3988  ;;  %v1304_v63 = vsel %vm1303_vm10, %v6029_v43, %v1302_v0  ;;  %vm1305_vm12 = vcmp.eq.f32.partialorder %v6029_v43, 0.0  ;;  %v6215_v9 = vadd.f32 %v2307_v48, %v2206_v58 }
 0x1f9   :  { %4004 = vrcp.f32 %v6141_v44  ;;  %v3991_v30 = vpop.eup %3990  ;;  %v6218_v24 = vmul.f32 %v1921_v51, %v5974_v50  ;;  %v1723_v23 = vmul.f32 %v3985_v16, %v3983_v42  ;;  %v6222_v45 = vmul.f32 %v1908_v41, %v5997_v52 }
 0x1fa   :  { %4006 = vrcp.f32 %v6151_v49  ;;  %v3993_v31 = vpop.eup %3992  ;;  %v1215_v47 = vand.u32 2147483648, %v6012_v18  ;;  %vm1214_vm13 = vcmp.eq.f32.partialorder %v6012_v18, 0.0  ;;  %v1307_v0 = vsel %vm1305_vm12, %v1306_v59, %v1304_v63 }
 0x1fb   :  { %4008 = vrsqrt.f32 %v6205_v26  ;;  %v1213_v58 = vsel %vm1212_vm11, %v6012_v18, %v1211_v19  ;;  %v1218_v48 = vmul.f32 %v3989_v22, %v6118_v21  ;;  %v6228_v50 = vpop.eup %3994  ;;  %v6231_v51 = vadd.f32 %v2294_v38, %v6184_v11 }
 0x1fc   :  { %4010 = vtanh.f32 %v1649_v5  ;;  %7707 = vst [vmem:[#allocation70_spill] sm:$0xff] %v6228_v50  ;;  %vm1748_vm14 = vcmp.gt.f32.partialorder %v5848_v2, 0.0  ;;  %v1309_v52 = vmul.f32 %v3991_v30, %v6092_v4  ;;  %vm1219_vm15 = vcmp.eq.f32.partialorder %v6118_v21, inf  ;;  %v6236_v42 = vpop.eup %3996 }
 0x1fd   :  { %4012 = vtanh.f32 %v1636_v3  ;;  %7708 = vst [vmem:[#allocation65_spill] sm:$0xff] %v6236_v42  ;;  %v7709_v3 = vld [vmem:[#allocation80_spill] sm:$0xff]  ;;  %v6240_v16 = vsel %vm1748_vm14, %v1723_v23, 0.0  ;;  %v1710_v41 = vmul.f32 %v3993_v31, %v3987_v12  ;;  %vm1310_vm0 = vcmp.eq.f32.partialorder %v6092_v4, inf }
 0x1fe   :  { %v2157_v59 = vmul.f32 %v7709_v3, %v6218_v24  ;;  %v1958_v38 = vmul.f32 %v6222_v45, %v5777_v10  ;;  %v6245_v19 = vmax.f32 %v1307_v0, 1e-15  ;;  %v1216_v2 = vsel %vm1214_vm13, %v1215_v47, %v1213_v58 }
 0x1ff   :  { %v1222_v22 = vand.u32 2147483648, %v6118_v21  ;;  %v1313_v23 = vand.u32 2147483648, %v6092_v4  ;;  %v1220_v12 = vsel %vm1219_vm15, %v6118_v21, %v1218_v48  ;;  %vm1221_vm1 = vcmp.eq.f32.partialorder %v6118_v21, 0.0  ;;  %v7725_v21 = vld [vmem:[#allocation87_spill] sm:$0xff] }
 0x200   :  { %v3999_v5 = vpop.eup %3998  ;;  %v6256_v10 = vmul.f32 %v6240_v16, %v6021_v29  ;;  %vm1735_vm2 = vcmp.gt.f32.partialorder %v5846_v33, 0.0  ;;  %v1311_v47 = vsel %vm1310_vm0, %v6092_v4, %v1309_v52  ;;  %vm1312_vm3 = vcmp.eq.f32.partialorder %v6092_v4, 0.0  ;;  %v7711_v52 = vld [vmem:[#allocation71_spill] sm:$0xff] }
 0x201   :  { %v4001_v63 = vpop.eup %4000  ;;  %v6263_v58 = vmul.f32 %v6218_v24, %v5751_v8  ;;  %v2144_v48 = vmul.f32 %v5705_v40, %v6222_v45  ;;  %v6267_v3 = vsel %vm1735_vm2, %v1710_v41, 0.0  ;;  %v6269_v30 = vmax.f32 %v1216_v2, 1e-15 }
 0x202   :  { %v4003_v31 = vpop.eup %4002  ;;  %7710 = vst [vmem:[#allocation80_spill] sm:$0xff] %v6267_v3  ;;  %v6271_v1 = vmul.f32 2.0, %v2157_v59  ;;  %v6273_v33 = vmul.f32 %v1958_v38, %v1958_v38  ;;  %v1400_v50 = vmul.f32 %v7711_v52, %v6245_v19  ;;  %v1223_v7 = vsel %vm1221_vm1, %v1222_v22, %v1220_v12  ;;  %v7718_v52 = vld [vmem:[#allocation72_spill] sm:$0xff] }
 0x203   :  { %v4005_v0 = vpop.eup %4004  ;;  %v7712_v8 = vmax.f32 %v6129_v62, 1e-15  ;;  %vm1736_vm5 = vcmp.gt.f32.partialorder %v5950_v6, 0.0  ;;  %vm1749_vm6 = vcmp.gt.f32.partialorder %v5930_v61, 0.0  ;;  %v1314_v40 = vsel %vm1312_vm3, %v1313_v23, %v1311_v47  ;;  %v7719_v23 = vld [vmem:[#allocation81_spill] sm:$0xff] }
 0x204   :  { %v4007_v42 = vpop.eup %4006  ;;  %v7715_v41 = vmax.f32 %v6136_v55, 1e-15  ;;  %v1891_v2 = vmul.f32 0.996, %v3999_v5  ;;  %v6294_v62 = vmul.f32 %v6267_v3, %v6059_v28  ;;  %v6298_v18 = vmax.f32 %v1223_v7, 1e-15 }
 0x205   :  { %v4009_v4 = vpop.eup %4008  ;;  %vm6279_vm4 = vcmp.gt.f32.partialorder %v7712_v8, 0.996  ;;  %v1387_v8 = vmul.f32 %v7718_v52, %v6269_v30  ;;  %vm1226_vm8 = vcmp.eq.f32.partialorder %v6182_v32, inf  ;;  %v1229_v55 = vand.u32 2147483648, %v6182_v32 }
 0x206   :  { %v4011_v59 = vpop.eup %4010  ;;  %vm6287_vm7 = vcmp.gt.f32.partialorder %v7715_v41, 0.996  ;;  %v1650_v47 = vmul.f32 %v7719_v23, %v1400_v50  ;;  %v6303_v41 = vmax.f32 %v1314_v40, 1e-15  ;;  %v1225_v5 = vmul.f32 %v4003_v31, %v6182_v32  ;;  %v7721_v31 = vld [vmem:[#allocation82_spill] sm:$0xff] }
 0x207   :  { %v4013_v12 = vpop.eup %4012  ;;  %v1316_v22 = vmul.f32 %v4009_v4, %v6205_v26  ;;  %v1724_v28 = vmul.f32 %v4011_v59, %v4005_v0  ;;  %vm1317_vm9 = vcmp.eq.f32.partialorder %v6205_v26, inf  ;;  %v2281_v3 = vsub.f32 1.0, %v6033_v25  ;;  %v7722_v4 = vld [vmem:[#allocation73_spill] sm:$0xff]  ;;  %v6319_v25 = vpop.xlane.xlu1 %2135 }
 0x208   :  { %v2243_v7 = vmul.f32 %v6149_v13, %v5941_v34  ;;  %v1865_v52 = vmul.f32 0.996, %v4001_v63  ;;  %v7720_v29 = vmax.f32 %v6256_v10, 1e-15  ;;  %v1810_v50 = vmax.f32 %v6294_v62, 1e-15 }
 0x209   :  { %v1711_v40 = vmul.f32 %v4013_v12, %v4007_v42  ;;  %v1637_v23 = vmul.f32 %v7721_v31, %v1387_v8  ;;  %v1388_v0 = vmul.f32 %v7722_v4, %v6298_v18  ;;  %v1320_v59 = vand.u32 2147483648, %v6205_v26  ;;  %2618 = vperm.xlu0 %3669, %v2281_v3   ;;  %v7723_v34 = vld [vmem:[#allocation75_spill] sm:$0xff]  ;;  %v7740_v62 = vld [vmem:[#allocation76_spill] sm:$0xff] }
 0x20a   :  { %4014 = vrcp.f32 %v7720_v29  ;;  %2378 = vperm.xlu1 %3668, %v2243_v7   ;;  %v1401_v29 = vmul.f32 %v7723_v34, %v6303_v41  ;;  %v1318_v13 = vsel %vm1317_vm9, %v6205_v26, %v1316_v22  ;;  %vm1319_vm10 = vcmp.eq.f32.partialorder %v6205_v26, 0.0  ;;  %v7726_v34 = vld [vmem:[#allocation89_spill] sm:$0xff] }
 0x20b   :  { %4016 = vrcp.f32 %v6245_v19  ;;  %v6329_v42 = vsel %vm1749_vm6, %v1724_v28, 0.0  ;;  %v1227_v63 = vsel %vm1226_vm8, %v6182_v32, %v1225_v5  ;;  %vm1228_vm11 = vcmp.eq.f32.partialorder %v6182_v32, 0.0 }
 0x20c   :  { %4018 = vtanh.f32 %v1650_v47  ;;  %v2256_v3 = vmul.f32 %v6172_v14, %v5978_v54  ;;  %v1909_v12 = vsel %vm6287_vm7, %v1865_v52, 1.0  ;;  %v1922_v22 = vsel %vm6279_vm4, %v1891_v2, 1.0  ;;  %v7724_v47 = vld [vmem:[#allocation86_spill] sm:$0xff]  ;;  %v6365_v2 = vpop.xlane.xlu1 %1152 }
 0x20d   :  { %v6343_v61 = vsel %vm1736_vm5, %v1711_v40, 0.0  ;;  %v2269_v28 = vsub.f32 1.0, %v6159_v17  ;;  %v2169_v8 = vmul.f32 2.0, %v2144_v48  ;;  %4020 = vrcp.f32 %v1810_v50 }
 0x20e   :  { %v1638_v5 = vmul.f32 %v7724_v47, %v1388_v0  ;;  %v1321_v7 = vsel %vm1319_vm10, %v1320_v59, %v1318_v13  ;;  %2443 = vperm.xlu1 %3668, %v2256_v3   ;;  %v6351_v54 = vmul.f32 %v6329_v42, %v6141_v44  ;;  %4022 = vrcp.f32 %v6269_v30 }
 0x20f   :  { %v1651_v6 = vmul.f32 %v7725_v21, %v1401_v29  ;;  %v1230_v14 = vsel %vm1228_vm11, %v1229_v55, %v1227_v63  ;;  %2558 = vperm.xlu0 %3669, %v2269_v28   ;;  %v6356_v17 = vmul.f32 %v1909_v12, %v6115_v57  ;;  %v6359_v48 = vmul.f32 %v1922_v22, %v6105_v20  ;;  %v6371_v55 = vpop.xlane.xlu0 %2096 }
 0x210   :  { %v6363_v38 = vmul.f32 %v6343_v61, %v6151_v49  ;;  %4024 = vtanh.f32 %v1637_v23  ;;  %v2344_v52 = vmax.f32 %v6231_v51, 1e-15  ;;  %v6369_v40 = vmax.f32 %v1321_v7, 1e-15  ;;  %v6400_v21 = vpop.xlane.xlu1 %2099 }
 0x211   :  { %4026 = vrcp.f32 %v6298_v18  ;;  %v2282_v57 = vsub.f32 1.0, %v6154_v53  ;;  %v1996_v20 = vmul.f32 %v6263_v58, %v6263_v58  ;;  %v2207_v31 = vadd.f32 1.0, %v6271_v1  ;;  %v7727_v1 = vld [vmem:[#allocation90_spill] sm:$0xff] }
 0x212   :  { %4028 = vtanh.f32 %v1638_v5  ;;  %v6377_v4 = vmax.f32 %v1230_v14, 1e-15  ;;  %v2295_v51 = vmul.f32 %v7656_v39, %v6273_v33  ;;  %v2194_v0 = vadd.f32 1.0, %v2169_v8  ;;  %v7730_v5 = vld [vmem:[#allocation78_spill] sm:$0xff] }
 0x213   :  { %v1824_v59 = vmax.f32 %v6351_v54, 1e-15  ;;  %4030 = vtanh.f32 %v1651_v6  ;;  %2623 = vperm.xlu1 %3668, %v2282_v57   ;;  %2793 = vperm.xlu0 %3669, %v6024_v60   ;;  %v2145_v58 = vmul.f32 %v7726_v34, %v6356_v17  ;;  %v2158_v29 = vmul.f32 %v7727_v1, %v6359_v48  ;;  %v7729_v60 = vld [vmem:[#allocation84_spill] sm:$0xff] }
 0x214   :  { %v4015_v23 = vpop.eup %4014  ;;  %v1811_v13 = vmax.f32 %v6363_v38, 1e-15  ;;  %4032 = vrcp.f32 %v6303_v41  ;;  %v2219_v3 = vadd.f32 %v7656_v39, %v6184_v11  ;;  %v7728_v12 = vmax.f32 %v6215_v9, 1e-15 }
 0x215   :  { %v4017_v53 = vpop.eup %4016  ;;  %v1402_v22 = vmul.f32 %v7729_v60, %v6369_v40  ;;  %v2257_v28 = vmul.f32 %v6194_v56, %v6072_v27  ;;  %v2308_v8 = vmul.f32 %v7656_v39, %v1996_v20  ;;  %v1893_v47 = vmul.f32 0.996, %v4015_v23  ;;  %v6411_v27 = vpop.xlane.xlu0 %1113 }
 0x216   :  { %v4019_v63 = vpop.eup %4018  ;;  %4034 = vrcp.f32 %v7728_v12  ;;  %v1389_v7 = vmul.f32 %v7730_v5, %v6377_v4  ;;  %v2233_v11 = vadd.f32 %v7656_v39, %v2207_v31  ;;  %v2320_v6 = vadd.f32 %v2295_v51, %v2194_v0  ;;  %v7734_v51 = vld [vmem:[#allocation66_spill] sm:$0xff] }
 0x217   :  { %4036 = vrcp.f32 %v2344_v52  ;;  %v7731_v9 = vmax.f32 %v6256_v10, 1e-15  ;;  %2858 = vperm.xlu1 %3668, %v6031_v15   ;;  %2448 = vperm.xlu0 %3669, %v2257_v28   ;;  %v4021_v56 = vpop.eup %4020  ;;  %v2170_v52 = vmul.f32 2.0, %v2145_v58  ;;  %v2183_v57 = vmul.f32 2.0, %v2158_v29  ;;  %v7735_v29 = vld [vmem:[#allocation88_spill] sm:$0xff] }
 0x218   :  { %4038 = vrcp.f32 %v1824_v59  ;;  %v1725_v23 = vmul.f32 %v4019_v63, %v4017_v53  ;;  %v4023_v10 = vpop.eup %4022  ;;  %v1652_v34 = vmul.f32 %v7734_v51, %v1402_v22  ;;  %v2244_v1 = vmul.f32 %v2219_v3, %v6081_v37  ;;  %v7738_v51 = vld [vmem:[#allocation92_spill] sm:$0xff] }
 0x219   :  { %vm6405_vm12 = vcmp.gt.f32.partialorder %v7731_v9, 0.996  ;;  %4040 = vrcp.f32 %v1811_v13  ;;  %v2283_v12 = vsub.f32 1.0, %v1996_v20  ;;  %v1972_v15 = vmul.f32 %v6359_v48, %v5898_v46 }
 0x21a   :  { %4042 = vrcp.f32 %v6369_v40  ;;  %v4025_v60 = vpop.eup %4024  ;;  %v1923_v58 = vsel %vm6405_vm12, %v1893_v47, 1.0  ;;  %v1639_v28 = vmul.f32 %v7735_v29, %v1389_v7  ;;  %v6425_v63 = vadd.f32 %v2308_v8, %v2207_v31  ;;  %v6437_v47 = vpop.xlane.xlu1 %1116 }
 0x21b   :  { %4044 = vrsqrt.f32 %v6411_v27  ;;  %v4027_v53 = vpop.eup %4026  ;;  %v2220_v22 = vadd.f32 %v7656_v39, %v2194_v0  ;;  %vm1750_vm13 = vcmp.gt.f32.partialorder %v6029_v43, 0.0  ;;  %2383 = vperm.xlu1 %3668, %v2244_v1   ;;  %2628 = vperm.xlu0 %3669, %v2283_v12   ;;  %v6430_v46 = vadd.f32 1.0, %v2170_v52  ;;  %v7739_v12 = vld [vmem:[#allocation74_spill] sm:$0xff] }
 0x21c   :  { %4046 = vrcp.f32 %v6377_v4  ;;  %v4029_v37 = vpop.eup %4028  ;;  %v6432_v20 = vadd.f32 1.0, %v2183_v57  ;;  %v6434_v3 = vsel %vm1750_vm13, %v1725_v23, 0.0  ;;  %v6440_v0 = vmul.f32 %v1923_v58, %v6240_v16 }
 0x21d   :  { %4048 = vrsqrt.f32 %v6365_v2  ;;  %v4031_v31 = vpop.eup %4030  ;;  %v1867_v43 = vmul.f32 0.996, %v4021_v56  ;;  %v2270_v8 = vsub.f32 1.0, %v6273_v33  ;;  %v6444_v7 = vmul.f32 %v2233_v11, %v6218_v24 }
 0x21e   :  { %4050 = vtanh.f32 %v1652_v34  ;;  %v4033_v5 = vpop.eup %4032  ;;  %v2345_v9 = vmax.f32 %v2320_v6, 1e-15  ;;  %v6446_v14 = vmul.f32 %v1972_v15, %v1972_v15  ;;  %v6452_v57 = vmul.f32 %v6434_v3, %v6245_v19 }
 0x21f   :  { %4052 = vtanh.f32 %v1639_v28  ;;  %v1712_v16 = vmul.f32 %v4025_v60, %v4023_v10  ;;  %v1713_v23 = vmul.f32 %v4029_v37, %v4027_v53  ;;  %2563 = vperm.xlu1 %3668, %v2270_v8   ;;  %2863 = vperm.xlu0 %3669, %v6095_v35   ;;  %v2245_v24 = vmul.f32 %v2220_v22, %v6222_v45  ;;  %v7742_v53 = vld [vmem:[#allocation64_spill] sm:$0xff] }
 0x220   :  { %v6448_v52 = vpop.eup %4034  ;;  %4054 = vrsqrt.f32 %v6437_v47  ;;  %v1959_v11 = vmul.f32 %v6356_v17, %v5919_v36  ;;  %v2234_v6 = vadd.f32 %v7656_v39, %v6432_v20  ;;  %vm6465_vm14 = vcmp.gt.f32.partialorder %v1810_v50, 0.996  ;;  %v7741_v50 = vld [vmem:[#allocation79_spill] sm:$0xff] }
 0x221   :  { %v6456_v33 = vpop.eup %4036  ;;  %v2221_v35 = vadd.f32 %v7656_v39, %v6430_v46  ;;  %v1973_v34 = vmul.f32 %v6440_v0, %v7738_v51  ;;  %v1910_v45 = vsel %vm6465_vm14, %v1867_v43, 1.0  ;;  %v1726_v36 = vmul.f32 %v4033_v5, %v4031_v31  ;;  %v7743_v43 = vld [vmem:[#allocation80_spill] sm:$0xff] }
 0x222   :  { %v4039_v10 = vpop.eup %4038  ;;  %4056 = vrcp.f32 %v2345_v9  ;;  %vm1737_vm15 = vcmp.gt.f32.partialorder %v7739_v12, 0.0  ;;  %vm1738_vm0 = vcmp.gt.f32.partialorder %v7740_v62, 0.0  ;;  %vm1751_vm1 = vcmp.gt.f32.partialorder %v7741_v50, 0.0 }
 0x223   :  { %v4041_v1 = vpop.eup %4040  ;;  %v6480_v15 = vmul.f32 %v7656_v39, %v6446_v14  ;;  %v7518_v58 = vmax.f32 %v6452_v57, 1e-15  ;;  %v6483_v29 = vsel %vm1737_vm15, %v1712_v16, 0.0  ;;  %v6485_v28 = vsel %vm1738_vm0, %v1713_v23, 0.0  ;;  %2798 = vperm.xlu1 %3668, %v7742_v53  }
 0x224   :  { %v4043_v60 = vpop.eup %4042  ;;  %v6488_v37 = vmul.f32 %v1959_v11, %v1959_v11  ;;  %v6491_v31 = vmul.f32 %v2234_v6, %v6359_v48  ;;  %v6494_v8 = vmul.f32 %v1910_v45, %v7743_v43  ;;  %v1895_v5 = vmul.f32 0.996, %v4039_v10 }
 0x225   :  { %v4045_v22 = vpop.eup %4044  ;;  %v6497_v56 = vmul.f32 %v2221_v35, %v6356_v17  ;;  %v6499_v16 = vmul.f32 %v1973_v34, %v1973_v34  ;;  %vm6503_vm2 = vcmp.gt.f32.partialorder %v1824_v59, 0.996  ;;  %v6509_v48 = vsel %vm1751_vm1, %v1726_v36, 0.0  ;;  %v7746_v34 = vld [vmem:[#allocation93_spill] sm:$0xff] }
 0x226   :  { %v4047_v9 = vpop.eup %4046  ;;  %v6513_v6 = vmul.f32 %v6483_v29, %v6269_v30  ;;  %v6517_v17 = vmul.f32 %v6485_v28, %v6298_v18  ;;  %vm1233_vm3 = vcmp.eq.f32.partialorder %v6411_v27, inf  ;;  %v1236_v54 = vand.u32 2147483648, %v6411_v27 }
 0x227   :  { %v4049_v11 = vpop.eup %4048  ;;  %v1869_v10 = vmul.f32 0.996, %v4041_v1  ;;  %4058 = vrcp.f32 %v7518_v58  ;;  %v1232_v35 = vmul.f32 %v4045_v22, %v6411_v27  ;;  %vm1235_vm4 = vcmp.eq.f32.partialorder %v6411_v27, 0.0  ;;  %2388 = vperm.xlu1 %3668, %v2245_v24  }
 0x228   :  { %v4051_v59 = vpop.eup %4050  ;;  %v1960_v45 = vmul.f32 %v6494_v8, %v7746_v34  ;;  %v1924_v36 = vsel %vm6503_vm2, %v1895_v5, 1.0  ;;  %v6531_v12 = vmul.f32 %v6509_v48, %v6303_v41  ;;  %v2271_v1 = vsub.f32 1.0, %v6488_v37 }
 0x229   :  { %v4053_v51 = vpop.eup %4052  ;;  %vm6536_vm5 = vcmp.gt.f32.partialorder %v1811_v13, 0.996  ;;  %vm1752_vm6 = vcmp.gt.f32.partialorder %v6205_v26, 0.0  ;;  %v1323_v24 = vmul.f32 %v4049_v11, %v6365_v2  ;;  %v1234_v53 = vsel %vm1233_vm3, %v6411_v27, %v1232_v35 }
 0x22a   :  { %v4055_v62 = vpop.eup %4054  ;;  %v7519_v22 = vmax.f32 %v6513_v6, 1e-15  ;;  %v1813_v43 = vmax.f32 %v6517_v17, 1e-15  ;;  %v1727_v5 = vmul.f32 %v4051_v59, %v4043_v60  ;;  %v1237_v23 = vsel %vm1235_vm4, %v1236_v54, %v1234_v53  ;;  %2568 = vperm.xlu0 %3669, %v2271_v1   ;;  %v7749_v54 = vld [vmem:[#allocation83_spill] sm:$0xff]  ;;  %v7751_v1 = vld [vmem:[#allocation68_spill] sm:$0xff] }
 0x22b   :  { %v1911_v38 = vsel %vm6536_vm5, %v1869_v10, 1.0  ;;  %v6550_v13 = vmul.f32 %v1924_v36, %v6329_v42  ;;  %vm1739_vm7 = vcmp.gt.f32.partialorder %v6182_v32, 0.0  ;;  %v6553_v11 = vmax.f32 %v1237_v23, 1e-15  ;;  %2453 = vperm.xlu1 %3668, %v6444_v7  }
 0x22c   :  { %v6556_v35 = vpop.eup %4056  ;;  %v7520_v34 = vmax.f32 %v6531_v12, 1e-15  ;;  %v1714_v58 = vmul.f32 %v4053_v51, %v4047_v9  ;;  %v1239_v60 = vmul.f32 %v4055_v62, %v6437_v47  ;;  %vm1324_vm8 = vcmp.eq.f32.partialorder %v6365_v2, inf  ;;  %v7750_v51 = vld [vmem:[#allocation70_spill] sm:$0xff] }
 0x22d   :  { %v1390_v59 = vmul.f32 %v7749_v54, %v6553_v11  ;;  %v2284_v42 = vsub.f32 1.0, %v6446_v14  ;;  %v1325_v10 = vsel %vm1324_vm8, %v6365_v2, %v1323_v24  ;;  %vm1326_vm9 = vcmp.eq.f32.partialorder %v6365_v2, 0.0  ;;  %v7752_v24 = vld [vmem:[#allocation69_spill] sm:$0xff] }
 0x22e   :  { %v6567_v7 = vmul.f32 %v1911_v38, %v6343_v61  ;;  %4060 = vrcp.f32 %v1813_v43  ;;  %v6573_v9 = vsel %vm1752_vm6, %v1727_v5, 0.0  ;;  %2803 = vperm.xlu0 %3669, %v7750_v51   ;;  %v1327_v36 = vand.u32 2147483648, %v6365_v2  ;;  %v7753_v38 = vld [vmem:[#allocation67_spill] sm:$0xff] }
 0x22f   :  { %v1640_v14 = vmul.f32 %v7751_v1, %v1390_v59  ;;  %4062 = vrcp.f32 %v6553_v11  ;;  %2633 = vperm.xlu1 %3668, %v2284_v42   ;;  %vm1240_vm10 = vcmp.eq.f32.partialorder %v6437_v47, inf  ;;  %vm1242_vm11 = vcmp.eq.f32.partialorder %v6437_v47, 0.0  ;;  %v7754_v42 = vld [vmem:[#allocation91_spill] sm:$0xff] }
 0x230   :  { %4064 = vrcp.f32 %v7520_v34  ;;  %v1328_v61 = vsel %vm1326_vm9, %v1327_v36, %v1325_v10  ;;  %v1241_v26 = vsel %vm1240_vm10, %v6437_v47, %v1239_v60  ;;  %v1243_v62 = vand.u32 2147483648, %v6437_v47  ;;  %v7756_v51 = vld [vmem:[#allocation63_spill] sm:$0xff] }
 0x231   :  { %v4059_v50 = vpop.eup %4058  ;;  %v2146_v53 = vmul.f32 %v7752_v24, %v6494_v8  ;;  %v6589_v5 = vsel %vm1739_vm7, %v1714_v58, 0.0  ;;  %4066 = vtanh.f32 %v1640_v14  ;;  %v6591_v23 = vmax.f32 %v1328_v61, 1e-15  ;;  %v7755_v58 = vld [vmem:[#allocation65_spill] sm:$0xff] }
 0x232   :  { %v2159_v54 = vmul.f32 %v7753_v38, %v6440_v0  ;;  %v1985_v59 = vmul.f32 %v1960_v45, %v1960_v45  ;;  %4068 = vrcp.f32 %v7519_v22  ;;  %2458 = vperm.xlu0 %3669, %v6491_v31   ;;  %v1244_v60 = vsel %vm1242_vm11, %v1243_v62, %v1241_v26  ;;  %v7757_v62 = vld [vmem:[#allocation95_spill] sm:$0xff]  ;;  %v7758_v38 = vld [vmem:[#allocation85_spill] sm:$0xff] }
 0x233   :  { %v2160_v10 = vmul.f32 %v7754_v42, %v6550_v13  ;;  %v6602_v32 = vmul.f32 %v6573_v9, %v6369_v40  ;;  %2868 = vperm.xlu1 %3668, %v7755_v58   ;;  %v1403_v36 = vmul.f32 %v7756_v51, %v6591_v23  ;;  %v6607_v1 = vmax.f32 %v1244_v60, 1e-15 }
 0x234   :  { %v1961_v45 = vmul.f32 %v6567_v7, %v6151_v49  ;;  %v1897_v14 = vmul.f32 0.996, %v4059_v50  ;;  %v6613_v31 = vmul.f32 %v6589_v5, %v6377_v4  ;;  %v2285_v61 = vsub.f32 1.0, %v6499_v16 }
 0x235   :  { %v2171_v26 = vmul.f32 2.0, %v2146_v53  ;;  %v1653_v24 = vmul.f32 %v7757_v62, %v1403_v36  ;;  %4070 = vrcp.f32 %v6591_v23  ;;  %v1391_v42 = vmul.f32 %v7758_v38, %v6607_v1  ;;  %v7762_v36 = vld [vmem:[#allocation61_spill] sm:$0xff] }
 0x236   :  { %v2334_v60 = vadd.f32 %v6480_v15, %v6432_v20  ;;  %v2184_v58 = vmul.f32 2.0, %v2159_v54  ;;  %v7759_v49 = vmax.f32 %v6452_v57, 1e-15  ;;  %2638 = vperm.xlu0 %3669, %v2285_v61   ;;  %4072 = vrcp.f32 %v6607_v1 }
 0x237   :  { %v2185_v53 = vmul.f32 2.0, %v2160_v10  ;;  %v1827_v51 = vmax.f32 %v6602_v32, 1e-15  ;;  %2393 = vperm.xlu1 %3668, %v6497_v56   ;;  %4074 = vtanh.f32 %v1653_v24  ;;  %v1641_v62 = vmul.f32 %v7762_v36, %v1391_v42 }
 0x238   :  { %vm6624_vm12 = vcmp.gt.f32.partialorder %v7759_v49, 0.996  ;;  %v4061_v38 = vpop.eup %4060  ;;  %v6632_v20 = vmul.f32 %v1961_v45, %v1961_v45  ;;  %v1814_v15 = vmax.f32 %v6613_v31, 1e-15  ;;  %v2358_v61 = vmax.f32 %v6425_v63, 1e-15 }
 0x239   :  { %v1925_v57 = vsel %vm6624_vm12, %v1897_v14, 1.0  ;;  %v4063_v54 = vpop.eup %4062  ;;  %v2196_v49 = vadd.f32 1.0, %v2171_v26  ;;  %v2272_v10 = vsub.f32 1.0, %v1985_v59  ;;  %4076 = vtanh.f32 %v1641_v62  ;;  %v7774_v31 = vld [vmem:[#allocation62_spill] sm:$0xff] }
 0x23a   :  { %v4065_v22 = vpop.eup %4064  ;;  %v2359_v34 = vmax.f32 %v2334_v60, 1e-15  ;;  %v6638_v56 = vadd.f32 1.0, %v2184_v58  ;;  %2873 = vperm.xlu0 %3669, %v6448_v52   ;;  %v6641_v45 = vadd.f32 1.0, %v2185_v53  ;;  %v6644_v42 = vmul.f32 %v1925_v57, %v6434_v3 }
 0x23b   :  { %v4067_v24 = vpop.eup %4066  ;;  %4078 = vrcp.f32 %v1827_v51  ;;  %vm1740_vm13 = vcmp.gt.f32.partialorder %v6411_v27, 0.0  ;;  %2573 = vperm.xlu1 %3668, %v2272_v10   ;;  %v1873_v14 = vmul.f32 0.996, %v4061_v38  ;;  %v2273_v52 = vsub.f32 1.0, %v6632_v20  ;;  %v7763_v27 = vld [vmem:[#allocation60_spill] sm:$0xff] }
 0x23c   :  { %v4069_v63 = vpop.eup %4068  ;;  %4080 = vrcp.f32 %v1814_v15  ;;  %v1715_v26 = vmul.f32 %v4067_v24, %v4063_v54  ;;  %v2222_v60 = vadd.f32 %v7656_v39, %v2196_v49  ;;  %v1899_v58 = vmul.f32 0.996, %v4065_v22 }
 0x23d   :  { %4082 = vrcp.f32 %v2358_v61  ;;  %v2296_v3 = vmul.f32 %v7656_v39, %v6488_v37  ;;  %v2297_v50 = vmul.f32 %v7656_v39, %v1985_v59  ;;  %v2147_v53 = vmul.f32 %v7763_v27, %v6567_v7 }
 0x23e   :  { %v6658_v36 = vsel %vm1740_vm13, %v1715_v26, 0.0  ;;  %2578 = vperm.xlu0 %3669, %v2273_v52   ;;  %4084 = vrcp.f32 %v2359_v34  ;;  %v2236_v38 = vadd.f32 %v7656_v39, %v6641_v45  ;;  %v1975_v57 = vmul.f32 %v6644_v42, %v6245_v19 }
 0x23f   :  { %v4071_v62 = vpop.eup %4070  ;;  %vm6666_vm14 = vcmp.gt.f32.partialorder %v1813_v43, 0.996  ;;  %2808 = vperm.xlu1 %3668, %v6456_v33   ;;  %v2235_v59 = vadd.f32 %v7656_v39, %v6638_v56  ;;  %v7766_v54 = vmax.f32 %v6531_v12, 1e-15  ;;  %v6683_v19 = vmul.f32 %v6658_v36, %v6553_v11 }
 0x240   :  { %v4073_v22 = vpop.eup %4072  ;;  %v1913_v34 = vsel %vm6666_vm14, %v1873_v14, 1.0  ;;  %v2247_v33 = vmul.f32 %v2222_v60, %v6494_v8  ;;  %v1974_v43 = vmul.f32 %v6550_v13, %v6141_v44  ;;  %vm1753_vm0 = vcmp.gt.f32.partialorder %v6365_v2, 0.0 }
 0x241   :  { %vm6677_vm15 = vcmp.gt.f32.partialorder %v7766_v54, 0.996  ;;  %v4075_v17 = vpop.eup %4074  ;;  %v2322_v12 = vadd.f32 %v2297_v50, %v2196_v49  ;;  %v2172_v24 = vmul.f32 2.0, %v2147_v53  ;;  %v1871_v14 = vmul.f32 0.996, %v4069_v63 }
 0x242   :  { %v1926_v10 = vsel %vm6677_vm15, %v1899_v58, 1.0  ;;  %2813 = vperm.xlu0 %3669, %v6556_v35   ;;  %v1728_v26 = vmul.f32 %v4075_v17, %v4071_v62  ;;  %v2261_v27 = vmul.f32 %v2236_v38, %v6550_v13  ;;  %v6693_v37 = vmul.f32 %v1975_v57, %v1975_v57 }
 0x243   :  { %v4077_v52 = vpop.eup %4076  ;;  %v6696_v8 = vmul.f32 %v1913_v34, %v6485_v28  ;;  %2398 = vperm.xlu1 %3668, %v2247_v33   ;;  %vm1741_vm1 = vcmp.gt.f32.partialorder %v6437_v47, 0.0  ;;  %v6700_v44 = vmul.f32 %v1926_v10, %v6509_v48  ;;  %v1815_v2 = vmax.f32 %v6683_v19, 1e-15 }
 0x244   :  { %v6703_v49 = vsel %vm1753_vm0, %v1728_v26, 0.0  ;;  %v1716_v35 = vmul.f32 %v4077_v52, %v4073_v22  ;;  %v2260_v60 = vmul.f32 %v2235_v59, %v6440_v0  ;;  %v1999_v13 = vmul.f32 %v1974_v43, %v1974_v43 }
 0x245   :  { %v4079_v63 = vpop.eup %4078  ;;  %v7769_v58 = vmax.f32 %v6513_v6, 1e-15  ;;  %v6714_v47 = vmul.f32 %v6703_v49, %v6591_v23  ;;  %v2321_v50 = vadd.f32 %v2296_v3, %v6430_v46  ;;  %v2347_v53 = vmax.f32 %v2322_v12, 1e-15  ;;  %v7772_v46 = vld [vmem:[#allocation96_spill] sm:$0xff] }
 0x246   :  { %v4081_v48 = vpop.eup %4080  ;;  %2468 = vperm.xlu0 %3669, %v2261_v27   ;;  %v6719_v0 = vsel %vm1741_vm1, %v1716_v35, 0.0  ;;  %v6721_v6 = vadd.f32 1.0, %v2172_v24  ;;  %v1963_v57 = vmul.f32 %v6696_v8, %v6298_v18  ;;  %v2162_v3 = vmul.f32 %v7772_v46, %v6700_v44  ;;  %v7773_v27 = vld [vmem:[#allocation94_spill] sm:$0xff] }
 0x247   :  { %vm6708_vm2 = vcmp.gt.f32.partialorder %v7769_v58, 0.996  ;;  %v4083_v38 = vpop.eup %4082  ;;  %v1828_v22 = vmax.f32 %v6714_v47, 1e-15  ;;  %v6728_v59 = vmul.f32 %v6719_v0, %v6607_v1  ;;  %2463 = vperm.xlu1 %3668, %v2260_v60   ;;  %v1901_v34 = vmul.f32 0.996, %v4079_v63 }
 0x248   :  { %v1912_v62 = vsel %vm6708_vm2, %v1871_v14, 1.0  ;;  %4086 = vrcp.f32 %v1815_v2  ;;  %v2287_v54 = vsub.f32 1.0, %v6693_v37  ;;  %v4085_v61 = vpop.eup %4084  ;;  %v1875_v18 = vmul.f32 0.996, %v4081_v48 }
 0x249   :  { %v6736_v17 = vmul.f32 %v1912_v62, %v6483_v29  ;;  %4088 = vrcp.f32 %v1828_v22  ;;  %v2286_v33 = vsub.f32 1.0, %v1999_v13  ;;  %v2346_v43 = vmax.f32 %v2321_v50, 1e-15 }
 0x24a   :  { %2648 = vperm.xlu0 %3669, %v2287_v54   ;;  %4090 = vrcp.f32 %v2347_v53  ;;  %v2311_v10 = vmul.f32 %v7656_v39, %v1999_v13  ;;  %vm1852_vm3 = vcmp.gt.f32.partialorder %v1827_v51, 0.996  ;;  %v1816_v12 = vmax.f32 %v6728_v59, 1e-15 }
 0x24b   :  { %2643 = vperm.xlu1 %3668, %v2286_v33   ;;  %v6744_v24 = vmul.f32 %v1963_v57, %v1963_v57  ;;  %v2187_v29 = vmul.f32 2.0, %v2162_v3  ;;  %v1927_v14 = vsel %vm1852_vm3, %v1901_v34, 1.0  ;;  %vm1839_vm4 = vcmp.gt.f32.partialorder %v1814_v15, 0.996 }
 0x24c   :  { %v2223_v26 = vadd.f32 %v7656_v39, %v6721_v6  ;;  %v1962_v52 = vmul.f32 %v6736_v17, %v6269_v30  ;;  %v2148_v32 = vmul.f32 %v7773_v27, %v6736_v17  ;;  %v1914_v51 = vsel %vm1839_vm4, %v1875_v18, 1.0 }
 0x24d   :  { %4092 = vrcp.f32 %v2346_v43  ;;  %v2336_v35 = vadd.f32 %v2311_v10, %v6641_v45  ;;  %v6756_v63 = vmul.f32 %v1927_v14, %v6573_v9  ;;  %v2161_v15 = vmul.f32 %v7774_v31, %v6644_v42 }
 0x24e   :  { %2883 = vperm.xlu0 %3669, %v4085_v61   ;;  %4094 = vrcp.f32 %v1816_v12  ;;  %v6762_v60 = vadd.f32 1.0, %v2187_v29  ;;  %v6765_v30 = vmul.f32 %v1914_v51, %v6589_v5  ;;  %v2275_v13 = vsub.f32 1.0, %v6744_v24 }
 0x24f   :  { %2878 = vperm.xlu1 %3668, %v4083_v38   ;;  %v2248_v58 = vmul.f32 %v2223_v26, %v6567_v7  ;;  %v1987_v45 = vmul.f32 %v1962_v52, %v1962_v52  ;;  %v2173_v28 = vmul.f32 2.0, %v2148_v32  ;;  %v2310_v48 = vmul.f32 %v7656_v39, %v6499_v16 }
 0x250   :  { %v2361_v53 = vmax.f32 %v2336_v35, 1e-15  ;;  %v1977_v62 = vmul.f32 %v6756_v63, %v6369_v40  ;;  %v2186_v38 = vmul.f32 2.0, %v2161_v15  ;;  %v2238_v5 = vadd.f32 %v7656_v39, %v6762_v60  ;;  %v7775_v35 = vld [vmem:[#allocation77_spill] sm:$0xff] }
 0x251   :  { %v2150_v7 = vmul.f32 %v6371_v55, %v6765_v30  ;;  %v2198_v46 = vadd.f32 1.0, %v2173_v28  ;;  %v2274_v54 = vsub.f32 1.0, %v1987_v45  ;;  %v2335_v16 = vadd.f32 %v2310_v48, %v6638_v56 }
 0x252   :  { %v4087_v9 = vpop.eup %4086  ;;  %2588 = vperm.xlu0 %3669, %v2275_v13   ;;  %v1976_v61 = vmul.f32 %v6700_v44, %v6303_v41  ;;  %4096 = vrcp.f32 %v2361_v53  ;;  %v2299_v40 = vmul.f32 %v7656_v39, %v1987_v45  ;;  %v6781_v18 = vmul.f32 %v1977_v62, %v1977_v62 }
 0x253   :  { %v4089_v50 = vpop.eup %4088  ;;  %2403 = vperm.xlu1 %3668, %v2248_v58   ;;  %v1877_v3 = vmul.f32 0.996, %v4087_v9  ;;  %v2263_v55 = vmul.f32 %v2238_v5, %v6700_v44  ;;  %v2175_v43 = vmul.f32 2.0, %v2150_v7  ;;  %vm1840_vm5 = vcmp.gt.f32.partialorder %v1815_v2, 0.996  ;;  %v2139_v58 = vpop.xlane.xlu0 %2138 }
 0x254   :  { %v4091_v57 = vpop.eup %4090  ;;  %v1903_v34 = vmul.f32 0.996, %v4089_v50  ;;  %vm1853_vm6 = vcmp.gt.f32.partialorder %v1828_v22, 0.996  ;;  %v6788_v10 = vadd.f32 1.0, %v2186_v38  ;;  %v2224_v41 = vadd.f32 %v7656_v39, %v2198_v46 }
 0x255   :  { %v1915_v29 = vsel %vm1840_vm5, %v1877_v3, 1.0  ;;  %v2360_v26 = vmax.f32 %v2335_v16, 1e-15  ;;  %v2001_v52 = vmul.f32 %v1976_v61, %v1976_v61  ;;  %v2324_v27 = vadd.f32 %v2299_v40, %v2198_v46 }
 0x256   :  { %2823 = vperm.xlu0 %3669, %v4091_v57   ;;  %v1928_v14 = vsel %vm1853_vm6, %v1903_v34, 1.0  ;;  %v2289_v44 = vsub.f32 1.0, %v6781_v18  ;;  %v2200_v32 = vadd.f32 1.0, %v2175_v43  ;;  %v6793_v19 = vmul.f32 %v1915_v29, %v6658_v36 }
 0x257   :  { %2583 = vperm.xlu1 %3668, %v2274_v54   ;;  %v4093_v33 = vpop.eup %4092  ;;  %v6796_v2 = vmul.f32 %v1928_v14, %v6703_v49  ;;  %v2237_v22 = vadd.f32 %v7656_v39, %v6788_v10  ;;  %v2249_v51 = vmul.f32 %v2224_v41, %v6736_v17  ;;  %v2149_v31 = vmul.f32 %v7775_v35, %v6696_v8  ;;  %v2103_v57 = vpop.xlane.xlu0 %2102 }
 0x258   :  { %v4095_v56 = vpop.eup %4094  ;;  %4098 = vrcp.f32 %v2360_v26  ;;  %v2313_v15 = vmul.f32 %v7656_v39, %v2001_v52  ;;  %v2298_v36 = vmul.f32 %v7656_v39, %v6632_v20  ;;  %v2349_v13 = vmax.f32 %v2324_v27, 1e-15 }
 0x259   :  { %v1879_v47 = vmul.f32 0.996, %v4095_v56  ;;  %v1964_v49 = vmul.f32 %v6765_v30, %v6377_v4  ;;  %vm1841_vm7 = vcmp.gt.f32.partialorder %v1816_v12, 0.996  ;;  %v2226_v17 = vadd.f32 %v7656_v39, %v2200_v32 }
 0x25a   :  { %2478 = vperm.xlu0 %3669, %v2263_v55   ;;  %v1965_v45 = vmul.f32 %v6793_v19, %v6553_v11  ;;  %v2164_v28 = vmul.f32 %v2139_v58, %v6796_v2  ;;  %v2262_v20 = vmul.f32 %v2237_v22, %v6644_v42  ;;  %v2174_v50 = vmul.f32 2.0, %v2149_v31 }
 0x25b   :  { %2818 = vperm.xlu1 %3668, %v4093_v33   ;;  %v1916_v9 = vsel %vm1841_vm7, %v1879_v47, 1.0  ;;  %v2338_v53 = vadd.f32 %v2313_v15, %v6762_v60  ;;  %4100 = vrcp.f32 %v2349_v13  ;;  %v1989_v4 = vmul.f32 %v1964_v49, %v1964_v49  ;;  %v6842_v43 = vpop.permute.xlu1 %2543 }
 0x25c   :  { %v4097_v48 = vpop.eup %4096  ;;  %v1978_v59 = vmul.f32 %v6796_v2, %v6591_v23  ;;  %v6819_v12 = vmul.f32 %v1916_v9, %v6719_v0  ;;  %v2323_v11 = vadd.f32 %v2298_v36, %v6721_v6  ;;  %v2251_v62 = vmul.f32 %v2226_v17, %v6765_v30  ;;  %v6854_v31 = vpop.permute.xlu0 %2608 }
 0x25d   :  { %v6823_v38 = vmul.f32 %v1965_v45, %v1965_v45  ;;  %v2189_v42 = vmul.f32 2.0, %v2164_v28  ;;  %v6825_v5 = vadd.f32 1.0, %v2174_v50  ;;  %v2288_v60 = vsub.f32 1.0, %v2001_v52 }
 0x25e   :  { %2658 = vperm.xlu0 %3669, %v2289_v44   ;;  %v2363_v7 = vmax.f32 %v2338_v53, 1e-15  ;;  %v2301_v46 = vmul.f32 %v7656_v39, %v1989_v4  ;;  %v6828_v23 = vmul.f32 %v1978_v59, %v1978_v59  ;;  %v1966_v0 = vmul.f32 %v6819_v12, %v6607_v1 }
 0x25f   :  { %2408 = vperm.xlu1 %3668, %v2249_v51   ;;  %v2152_v6 = vmul.f32 %v2103_v57, %v6819_v12  ;;  %v2348_v3 = vmax.f32 %v2323_v11, 1e-15  ;;  %v2214_v34 = vadd.f32 1.0, %v2189_v42  ;;  %v2277_v54 = vsub.f32 1.0, %v6823_v38  ;;  %v6852_v51 = vpop.permute.xlu1 %2368 }
 0x260   :  { %v2225_v16 = vadd.f32 %v7656_v39, %v6825_v5  ;;  %v2163_v61 = vmul.f32 %v6319_v25, %v6756_v63  ;;  %4102 = vrcp.f32 %v2363_v7  ;;  %v2326_v40 = vadd.f32 %v2301_v46, %v2200_v32  ;;  %v2549_v45 = vpop.permute.xlu0 %2548 }
 0x261   :  { %v2315_v1 = vmul.f32 %v7656_v39, %v6828_v23  ;;  %v6840_v33 = vmul.f32 %v1966_v0, %v1966_v0  ;;  %v2177_v55 = vmul.f32 2.0, %v2152_v6  ;;  %4104 = vrcp.f32 %v2348_v3 }
 0x262   :  { %2893 = vperm.xlu0 %3669, %v4097_v48   ;;  %v4099_v30 = vpop.eup %4098  ;;  %v2312_v56 = vmul.f32 %v7656_v39, %v6693_v37  ;;  %v2240_v41 = vadd.f32 %v7656_v39, %v2214_v34  ;;  %v2250_v25 = vmul.f32 %v2225_v16, %v6696_v8  ;;  %v2188_v14 = vmul.f32 2.0, %v2163_v61 }
 0x263   :  { %2473 = vperm.xlu1 %3668, %v2262_v20   ;;  %v2351_v26 = vmax.f32 %v2326_v40, 1e-15  ;;  %v2340_v52 = vadd.f32 %v2315_v1, %v2214_v34  ;;  %v2303_v27 = vmul.f32 %v7656_v39, %v6840_v33  ;;  %v2202_v44 = vadd.f32 1.0, %v2177_v55  ;;  %v6860_v17 = vpop.permute.xlu1 %2433 }
 0x264   :  { %v2337_v32 = vadd.f32 %v2312_v56, %v6788_v10  ;;  %v2265_v47 = vmul.f32 %v2240_v41, %v6796_v2  ;;  %v2213_v22 = vadd.f32 1.0, %v2188_v14  ;;  %v2276_v37 = vsub.f32 1.0, %v1989_v4  ;;  %v7776_v41 = vld [vmem:[#allocation15_spill] sm:$0xff] }
 0x265   :  { %v4101_v29 = vpop.eup %4100  ;;  %4106 = vrcp.f32 %v2351_v26  ;;  %v2365_v8 = vmax.f32 %v2340_v52, 1e-15  ;;  %v2328_v35 = vadd.f32 %v2303_v27, %v2202_v44  ;;  %v2151_v13 = vmul.f32 %v6400_v21, %v6793_v19  ;;  %v7778_v26 = vld [vmem:[#allocation14_spill] sm:$0xff]  ;;  %v7779_v27 = vld [vmem:[#allocation16_spill] sm:$0xff] }
 0x266   :  { %2418 = vperm.xlu0 %3669, %v2251_v62   ;;  %v2362_v36 = vmax.f32 %v2337_v32, 1e-15  ;;  %v2228_v10 = vadd.f32 %v7656_v39, %v2202_v44  ;;  %v2239_v2 = vadd.f32 %v7656_v39, %v2213_v22  ;;  %v2300_v28 = vmul.f32 %v7656_v39, %v6744_v24  ;;  %v2374_v62 = vpop.permute.xlu0 %2373 }
 0x267   :  { %2653 = vperm.xlu1 %3668, %v2288_v60   ;;  %4108 = vrcp.f32 %v2365_v8  ;;  %v2353_v58 = vmax.f32 %v2328_v35, 1e-15  ;;  %v2176_v9 = vmul.f32 2.0, %v2151_v13  ;;  %v2302_v53 = vmul.f32 %v7656_v39, %v6823_v38  ;;  %v2614_v11 = vpop.permute.xlu1 %2613 }
 0x268   :  { %4110 = vrcp.f32 %v2362_v36  ;;  %v2253_v48 = vmul.f32 %v2228_v10, %v6819_v12  ;;  %v2264_v21 = vmul.f32 %v2239_v2, %v6756_v63  ;;  %v2325_v20 = vadd.f32 %v2300_v28, %v6825_v5 }
 0x269   :  { %4112 = vrcp.f32 %v2353_v58  ;;  %v2201_v50 = vadd.f32 1.0, %v2176_v9  ;;  %v2290_v59 = vsub.f32 1.0, %v6828_v23  ;;  %v2314_v63 = vmul.f32 %v7656_v39, %v6781_v18 }
 0x26a   :  { %2598 = vperm.xlu0 %3669, %v2277_v54   ;;  %v4103_v15 = vpop.eup %4102  ;;  %v2350_v24 = vmax.f32 %v2325_v20, 1e-15  ;;  %v2439_v38 = vpop.permute.xlu0 %2438 }
 0x26b   :  { %2888 = vperm.xlu1 %3668, %v4099_v30   ;;  %v4105_v49 = vpop.eup %4104  ;;  %v2327_v12 = vadd.f32 %v2302_v53, %v2201_v50  ;;  %v2227_v60 = vadd.f32 %v7656_v39, %v2201_v50  ;;  %v2554_v7 = vpop.permute.xlu1 %2553  ;;  %v2339_v57 = vadd.f32 %v2314_v63, %v2213_v22  ;;  %v2278_v39 = vsub.f32 1.0, %v6840_v33 }
 0x26c   :  { %4114 = vrcp.f32 %v2350_v24  ;;  %v2519_v52 = vmul.f32 %v2439_v38, %v7778_v26  ;;  %v2520_v44 = vmul.f32 %v2439_v38, %v7779_v27  ;;  %v7783_v24 = vld [vmem:[#allocation20_spill] sm:$0xff] }
 0x26d   :  { %v2352_v46 = vmax.f32 %v2327_v12, 1e-15  ;;  %v2252_v0 = vmul.f32 %v2227_v60, %v6793_v19  ;;  %v2364_v6 = vmax.f32 %v2339_v57, 1e-15 }
 0x26e   :  { %2833 = vperm.xlu0 %3669, %v4101_v29   ;;  %v2493_v29 = vmul.f32 %v2374_v62, %v7776_v41  ;;  %v7787_v41 = vld [vmem:[#allocation13_spill] sm:$0xff] }
 0x26f   :  { %2413 = vperm.xlu1 %3668, %v2250_v25   ;;  %v4107_v4 = vpop.eup %4106  ;;  %4116 = vrcp.f32 %v2352_v46  ;;  %v7777_v25 = vld [vmem:[#allocation17_spill] sm:$0xff] }
 0x270   :  { %4118 = vrcp.f32 %v2364_v6  ;;  %v2494_v14 = vmul.f32 %v2374_v62, %v7777_v25 }
 0x271   :  { %v4109_v42 = vpop.eup %4108 }
 0x272   :  { %2488 = vperm.xlu0 %3669, %v2265_v47   ;;  %v4111_v5 = vpop.eup %4110  ;;  %v7780_v47 = vld [vmem:[#allocation8_spill] sm:$0xff] }
 0x273   :  { %2593 = vperm.xlu1 %3668, %v2276_v37   ;;  %v4113_v23 = vpop.eup %4112  ;;  %v2668_v22 = vmul.f32 %v2549_v45, %v7780_v47  ;;  %v7781_v37 = vld [vmem:[#allocation9_spill] sm:$0xff]  ;;  %v2694_v35 = vmul.f32 %v2614_v11, %v7780_v47  ;;  %v2670_v57 = vmul.f32 %v2554_v7, %v7780_v47  ;;  %v2666_v6 = vmul.f32 %v6842_v43, %v7780_v47 }
 0x274   :  { %v2669_v8 = vmul.f32 %v2549_v45, %v7781_v37  ;;  %v2671_v46 = vmul.f32 %v2554_v7, %v7781_v37  ;;  %v2693_v27 = vmul.f32 %v6854_v31, %v7781_v37 }
 0x275   :  { %v2744_v13 = vadd.f32 %v2694_v35, %v2519_v52  ;;  %v2718_v2 = vadd.f32 %v2668_v22, %v2493_v29 }
 0x276   :  { %2903 = vperm.xlu0 %3669, %v4103_v15   ;;  %v4115_v34 = vpop.eup %4114  ;;  %v2695_v15 = vmul.f32 %v2614_v11, %v7781_v37  ;;  %v7782_v11 = vld [vmem:[#allocation18_spill] sm:$0xff] }
 0x277   :  { %2828 = vperm.xlu1 %3668, %v4105_v49   ;;  %v2719_v49 = vadd.f32 %v2669_v8, %v2494_v14 }
 0x278   :  { %v2745_v10 = vadd.f32 %v2695_v15, %v2520_v44 }
 0x279   :  { %v4117_v16 = vpop.eup %4116 }
 0x27a   :  { %2428 = vperm.xlu0 %3669, %v2253_v48   ;;  %v4119_v40 = vpop.eup %4118 }
 0x27b   :  { %2483 = vperm.xlu1 %3668, %v2264_v21  }
 0x27e   :  { %2843 = vperm.xlu0 %3669, %v4107_v4  }
 0x27f   :  { %2663 = vperm.xlu1 %3668, %v2290_v59  }
 0x282   :  { %2913 = vperm.xlu0 %3669, %v4109_v42   ;;  %v7784_v42 = vld [vmem:[#allocation10_spill] sm:$0xff] }
 0x283   :  { %2898 = vperm.xlu1 %3668, %v4111_v5   ;;  %v2491_v60 = vmul.f32 %v6852_v51, %v7784_v42  ;;  %v7785_v5 = vld [vmem:[#allocation12_spill] sm:$0xff] }
 0x284   :  { %v2492_v38 = vmul.f32 %v6852_v51, %v7785_v5  ;;  %v2518_v51 = vmul.f32 %v6860_v17, %v7787_v41 }
 0x285   :  { %v2716_v7 = vadd.f32 %v2666_v6, %v2491_v60  ;;  %v7792_v6 = vld [vmem:[#allocation22_spill] sm:$0xff] }
 0x286   :  { %2853 = vperm.xlu0 %3669, %v4113_v23   ;;  %v2743_v15 = vadd.f32 %v2693_v27, %v2518_v51 }
 0x287   :  { %2423 = vperm.xlu1 %3668, %v2252_v0  }
 0x288   :  { %v6874_v30 = vpop.permute.xlu0 %2618 }
 0x289   :  { %v2379_v18 = vpop.permute.xlu1 %2378 }
 0x28a   :  { %v2495_v62 = vmul.f32 %v2379_v18, %v7782_v11  ;;  %v2496_v63 = vmul.f32 %v2379_v18, %v7783_v24  ;;  %v2667_v18 = vmul.f32 %v6842_v43, %v7781_v37  ;;  %v2692_v43 = vmul.f32 %v6854_v31, %v7780_v47  ;;  %v7789_v31 = vld [vmem:[#allocation21_spill] sm:$0xff] }
 0x28b   :  { %2603 = vperm.xlu1 %3668, %v2278_v39   ;;  %v7791_v11 = vld [vmem:[#allocation25_spill] sm:$0xff] }
 0x28c   :  { %v2720_v39 = vadd.f32 %v2670_v57, %v2495_v62  ;;  %v2717_v25 = vadd.f32 %v2667_v18, %v2492_v38 }
 0x28d   :  { %v6877_v3 = vpop.permute.xlu1 %2443 }
 0x28e   :  { %v6879_v54 = vpop.permute.xlu0 %2558 }
 0x28f   :  { %2838 = vperm.xlu1 %3668, %v4115_v34   ;;  %v2721_v34 = vadd.f32 %v2671_v46, %v2496_v63 }
 0x292   :  { %v6881_v61 = vpop.permute.xlu1 %2623  ;;  %v2794_v19 = vpop.permute.xlu0 %2793 }
 0x293   :  { %2848 = vperm.xlu1 %3668, %v4117_v16   ;;  %v7786_v16 = vld [vmem:[#allocation11_spill] sm:$0xff]  ;;  %v6949_v44 = vmul.f32 %v2794_v19, %v2716_v7  ;;  %v6951_v22 = vmul.f32 %v2794_v19, %v2717_v25  ;;  %v2698_v63 = vmul.f32 %v6881_v61, %v7780_v47  ;;  %v2699_v42 = vmul.f32 %v6881_v61, %v7781_v37 }
 0x294   :  { %v2672_v7 = vmul.f32 %v6879_v54, %v7780_v47  ;;  %v2673_v25 = vmul.f32 %v6879_v54, %v7781_v37 }
 0x296   :  { %v6883_v1 = vpop.permute.xlu1 %2858  ;;  %v6885_v55 = vpop.permute.xlu0 %2448 }
 0x297   :  { %2908 = vperm.xlu1 %3668, %v4119_v40   ;;  %v2517_v40 = vmul.f32 %v6860_v17, %v7786_v16  ;;  %v2524_v62 = vmul.f32 %v6885_v55, %v7791_v11 }
 0x299   :  { %v2742_v35 = vadd.f32 %v2692_v43, %v2517_v40 }
 0x29a   :  { %v6887_v33 = vpop.permute.xlu1 %2383  ;;  %v6889_v56 = vpop.permute.xlu0 %2628 }
 0x29b   :  { %v6964_v19 = vmul.f32 %v6883_v1, %v2742_v35  ;;  %v2497_v18 = vmul.f32 %v6887_v33, %v7792_v6 }
 0x29e   :  { %v6895_v32 = vpop.permute.xlu1 %2563  ;;  %v2864_v36 = vpop.permute.xlu0 %2863 }
 0x29f   :  { %v6901_v28 = vmul.f32 %v2864_v36, %v2744_v13  ;;  %v6903_v9 = vmul.f32 %v2864_v36, %v2745_v10 }
 0x2a1   :  { %v3094_v53 = vmul.f32 %v6901_v28, %v6901_v28  ;;  %v3095_v4 = vmul.f32 %v6903_v9, %v6903_v9 }
 0x2a2   :  { %v2799_v58 = vpop.permute.xlu1 %2798 }
 0x2a3   :  { %v6905_v48 = vmul.f32 %v2799_v58, %v2718_v2  ;;  %v6907_v21 = vmul.f32 %v2799_v58, %v2719_v49  ;;  %v3158_v0 = vadd.f32 %v3095_v4, %v3094_v53  ;;  %v7788_v2 = vld [vmem:[#allocation19_spill] sm:$0xff]  ;;  %v2522_v58 = vmul.f32 %v6877_v3, %v7789_v31 }
 0x2a4   :  { %v2521_v49 = vmul.f32 %v6877_v3, %v7788_v2  ;;  %v3067_v53 = vmul.f32 %v6951_v22, %v6951_v22  ;;  %v7790_v4 = vld [vmem:[#allocation23_spill] sm:$0xff]  ;;  %v2696_v3 = vmul.f32 %v6874_v30, %v7780_v47  ;;  %v2722_v2 = vadd.f32 %v2672_v7, %v2497_v18 }
 0x2a5   :  { %v3068_v45 = vmul.f32 %v6905_v48, %v6905_v48  ;;  %v3069_v20 = vmul.f32 %v6907_v21, %v6907_v21  ;;  %v2674_v31 = vmul.f32 %v6895_v32, %v7780_v47 }
 0x2a6   :  { %v6913_v50 = vpop.permute.xlu1 %2388  ;;  %v2746_v38 = vadd.f32 %v2696_v3, %v2521_v49 }
 0x2a7   :  { %v3119_v59 = vadd.f32 %v3069_v20, %v3068_v45  ;;  %v6967_v45 = vmul.f32 %v6883_v1, %v2743_v15  ;;  %v3066_v20 = vmul.f32 %v6949_v44, %v6949_v44  ;;  %v2697_v1 = vmul.f32 %v6874_v30, %v7781_v37 }
 0x2a8   :  { %v2749_v30 = vadd.f32 %v2699_v42, %v2524_v62 }
 0x2a9   :  { %v6921_v12 = vpop.permute.xlu0 %2568  ;;  %3120 = vadd.xlane.f32.xlu0 %v3119_v59  ;;  %v2523_v59 = vmul.f32 %v6885_v55, %v7790_v4  ;;  %v3092_v55 = vmul.f32 %v6964_v19, %v6964_v19  ;;  %v3093_v5 = vmul.f32 %v6967_v45, %v6967_v45  ;;  %v2747_v57 = vadd.f32 %v2697_v1, %v2522_v58 }
 0x2aa   :  { %v6929_v23 = vpop.permute.xlu1 %2453 }
 0x2ab   :  { %v2748_v46 = vadd.f32 %v2698_v63, %v2523_v59  ;;  %v3155_v43 = vadd.f32 %v3093_v5, %v3092_v55 }
 0x2ad   :  { %v2804_v29 = vpop.permute.xlu0 %2803  ;;  %3159 = vadd.xlane.f32.xlu0 %v3158_v0  ;;  %v3116_v0 = vadd.f32 %v3067_v53, %v3066_v20 }
 0x2ae   :  { %v6939_v14 = vmul.f32 %v2804_v29, %v2720_v39  ;;  %v6941_v26 = vmul.f32 %v2804_v29, %v2721_v34  ;;  %v6943_v52 = vpop.permute.xlu1 %2633  ;;  %v7793_v39 = vld [vmem:[#allocation24_spill] sm:$0xff] }
 0x2af   :  { %v2498_v34 = vmul.f32 %v6887_v33, %v7793_v39  ;;  %v7794_v33 = vld [vmem:[#allocation26_spill] sm:$0xff]  ;;  %v2702_v6 = vmul.f32 %v6943_v52, %v7780_v47  ;;  %v2703_v18 = vmul.f32 %v6943_v52, %v7781_v37  ;;  %v7796_v39 = vld [vmem:[#allocation27_spill] sm:$0xff]  ;;  %v2701_v52 = vmul.f32 %v6889_v56, %v7781_v37 }
 0x2b0   :  { %v3070_v17 = vmul.f32 %v6939_v14, %v6939_v14  ;;  %v3071_v8 = vmul.f32 %v6941_v26, %v6941_v26  ;;  %v2499_v27 = vmul.f32 %v6913_v50, %v7794_v33 }
 0x2b1   :  { %v6957_v36 = vpop.permute.xlu0 %2458  ;;  %v2723_v49 = vadd.f32 %v2673_v25, %v2498_v34  ;;  %v2525_v34 = vmul.f32 %v6929_v23, %v7796_v39 }
 0x2b2   :  { %v3122_v13 = vadd.f32 %v3071_v8, %v3070_v17  ;;  %v2869_v10 = vpop.permute.xlu1 %2868  ;;  %v7795_v17 = vld [vmem:[#allocation28_spill] sm:$0xff]  ;;  %v2724_v59 = vadd.f32 %v2674_v31, %v2499_v27  ;;  %v7799_v27 = vld [vmem:[#allocation33_spill] sm:$0xff] }
 0x2b3   :  { %v6997_v61 = vmul.f32 %v2869_v10, %v2746_v38  ;;  %v6999_v16 = vmul.f32 %v2869_v10, %v2747_v57  ;;  %v2500_v8 = vmul.f32 %v6913_v50, %v7795_v17  ;;  %v2675_v50 = vmul.f32 %v6895_v32, %v7781_v37 }
 0x2b4   :  { %3123 = vadd.xlane.f32.xlu0 %v3122_v13  ;;  %v2528_v17 = vmul.f32 %v6957_v36, %v7799_v27 }
 0x2b5   :  { %v6981_v24 = vpop.permute.xlu0 %2638  ;;  %v3096_v13 = vmul.f32 %v6997_v61, %v6997_v61  ;;  %v3097_v54 = vmul.f32 %v6999_v16, %v6999_v16  ;;  %v2725_v11 = vadd.f32 %v2675_v50, %v2500_v8 }
 0x2b6   :  { %v6987_v60 = vpop.permute.xlu1 %2393 }
 0x2b7   :  { %v3161_v63 = vadd.f32 %v3097_v54, %v3096_v13  ;;  %v2753_v13 = vadd.f32 %v2703_v18, %v2528_v17 }
 0x2b9   :  { %v2874_v40 = vpop.permute.xlu0 %2873 }
 0x2ba   :  { %v7001_v41 = vmul.f32 %v2874_v40, %v2748_v46  ;;  %v7003_v51 = vmul.f32 %v2874_v40, %v2749_v30  ;;  %v7005_v29 = vpop.permute.xlu1 %2573  ;;  %v7797_v40 = vld [vmem:[#allocation29_spill] sm:$0xff] }
 0x2bb   :  { %3117 = vadd.xlane.f32.xlu1 %v3116_v0  ;;  %v2526_v7 = vmul.f32 %v6929_v23, %v7797_v40 }
 0x2bc   :  { %v3098_v35 = vmul.f32 %v7001_v41, %v7001_v41  ;;  %v3099_v15 = vmul.f32 %v7003_v51, %v7003_v51 }
 0x2bd   :  { %v7023_v10 = vpop.permute.xlu0 %2578  ;;  %v2751_v23 = vadd.f32 %v2701_v52, %v2526_v7  ;;  %v7803_v7 = vld [vmem:[#allocation32_spill] sm:$0xff]  ;;  %v2677_v52 = vmul.f32 %v6921_v12, %v7781_v37 }
 0x2be   :  { %v3164_v58 = vadd.f32 %v3099_v15, %v3098_v35  ;;  %v2809_v20 = vpop.permute.xlu1 %2808  ;;  %v2700_v35 = vmul.f32 %v6889_v56, %v7780_v47 }
 0x2bf   :  { %v7029_v53 = vmul.f32 %v2809_v20, %v2722_v2  ;;  %v7031_v4 = vmul.f32 %v2809_v20, %v2723_v49  ;;  %3156 = vadd.xlane.f32.xlu1 %v3155_v43  ;;  %v7798_v43 = vld [vmem:[#allocation31_spill] sm:$0xff]  ;;  %v7800_v20 = vld [vmem:[#allocation34_spill] sm:$0xff] }
 0x2c0   :  { %3165 = vadd.xlane.f32.xlu0 %v3164_v58  ;;  %v2527_v33 = vmul.f32 %v6957_v36, %v7798_v43  ;;  %v2750_v2 = vadd.f32 %v2700_v35, %v2525_v34  ;;  %v7802_v34 = vld [vmem:[#allocation30_spill] sm:$0xff]  ;;  %v2502_v43 = vmul.f32 %v6987_v60, %v7803_v7  ;;  %v2676_v35 = vmul.f32 %v6921_v12, %v7780_v47 }
 0x2c1   :  { %v2814_v62 = vpop.permute.xlu0 %2813  ;;  %v3072_v3 = vmul.f32 %v7029_v53, %v7029_v53  ;;  %v3073_v1 = vmul.f32 %v7031_v4, %v7031_v4  ;;  %v2501_v40 = vmul.f32 %v6987_v60, %v7802_v34 }
 0x2c2   :  { %v7037_v42 = vmul.f32 %v2814_v62, %v2724_v59  ;;  %v7039_v32 = vmul.f32 %v2814_v62, %v2725_v11  ;;  %v2399_v55 = vpop.permute.xlu1 %2398  ;;  %v2752_v15 = vadd.f32 %v2702_v6, %v2527_v33  ;;  %v7801_v11 = vld [vmem:[#allocation36_spill] sm:$0xff] }
 0x2c3   :  { %3162 = vadd.xlane.f32.xlu1 %v3161_v63  ;;  %v3125_v46 = vadd.f32 %v3073_v1, %v3072_v3  ;;  %v2503_v59 = vmul.f32 %v2399_v55, %v7800_v20  ;;  %v2504_v62 = vmul.f32 %v2399_v55, %v7801_v11  ;;  %v2679_v55 = vmul.f32 %v7005_v29, %v7781_v37 }
 0x2c4   :  { %v3074_v5 = vmul.f32 %v7037_v42, %v7037_v42  ;;  %v3075_v38 = vmul.f32 %v7039_v32, %v7039_v32 }
 0x2c5   :  { %v7045_v57 = vpop.permute.xlu0 %2468  ;;  %v2729_v39 = vadd.f32 %v2679_v55, %v2504_v62 }
 0x2c6   :  { %v3128_v30 = vadd.f32 %v3075_v38, %v3074_v5  ;;  %v7047_v0 = vpop.permute.xlu1 %2463  ;;  %v2678_v38 = vmul.f32 %v7005_v29, %v7780_v47 }
 0x2c7   :  { %3126 = vadd.xlane.f32.xlu1 %v3125_v46 }
 0x2c8   :  { %3129 = vadd.xlane.f32.xlu0 %v3128_v30  ;;  %v2728_v18 = vadd.f32 %v2678_v38, %v2503_v59  ;;  %v7805_v38 = vld [vmem:[#allocation41_spill] sm:$0xff] }
 0x2c9   :  { %v7057_v25 = vpop.permute.xlu0 %2648  ;;  %v2532_v55 = vmul.f32 %v7045_v57, %v7805_v38 }
 0x2ca   :  { %v2644_v8 = vpop.permute.xlu1 %2643 }
 0x2cb   :  { %v2706_v11 = vmul.f32 %v2644_v8, %v7780_v47  ;;  %v2707_v62 = vmul.f32 %v2644_v8, %v7781_v37 }
 0x2cd   :  { %v2884_v54 = vpop.permute.xlu0 %2883 }
 0x2ce   :  { %v7067_v49 = vmul.f32 %v2884_v54, %v2752_v15  ;;  %v7069_v31 = vmul.f32 %v2884_v54, %v2753_v13  ;;  %v2879_v50 = vpop.permute.xlu1 %2878  ;;  %v2726_v54 = vadd.f32 %v2676_v35, %v2501_v40  ;;  %v7806_v35 = vld [vmem:[#allocation35_spill] sm:$0xff] }
 0x2cf   :  { %v7071_v58 = vmul.f32 %v2879_v50, %v2750_v2  ;;  %v7073_v36 = vmul.f32 %v2879_v50, %v2751_v23  ;;  %v2727_v2 = vadd.f32 %v2677_v52, %v2502_v43  ;;  %v7807_v52 = vld [vmem:[#allocation37_spill] sm:$0xff] }
 0x2d0   :  { %v3102_v56 = vmul.f32 %v7067_v49, %v7067_v49  ;;  %v3103_v3 = vmul.f32 %v7069_v31, %v7069_v31 }
 0x2d1   :  { %v7081_v1 = vpop.permute.xlu0 %2588  ;;  %v3100_v63 = vmul.f32 %v7071_v58, %v7071_v58  ;;  %v3101_v5 = vmul.f32 %v7073_v36, %v7073_v36 }
 0x2d2   :  { %v3170_v46 = vadd.f32 %v3103_v3, %v3102_v56  ;;  %v7091_v30 = vpop.permute.xlu1 %2403 }
 0x2d3   :  { %v3167_v6 = vadd.f32 %v3101_v5, %v3100_v63  ;;  %v7804_v63 = vld [vmem:[#allocation39_spill] sm:$0xff] }
 0x2d4   :  { %3171 = vadd.xlane.f32.xlu0 %v3170_v46  ;;  %v2531_v5 = vmul.f32 %v7045_v57, %v7804_v63  ;;  %v2529_v57 = vmul.f32 %v7047_v0, %v7806_v35 }
 0x2d5   :  { %v2824_v33 = vpop.permute.xlu0 %2823  ;;  %3168 = vadd.xlane.f32.xlu1 %v3167_v6 }
 0x2d6   :  { %v7097_v27 = vmul.f32 %v2824_v33, %v2728_v18  ;;  %v7099_v17 = vmul.f32 %v2824_v33, %v2729_v39  ;;  %v2584_v29 = vpop.permute.xlu1 %2583  ;;  %v2756_v18 = vadd.f32 %v2706_v11, %v2531_v5  ;;  %v2757_v39 = vadd.f32 %v2707_v62, %v2532_v55  ;;  %v7808_v11 = vld [vmem:[#allocation42_spill] sm:$0xff] }
 0x2d7   :  { %v2683_v55 = vmul.f32 %v2584_v29, %v7781_v37 }
 0x2d8   :  { %v3078_v15 = vmul.f32 %v7097_v27, %v7097_v27  ;;  %v3079_v13 = vmul.f32 %v7099_v17, %v7099_v17 }
 0x2d9   :  { %v2479_v60 = vpop.permute.xlu0 %2478 }
 0x2da   :  { %v3134_v23 = vadd.f32 %v3079_v13, %v3078_v15  ;;  %v2819_v50 = vpop.permute.xlu1 %2818  ;;  %v2530_v15 = vmul.f32 %v7047_v0, %v7807_v52  ;;  %v2682_v0 = vmul.f32 %v2584_v29, %v7780_v47 }
 0x2db   :  { %v7109_v20 = vmul.f32 %v2819_v50, %v2726_v54  ;;  %v7111_v59 = vmul.f32 %v2819_v50, %v2727_v2  ;;  %v2705_v50 = vmul.f32 %v6981_v24, %v7781_v37 }
 0x2dc   :  { %3135 = vadd.xlane.f32.xlu0 %v3134_v23  ;;  %v2704_v23 = vmul.f32 %v6981_v24, %v7780_v47 }
 0x2dd   :  { %v7115_v12 = vpop.permute.xlu0 %2658  ;;  %v3076_v56 = vmul.f32 %v7109_v20, %v7109_v20  ;;  %v3077_v3 = vmul.f32 %v7111_v59, %v7111_v59  ;;  %v2755_v38 = vadd.f32 %v2705_v50, %v2530_v15 }
 0x2de   :  { %v2409_v46 = vpop.permute.xlu1 %2408  ;;  %v2754_v5 = vadd.f32 %v2704_v23, %v2529_v57 }
 0x2df   :  { %v3131_v6 = vadd.f32 %v3077_v3, %v3076_v56  ;;  %v2507_v62 = vmul.f32 %v2409_v46, %v7808_v11  ;;  %v7809_v56 = vld [vmem:[#allocation45_spill] sm:$0xff]  ;;  %v7812_v11 = vld [vmem:[#allocation38_spill] sm:$0xff] }
 0x2e0   :  { %v2508_v3 = vmul.f32 %v2409_v46, %v7809_v56  ;;  %v7813_v56 = vld [vmem:[#allocation40_spill] sm:$0xff] }
 0x2e1   :  { %v2894_v8 = vpop.permute.xlu0 %2893  ;;  %3132 = vadd.xlane.f32.xlu1 %v3131_v6 }
 0x2e2   :  { %v7125_v34 = vmul.f32 %v2894_v8, %v2756_v18  ;;  %v7127_v40 = vmul.f32 %v2894_v8, %v2757_v39  ;;  %v7129_v7 = vpop.permute.xlu1 %2473  ;;  %v2732_v8 = vadd.f32 %v2682_v0, %v2507_v62  ;;  %v2733_v24 = vadd.f32 %v2683_v55, %v2508_v3  ;;  %v7815_v55 = vld [vmem:[#allocation48_spill] sm:$0xff] }
 0x2e3   :  { %v2505_v62 = vmul.f32 %v7091_v30, %v7812_v11  ;;  %v2506_v3 = vmul.f32 %v7091_v30, %v7813_v56 }
 0x2e4   :  { %v3106_v43 = vmul.f32 %v7125_v34, %v7125_v34  ;;  %v3107_v33 = vmul.f32 %v7127_v40, %v7127_v40 }
 0x2e5   :  { %v2419_v13 = vpop.permute.xlu0 %2418 }
 0x2e6   :  { %v3176_v54 = vadd.f32 %v3107_v33, %v3106_v43  ;;  %v2654_v2 = vpop.permute.xlu1 %2653 }
 0x2e7   :  { %v2710_v15 = vmul.f32 %v2654_v2, %v7780_v47 }
 0x2e8   :  { %3177 = vadd.xlane.f32.xlu0 %v3176_v54  ;;  %v2711_v54 = vmul.f32 %v2654_v2, %v7781_v37 }
 0x2e9   :  { %v7145_v63 = vpop.permute.xlu0 %2598 }
 0x2ea   :  { %v2889_v6 = vpop.permute.xlu1 %2888 }
 0x2eb   :  { %v7149_v18 = vmul.f32 %v2889_v6, %v2754_v5  ;;  %v7151_v39 = vmul.f32 %v2889_v6, %v2755_v38  ;;  %v7814_v38 = vld [vmem:[#allocation47_spill] sm:$0xff]  ;;  %v2536_v6 = vmul.f32 %v2479_v60, %v7815_v55 }
 0x2ec   :  { %v2535_v0 = vmul.f32 %v2479_v60, %v7814_v38 }
 0x2ed   :  { %v2834_v43 = vpop.permute.xlu0 %2833  ;;  %v3104_v46 = vmul.f32 %v7149_v18, %v7149_v18  ;;  %v3105_v33 = vmul.f32 %v7151_v39, %v7151_v39 }
 0x2ee   :  { %v7157_v35 = vmul.f32 %v2834_v43, %v2732_v8  ;;  %v7159_v57 = vmul.f32 %v2834_v43, %v2733_v24  ;;  %v7161_v52 = vpop.permute.xlu1 %2413  ;;  %v2680_v24 = vmul.f32 %v7023_v10, %v7780_v47  ;;  %v2681_v43 = vmul.f32 %v7023_v10, %v7781_v37  ;;  %v7820_v10 = vld [vmem:[#allocation50_spill] sm:$0xff] }
 0x2ef   :  { %v3173_v29 = vadd.f32 %v3105_v33, %v3104_v46  ;;  %v2760_v46 = vadd.f32 %v2710_v15, %v2535_v0  ;;  %v2761_v33 = vadd.f32 %v2711_v54, %v2536_v6  ;;  %v7821_v15 = vld [vmem:[#allocation53_spill] sm:$0xff] }
 0x2f0   :  { %7810 = vst [vmem:[#allocation71_spill] sm:$0xff] %v7157_v35  ;;  %7811 = vst [vmem:[#allocation72_spill] sm:$0xff] %v7159_v57  ;;  %v3082_v23 = vmul.f32 %v7157_v35, %v7157_v35  ;;  %v3083_v50 = vmul.f32 %v7159_v57, %v7159_v57  ;;  %v2730_v57 = vadd.f32 %v2680_v24, %v2505_v62 }
 0x2f1   :  { %v2489_v5 = vpop.permute.xlu0 %2488  ;;  %3174 = vadd.xlane.f32.xlu1 %v3173_v29  ;;  %v2731_v30 = vadd.f32 %v2681_v43, %v2506_v3  ;;  %v2512_v54 = vmul.f32 %v2419_v13, %v7821_v15 }
 0x2f2   :  { %v3140_v8 = vadd.f32 %v3083_v50, %v3082_v23  ;;  %v2594_v2 = vpop.permute.xlu1 %2593 }
 0x2f3   :  { %v2686_v60 = vmul.f32 %v2594_v2, %v7780_v47  ;;  %v2687_v23 = vmul.f32 %v2594_v2, %v7781_v37 }
 0x2f4   :  { %3141 = vadd.xlane.f32.xlu0 %v3140_v8  ;;  %v2511_v8 = vmul.f32 %v2419_v13, %v7820_v10  ;;  %v7822_v13 = vld [vmem:[#allocation43_spill] sm:$0xff] }
 0x2f5   :  { %v2904_v11 = vpop.permute.xlu0 %2903  ;;  %v2737_v43 = vadd.f32 %v2687_v23, %v2512_v54  ;;  %v2709_v23 = vmul.f32 %v7057_v25, %v7781_v37 }
 0x2f6   :  { %v7179_v56 = vmul.f32 %v2904_v11, %v2760_v46  ;;  %v7181_v29 = vmul.f32 %v2904_v11, %v2761_v33  ;;  %v2829_v50 = vpop.permute.xlu1 %2828  ;;  %v2736_v24 = vadd.f32 %v2686_v60, %v2511_v8  ;;  %v2533_v11 = vmul.f32 %v7129_v7, %v7822_v13 }
 0x2f7   :  { %v7185_v38 = vmul.f32 %v2829_v50, %v2730_v57  ;;  %v7187_v55 = vmul.f32 %v2829_v50, %v2731_v30  ;;  %v7823_v30 = vld [vmem:[#allocation44_spill] sm:$0xff]  ;;  %v2708_v60 = vmul.f32 %v7057_v25, %v7780_v47 }
 0x2f8   :  { %7816 = vst [vmem:[#allocation81_spill] sm:$0xff] %v7179_v56  ;;  %7817 = vst [vmem:[#allocation82_spill] sm:$0xff] %v7181_v29  ;;  %v3110_v62 = vmul.f32 %v7179_v56, %v7179_v56  ;;  %v3111_v3 = vmul.f32 %v7181_v29, %v7181_v29  ;;  %v2534_v50 = vmul.f32 %v7129_v7, %v7823_v30  ;;  %v7828_v30 = vld [vmem:[#allocation55_spill] sm:$0xff] }
 0x2f9   :  { %7818 = vst [vmem:[#allocation73_spill] sm:$0xff] %v7185_v38  ;;  %7819 = vst [vmem:[#allocation75_spill] sm:$0xff] %v7187_v55  ;;  %v2429_v0 = vpop.permute.xlu0 %2428  ;;  %v3080_v6 = vmul.f32 %v7185_v38, %v7185_v38  ;;  %v3081_v57 = vmul.f32 %v7187_v55, %v7187_v55  ;;  %v2758_v7 = vadd.f32 %v2708_v60, %v2533_v11 }
 0x2fa   :  { %v3182_v2 = vadd.f32 %v3111_v3, %v3110_v62  ;;  %v2484_v46 = vpop.permute.xlu1 %2483  ;;  %v2759_v62 = vadd.f32 %v2709_v23, %v2534_v50  ;;  %v2539_v50 = vmul.f32 %v2489_v5, %v7828_v30  ;;  %v7832_v30 = vld [vmem:[#allocation58_spill] sm:$0xff] }
 0x2fb   :  { %v3137_v33 = vadd.f32 %v3081_v57, %v3080_v6 }
 0x2fc   :  { %3183 = vadd.xlane.f32.xlu0 %v3182_v2 }
 0x2fd   :  { %v2844_v10 = vpop.permute.xlu0 %2843  ;;  %3138 = vadd.xlane.f32.xlu1 %v3137_v33 }
 0x2fe   :  { %v7203_v15 = vmul.f32 %v2844_v10, %v2736_v24  ;;  %v7205_v38 = vmul.f32 %v2844_v10, %v2737_v43  ;;  %v2664_v29 = vpop.permute.xlu1 %2663  ;;  %v7829_v10 = vld [vmem:[#allocation56_spill] sm:$0xff] }
 0x2ff   :  { %v2714_v43 = vmul.f32 %v2664_v29, %v7780_v47  ;;  %v2715_v33 = vmul.f32 %v2664_v29, %v7781_v37  ;;  %v2540_v60 = vmul.f32 %v2489_v5, %v7829_v10  ;;  %v2685_v29 = vmul.f32 %v7081_v1, %v7781_v37  ;;  %v7833_v5 = vld [vmem:[#allocation59_spill] sm:$0xff] }
 0x300   :  { %7824 = vst [vmem:[#allocation86_spill] sm:$0xff] %v7203_v15  ;;  %7825 = vst [vmem:[#allocation87_spill] sm:$0xff] %v7205_v38  ;;  %v3086_v8 = vmul.f32 %v7203_v15, %v7203_v15  ;;  %v3087_v54 = vmul.f32 %v7205_v38, %v7205_v38  ;;  %v2516_v10 = vmul.f32 %v2429_v0, %v7833_v5  ;;  %v7834_v38 = vld [vmem:[#allocation54_spill] sm:$0xff] }
 0x301   :  { %v2914_v23 = vpop.permute.xlu0 %2913 }
 0x302   :  { %v3146_v3 = vadd.f32 %v3087_v54, %v3086_v8  ;;  %v2899_v6 = vpop.permute.xlu1 %2898  ;;  %v7830_v8 = vld [vmem:[#allocation46_spill] sm:$0xff] }
 0x303   :  { %v7215_v57 = vmul.f32 %v2899_v6, %v2758_v7  ;;  %v7217_v2 = vmul.f32 %v2899_v6, %v2759_v62  ;;  %v2509_v54 = vmul.f32 %v7161_v52, %v7830_v8  ;;  %v7831_v7 = vld [vmem:[#allocation49_spill] sm:$0xff]  ;;  %v2764_v6 = vadd.f32 %v2714_v43, %v2539_v50 }
 0x304   :  { %3147 = vadd.xlane.f32.xlu0 %v3146_v3  ;;  %v2510_v62 = vmul.f32 %v7161_v52, %v7831_v7  ;;  %v2684_v3 = vmul.f32 %v7081_v1, %v7780_v47  ;;  %v2688_v1 = vmul.f32 %v7145_v63, %v7780_v47  ;;  %v2689_v43 = vmul.f32 %v7145_v63, %v7781_v37 }
 0x305   :  { %7826 = vst [vmem:[#allocation89_spill] sm:$0xff] %v7215_v57  ;;  %7827 = vst [vmem:[#allocation90_spill] sm:$0xff] %v7217_v2  ;;  %v3108_v24 = vmul.f32 %v7215_v57, %v7215_v57  ;;  %v3109_v25 = vmul.f32 %v7217_v2, %v7217_v2  ;;  %v2515_v2 = vmul.f32 %v2429_v0, %v7832_v30  ;;  %v2854_v50 = vpop.permute.xlu0 %2853 }
 0x306   :  { %v2424_v13 = vpop.permute.xlu1 %2423  ;;  %v2734_v56 = vadd.f32 %v2684_v3, %v2509_v54  ;;  %v2735_v35 = vadd.f32 %v2685_v29, %v2510_v62  ;;  %v7837_v62 = vld [vmem:[#allocation52_spill] sm:$0xff] }
 0x307   :  { %v3179_v11 = vadd.f32 %v3109_v25, %v3108_v24  ;;  %v2765_v24 = vadd.f32 %v2715_v33, %v2540_v60  ;;  %v2513_v52 = vmul.f32 %v2424_v13, %v7834_v38  ;;  %v7245_v33 = vmul.f32 %v2914_v23, %v2764_v6 }
 0x308   :  { %v2538_v3 = vmul.f32 %v2484_v46, %v7837_v62 }
 0x309   :  { %3180 = vadd.xlane.f32.xlu1 %v3179_v11  ;;  %v7835_v11 = vld [vmem:[#allocation57_spill] sm:$0xff]  ;;  %v7247_v0 = vmul.f32 %v2914_v23, %v2765_v24  ;;  %v2738_v29 = vadd.f32 %v2688_v1, %v2513_v52  ;;  %v3114_v24 = vmul.f32 %v7245_v33, %v7245_v33 }
 0x30a   :  { %v2604_v25 = vpop.permute.xlu1 %2603  ;;  %v2514_v7 = vmul.f32 %v2424_v13, %v7835_v11  ;;  %v7836_v13 = vld [vmem:[#allocation51_spill] sm:$0xff] }
 0x30b   :  { %v2690_v57 = vmul.f32 %v2604_v25, %v7780_v47  ;;  %v2691_v8 = vmul.f32 %v2604_v25, %v7781_v37  ;;  %v2537_v54 = vmul.f32 %v2484_v46, %v7836_v13  ;;  %v2713_v46 = vmul.f32 %v7115_v12, %v7781_v37 }
 0x30c   :  { %v2739_v63 = vadd.f32 %v2689_v43, %v2514_v7  ;;  %v3115_v30 = vmul.f32 %v7247_v0, %v7247_v0 }
 0x30d   :  { %v2740_v15 = vadd.f32 %v2690_v57, %v2515_v2  ;;  %v2741_v55 = vadd.f32 %v2691_v8, %v2516_v10 }
 0x30e   :  { %v2839_v60 = vpop.permute.xlu1 %2838 }
 0x30f   :  { %v7249_v25 = vmul.f32 %v2854_v50, %v2740_v15  ;;  %v7251_v38 = vmul.f32 %v2854_v50, %v2741_v55  ;;  %v7253_v57 = vmul.f32 %v2839_v60, %v2734_v56  ;;  %v7255_v2 = vmul.f32 %v2839_v60, %v2735_v35 }
 0x310   :  { %v2712_v35 = vmul.f32 %v7115_v12, %v7780_v47  ;;  %v2763_v12 = vadd.f32 %v2713_v46, %v2538_v3  ;;  %v3188_v60 = vadd.f32 %v3115_v30, %v3114_v24 }
 0x311   :  { %v3084_v23 = vmul.f32 %v7253_v57, %v7253_v57  ;;  %v3085_v6 = vmul.f32 %v7255_v2, %v7255_v2  ;;  %v3090_v55 = vmul.f32 %v7249_v25, %v7249_v25  ;;  %v3091_v56 = vmul.f32 %v7251_v38, %v7251_v38 }
 0x312   :  { %v2849_v15 = vpop.permute.xlu1 %2848  ;;  %v2762_v11 = vadd.f32 %v2712_v35, %v2537_v54 }
 0x313   :  { %v7275_v5 = vmul.f32 %v2849_v15, %v2738_v29  ;;  %v7277_v10 = vmul.f32 %v2849_v15, %v2739_v63  ;;  %v3143_v8 = vadd.f32 %v3085_v6, %v3084_v23  ;;  %v3152_v52 = vadd.f32 %v3091_v56, %v3090_v55 }
 0x315   :  { %v3088_v47 = vmul.f32 %v7275_v5, %v7275_v5  ;;  %v3089_v37 = vmul.f32 %v7277_v10, %v7277_v10  ;;  %3144 = vadd.xlane.f32.xlu1 %v3143_v8  ;;  %3153 = vadd.xlane.f32.xlu0 %v3152_v52 }
 0x316   :  { %v2909_v7 = vpop.permute.xlu1 %2908 }
 0x317   :  { %v7283_v1 = vmul.f32 %v2909_v7, %v2762_v11  ;;  %v7285_v43 = vmul.f32 %v2909_v7, %v2763_v12  ;;  %v3149_v50 = vadd.f32 %v3089_v37, %v3088_v47 }
 0x319   :  { %v3112_v13 = vmul.f32 %v7283_v1, %v7283_v1  ;;  %v3113_v54 = vmul.f32 %v7285_v43, %v7285_v43  ;;  %3150 = vadd.xlane.f32.xlu1 %v3149_v50  ;;  %3189 = vadd.xlane.f32.xlu0 %v3188_v60 }
 0x31b   :  { %v3185_v62 = vadd.f32 %v3113_v54, %v3112_v13 }
 0x31d   :  { %3186 = vadd.xlane.f32.xlu1 %v3185_v62 }
 0x336   :  { %v3121_v29 = vpop.xlane.xlu0 %3120 }
 0x337   :  { %4120 = vrsqrt.f32 %v3121_v29  ;;  %vm3200_vm8 = vcmp.eq.f32.partialorder %v3121_v29, inf  ;;  %v3203_v55 = vand.u32 2147483648, %v3121_v29  ;;  %vm3202_vm9 = vcmp.eq.f32.partialorder %v3121_v29, 0.0 }
 0x33a   :  { %v3160_v3 = vpop.xlane.xlu0 %3159 }
 0x33b   :  { %4122 = vrsqrt.f32 %v3160_v3  ;;  %vm3291_vm10 = vcmp.eq.f32.partialorder %v3160_v3, inf  ;;  %v3294_v30 = vand.u32 2147483648, %v3160_v3  ;;  %vm3293_vm11 = vcmp.eq.f32.partialorder %v3160_v3, 0.0 }
 0x341   :  { %v4121_v63 = vpop.eup %4120  ;;  %v3124_v23 = vpop.xlane.xlu0 %3123 }
 0x342   :  { %v3199_v6 = vmul.f32 %v4121_v63, %v3121_v29  ;;  %4124 = vrsqrt.f32 %v3124_v23  ;;  %vm3207_vm12 = vcmp.eq.f32.partialorder %v3124_v23, inf  ;;  %v3210_v60 = vand.u32 2147483648, %v3124_v23 }
 0x343   :  { %vm3209_vm13 = vcmp.eq.f32.partialorder %v3124_v23, 0.0 }
 0x344   :  { %v3201_v56 = vsel %vm3200_vm8, %v3121_v29, %v3199_v6 }
 0x345   :  { %v4123_v35 = vpop.eup %4122  ;;  %v3204_v46 = vsel %vm3202_vm9, %v3203_v55, %v3201_v56 }
 0x346   :  { %v3367_v15 = vmax.f32 %v3204_v46, 1e-15  ;;  %v3290_v24 = vmul.f32 %v4123_v35, %v3160_v3 }
 0x348   :  { %4126 = vrcp.f32 %v3367_v15  ;;  %v3292_v8 = vsel %vm3291_vm10, %v3160_v3, %v3290_v24  ;;  %v3118_v52 = vpop.xlane.xlu1 %3117  ;;  %vm3392_vm14 = vcmp.gt.f32.partialorder %v3367_v15, 0.996 }
 0x349   :  { %v3295_v11 = vsel %vm3293_vm11, %v3294_v30, %v3292_v8  ;;  %4128 = vrsqrt.f32 %v3118_v52  ;;  %vm3193_vm15 = vcmp.eq.f32.partialorder %v3118_v52, inf  ;;  %vm3195_vm0 = vcmp.eq.f32.partialorder %v3118_v52, 0.0 }
 0x34a   :  { %v3380_v47 = vmax.f32 %v3295_v11, 1e-15  ;;  %v3196_v46 = vand.u32 2147483648, %v3118_v52 }
 0x34c   :  { %v4125_v37 = vpop.eup %4124  ;;  %4130 = vrcp.f32 %v3380_v47  ;;  %v3157_v12 = vpop.xlane.xlu1 %3156  ;;  %vm3405_vm1 = vcmp.gt.f32.partialorder %v3380_v47, 0.996 }
 0x34d   :  { %v3206_v7 = vmul.f32 %v4125_v37, %v3124_v23  ;;  %v3166_v50 = vpop.xlane.xlu0 %3165  ;;  %4132 = vrsqrt.f32 %v3157_v12  ;;  %vm3284_vm2 = vcmp.eq.f32.partialorder %v3157_v12, inf  ;;  %vm3286_vm5 = vcmp.eq.f32.partialorder %v3157_v12, 0.0 }
 0x34e   :  { %4134 = vrsqrt.f32 %v3166_v50  ;;  %vm3305_vm3 = vcmp.eq.f32.partialorder %v3166_v50, inf  ;;  %vm3307_vm4 = vcmp.eq.f32.partialorder %v3166_v50, 0.0 }
 0x34f   :  { %v3208_v13 = vsel %vm3207_vm12, %v3124_v23, %v3206_v7 }
 0x350   :  { %v3211_v54 = vsel %vm3209_vm13, %v3210_v60, %v3208_v13  ;;  %v3163_v62 = vpop.xlane.xlu1 %3162 }
 0x351   :  { %v3368_v29 = vmax.f32 %v3211_v54, 1e-15  ;;  %4136 = vrsqrt.f32 %v3163_v62  ;;  %vm3298_vm6 = vcmp.eq.f32.partialorder %v3163_v62, inf  ;;  %vm3300_vm8 = vcmp.eq.f32.partialorder %v3163_v62, 0.0 }
 0x352   :  { %v4127_v3 = vpop.eup %4126 }
 0x353   :  { %v4129_v63 = vpop.eup %4128  ;;  %v3419_v6 = vmul.f32 0.996, %v4127_v3  ;;  %4138 = vrcp.f32 %v3368_v29  ;;  %vm3393_vm7 = vcmp.gt.f32.partialorder %v3368_v29, 0.996 }
 0x354   :  { %v3192_v55 = vmul.f32 %v4129_v63, %v3118_v52  ;;  %v7291_v56 = vpop.xlane.xlu1 %3126 }
 0x355   :  { %v3467_v35 = vsel %vm3392_vm14, %v3419_v6, 1.0  ;;  %v7293_v24 = vpop.xlane.xlu0 %3129  ;;  %4140 = vrsqrt.f32 %v7291_v56  ;;  %v3287_v6 = vand.u32 2147483648, %v3157_v12  ;;  %vm3214_vm9 = vcmp.eq.f32.partialorder %v7291_v56, inf }
 0x356   :  { %v4131_v23 = vpop.eup %4130  ;;  %v3493_v30 = vmul.f32 %v3467_v35, %v6905_v48  ;;  %v3494_v8 = vmul.f32 %v3467_v35, %v6907_v21  ;;  %v3194_v11 = vsel %vm3193_vm15, %v3118_v52, %v3192_v55  ;;  %4142 = vrsqrt.f32 %v7293_v24 }
 0x357   :  { %v4133_v15 = vpop.eup %4132  ;;  %v3445_v37 = vmul.f32 0.996, %v4131_v23  ;;  %v7299_v7 = vsel %vm3195_vm0, %v3196_v46, %v3194_v11  ;;  %v3308_v48 = vand.u32 2147483648, %v3166_v50  ;;  %vm3216_vm10 = vcmp.eq.f32.partialorder %v7291_v56, 0.0 }
 0x358   :  { %v4135_v60 = vpop.eup %4134  ;;  %3543 = vst [vmem:[#allocation5 + $0x10] sm:$0xff] %v3493_v30  ;;  %3544 = vst [vmem:[#allocation5 + $0x18] sm:$0xff] %v3494_v8  ;;  %v3366_v13 = vmax.f32 %v7299_v7, 1e-15  ;;  %v3283_v54 = vmul.f32 %v4133_v15, %v3157_v12  ;;  %vm3221_vm11 = vcmp.eq.f32.partialorder %v7293_v24, inf  ;;  %vm3223_vm12 = vcmp.eq.f32.partialorder %v7293_v24, 0.0 }
 0x359   :  { %v3480_v3 = vsel %vm3405_vm1, %v3445_v37, 1.0  ;;  %v3304_v63 = vmul.f32 %v4135_v60, %v3166_v50  ;;  %v3301_v37 = vand.u32 2147483648, %v3163_v62 }
 0x35a   :  { %v3519_v21 = vmul.f32 %v3480_v3, %v6901_v28  ;;  %v3520_v52 = vmul.f32 %v3480_v3, %v6903_v9  ;;  %4144 = vrcp.f32 %v3366_v13  ;;  %v3285_v46 = vsel %vm3284_vm2, %v3157_v12, %v3283_v54 }
 0x35b   :  { %v4137_v55 = vpop.eup %4136  ;;  %v3306_v35 = vsel %vm3305_vm3, %v3166_v50, %v3304_v63  ;;  %v3288_v23 = vsel %vm3286_vm5, %v3287_v6, %v3285_v46  ;;  %vm3391_vm13 = vcmp.gt.f32.partialorder %v3366_v13, 0.996 }
 0x35c   :  { %3569 = vst [vmem:[#allocation5 + $0xe0] sm:$0xff] %v3519_v21  ;;  %3570 = vst [vmem:[#allocation5 + $0xe8] sm:$0xff] %v3520_v52  ;;  %v3309_v47 = vsel %vm3307_vm4, %v3308_v48, %v3306_v35  ;;  %v3297_v30 = vmul.f32 %v4137_v55, %v3163_v62  ;;  %v3379_v15 = vmax.f32 %v3288_v23, 1e-15  ;;  %v3224_v52 = vand.u32 2147483648, %v7293_v24 }
 0x35d   :  { %v4139_v8 = vpop.eup %4138  ;;  %v3382_v11 = vmax.f32 %v3309_v47, 1e-15 }
 0x35e   :  { %v3421_v28 = vmul.f32 0.996, %v4139_v8  ;;  %v3299_v9 = vsel %vm3298_vm6, %v3163_v62, %v3297_v30  ;;  %v3217_v62 = vand.u32 2147483648, %v7291_v56  ;;  %vm3404_vm15 = vcmp.gt.f32.partialorder %v3379_v15, 0.996 }
 0x35f   :  { %v4141_v7 = vpop.eup %4140  ;;  %4146 = vrcp.f32 %v3382_v11  ;;  %v3302_v60 = vsel %vm3300_vm8, %v3301_v37, %v3299_v9  ;;  %vm3407_vm14 = vcmp.gt.f32.partialorder %v3382_v11, 0.996 }
 0x360   :  { %v4143_v12 = vpop.eup %4142  ;;  %v3468_v50 = vsel %vm3393_vm7, %v3421_v28, 1.0  ;;  %4148 = vrcp.f32 %v3379_v15  ;;  %v3381_v54 = vmax.f32 %v3302_v60, 1e-15  ;;  %v3213_v3 = vmul.f32 %v4141_v7, %v7291_v56 }
 0x361   :  { %v3495_v63 = vmul.f32 %v3468_v50, %v6939_v14  ;;  %v3496_v29 = vmul.f32 %v3468_v50, %v6941_v26  ;;  %v3220_v48 = vmul.f32 %v4143_v12, %v7293_v24  ;;  %v7311_v21 = vpop.xlane.xlu0 %3171 }
 0x362   :  { %4150 = vrcp.f32 %v3381_v54  ;;  %v3215_v6 = vsel %vm3214_vm9, %v7291_v56, %v3213_v3  ;;  %v7316_v55 = vpop.xlane.xlu1 %3168  ;;  %vm7329_vm0 = vcmp.gt.f32.partialorder %v3381_v54, 0.996  ;;  %vm3319_vm1 = vcmp.eq.f32.partialorder %v7311_v21, inf }
 0x363   :  { %3545 = vst [vmem:[#allocation5 + $0x20] sm:$0xff] %v3495_v63  ;;  %3546 = vst [vmem:[#allocation5 + $0x28] sm:$0xff] %v3496_v29  ;;  %v3222_v14 = vsel %vm3221_vm11, %v7293_v24, %v3220_v48  ;;  %v3218_v26 = vsel %vm3216_vm10, %v3217_v62, %v3215_v6  ;;  %4152 = vrsqrt.f32 %v7311_v21  ;;  %vm3321_vm2 = vcmp.eq.f32.partialorder %v7311_v21, 0.0 }
 0x364   :  { %v4145_v35 = vpop.eup %4144  ;;  %v3225_v46 = vsel %vm3223_vm12, %v3224_v52, %v3222_v14  ;;  %v3369_v47 = vmax.f32 %v3218_v26, 1e-15  ;;  %4154 = vrsqrt.f32 %v7316_v55  ;;  %v3322_v62 = vand.u32 2147483648, %v7311_v21 }
 0x365   :  { %v3417_v23 = vmul.f32 0.996, %v4145_v35  ;;  %v3370_v30 = vmax.f32 %v3225_v46, 1e-15  ;;  %vm3312_vm3 = vcmp.eq.f32.partialorder %v7316_v55, inf  ;;  %v3315_v26 = vand.u32 2147483648, %v7316_v55 }
 0x366   :  { %4156 = vrcp.f32 %v3369_v47  ;;  %vm3314_vm4 = vcmp.eq.f32.partialorder %v7316_v55, 0.0  ;;  %vm3394_vm5 = vcmp.gt.f32.partialorder %v3369_v47, 0.996 }
 0x367   :  { %v3466_v8 = vsel %vm3391_vm13, %v3417_v23, 1.0  ;;  %4158 = vrcp.f32 %v3370_v30  ;;  %vm3395_vm6 = vcmp.gt.f32.partialorder %v3370_v30, 0.996 }
 0x368   :  { %v3491_v37 = vmul.f32 %v3466_v8, %v6949_v44  ;;  %v3492_v24 = vmul.f32 %v3466_v8, %v6951_v22 }
 0x369   :  { %v4147_v28 = vpop.eup %4146  ;;  %v7326_v56 = vpop.xlane.xlu0 %3135 }
 0x36a   :  { %v4149_v9 = vpop.eup %4148  ;;  %v3449_v7 = vmul.f32 0.996, %v4147_v28  ;;  %3541 = vst [vmem:[#allocation5] sm:$0xff] %v3491_v37  ;;  %3542 = vst [vmem:[#allocation5 + $0x8] sm:$0xff] %v3492_v24  ;;  %4160 = vrsqrt.f32 %v7326_v56  ;;  %vm3235_vm7 = vcmp.eq.f32.partialorder %v7326_v56, inf  ;;  %v3238_v30 = vand.u32 2147483648, %v7326_v56 }
 0x36b   :  { %v3443_v60 = vmul.f32 0.996, %v4149_v9  ;;  %vm3237_vm8 = vcmp.eq.f32.partialorder %v7326_v56, 0.0 }
 0x36c   :  { %v4151_v13 = vpop.eup %4150  ;;  %v3482_v12 = vsel %vm3407_vm14, %v3449_v7, 1.0 }
 0x36d   :  { %v4153_v44 = vpop.eup %4152  ;;  %v3523_v22 = vmul.f32 %v3482_v12, %v7001_v41  ;;  %v3524_v3 = vmul.f32 %v3482_v12, %v7003_v51  ;;  %v3479_v63 = vsel %vm3404_vm15, %v3443_v60, 1.0  ;;  %v3447_v29 = vmul.f32 0.996, %v4151_v13 }
 0x36e   :  { %v4155_v11 = vpop.eup %4154  ;;  %v3517_v15 = vmul.f32 %v3479_v63, %v6964_v19  ;;  %v3518_v48 = vmul.f32 %v3479_v63, %v6967_v45  ;;  %v3318_v54 = vmul.f32 %v4153_v44, %v7311_v21  ;;  %v3133_v52 = vpop.xlane.xlu1 %3132 }
 0x36f   :  { %3573 = vst [vmem:[#allocation5 + $0x100] sm:$0xff] %v3523_v22  ;;  %3574 = vst [vmem:[#allocation5 + $0x108] sm:$0xff] %v3524_v3  ;;  %v3481_v6 = vsel %vm7329_vm0, %v3447_v29, 1.0  ;;  %v3311_v41 = vmul.f32 %v4155_v11, %v7316_v55  ;;  %4162 = vrsqrt.f32 %v3133_v52  ;;  %vm3228_vm9 = vcmp.eq.f32.partialorder %v3133_v52, inf }
 0x370   :  { %v4157_v51 = vpop.eup %4156  ;;  %3567 = vst [vmem:[#allocation5 + $0xd0] sm:$0xff] %v3517_v15  ;;  %3568 = vst [vmem:[#allocation5 + $0xd8] sm:$0xff] %v3518_v48  ;;  %v3521_v19 = vmul.f32 %v3481_v6, %v6997_v61  ;;  %v3522_v45 = vmul.f32 %v3481_v6, %v6999_v16  ;;  %v3320_v14 = vsel %vm3319_vm1, %v7311_v21, %v3318_v54  ;;  %v3231_v44 = vand.u32 2147483648, %v3133_v52 }
 0x371   :  { %v4159_v35 = vpop.eup %4158  ;;  %v3423_v46 = vmul.f32 0.996, %v4157_v51  ;;  %v3323_v23 = vsel %vm3321_vm2, %v3322_v62, %v3320_v14  ;;  %v3313_v8 = vsel %vm3312_vm3, %v7316_v55, %v3311_v41  ;;  %vm3230_vm10 = vcmp.eq.f32.partialorder %v3133_v52, 0.0 }
 0x372   :  { %v3425_v37 = vmul.f32 0.996, %v4159_v35  ;;  %3571 = vst [vmem:[#allocation5 + $0xf0] sm:$0xff] %v3521_v19  ;;  %3572 = vst [vmem:[#allocation5 + $0xf8] sm:$0xff] %v3522_v45  ;;  %v3384_v61 = vmax.f32 %v3323_v23, 1e-15  ;;  %v3316_v16 = vsel %vm3314_vm4, %v3315_v26, %v3313_v8 }
 0x373   :  { %v3469_v24 = vsel %vm3394_vm5, %v3423_v46, 1.0  ;;  %v3383_v28 = vmax.f32 %v3316_v16, 1e-15 }
 0x374   :  { %v4161_v9 = vpop.eup %4160  ;;  %v3470_v7 = vsel %vm3395_vm6, %v3425_v37, 1.0  ;;  %v3497_v60 = vmul.f32 %v3469_v24, %v7029_v53  ;;  %v3498_v21 = vmul.f32 %v3469_v24, %v7031_v4  ;;  %4164 = vrcp.f32 %v3384_v61 }
 0x375   :  { %v3499_v13 = vmul.f32 %v3470_v7, %v7037_v42  ;;  %v3500_v12 = vmul.f32 %v3470_v7, %v7039_v32  ;;  %v3178_v55 = vpop.xlane.xlu0 %3177  ;;  %4166 = vrcp.f32 %v3383_v28  ;;  %v3234_v47 = vmul.f32 %v4161_v9, %v7326_v56 }
 0x376   :  { %3547 = vst [vmem:[#allocation5 + $0x30] sm:$0xff] %v3497_v60  ;;  %3548 = vst [vmem:[#allocation5 + $0x38] sm:$0xff] %v3498_v21  ;;  %4168 = vrsqrt.f32 %v3178_v55  ;;  %vm3409_vm11 = vcmp.gt.f32.partialorder %v3384_v61, 0.996  ;;  %vm3408_vm12 = vcmp.gt.f32.partialorder %v3383_v28, 0.996 }
 0x377   :  { %3549 = vst [vmem:[#allocation5 + $0x40] sm:$0xff] %v3499_v13  ;;  %3550 = vst [vmem:[#allocation5 + $0x48] sm:$0xff] %v3500_v12  ;;  %v3236_v53 = vsel %vm3235_vm7, %v7326_v56, %v3234_v47  ;;  %vm3333_vm13 = vcmp.eq.f32.partialorder %v3178_v55, inf  ;;  %v3336_v45 = vand.u32 2147483648, %v3178_v55  ;;  %vm3335_vm14 = vcmp.eq.f32.partialorder %v3178_v55, 0.0 }
 0x378   :  { %v3239_v42 = vsel %vm3237_vm8, %v3238_v30, %v3236_v53 }
 0x379   :  { %v4163_v4 = vpop.eup %4162  ;;  %v3372_v32 = vmax.f32 %v3239_v42, 1e-15 }
 0x37a   :  { %v3227_v50 = vmul.f32 %v4163_v4, %v3133_v52 }
 0x37b   :  { %4170 = vrcp.f32 %v3372_v32  ;;  %vm3397_vm15 = vcmp.gt.f32.partialorder %v3372_v32, 0.996 }
 0x37c   :  { %v3229_v22 = vsel %vm3228_vm9, %v3133_v52, %v3227_v50 }
 0x37d   :  { %v3232_v3 = vsel %vm3230_vm10, %v3231_v44, %v3229_v22 }
 0x37e   :  { %v3371_v63 = vmax.f32 %v3232_v3, 1e-15  ;;  %v3175_v29 = vpop.xlane.xlu1 %3174  ;;  %v4165_v11 = vpop.eup %4164 }
 0x37f   :  { %4172 = vrsqrt.f32 %v3175_v29  ;;  %v4167_v15 = vpop.eup %4166  ;;  %v3453_v48 = vmul.f32 0.996, %v4165_v11  ;;  %vm3326_vm0 = vcmp.eq.f32.partialorder %v3175_v29, inf  ;;  %v3329_v7 = vand.u32 2147483648, %v3175_v29 }
 0x380   :  { %4174 = vrcp.f32 %v3371_v63  ;;  %v4169_v54 = vpop.eup %4168  ;;  %v3451_v56 = vmul.f32 0.996, %v4167_v15  ;;  %vm3396_vm1 = vcmp.gt.f32.partialorder %v3371_v63, 0.996  ;;  %vm3328_vm2 = vcmp.eq.f32.partialorder %v3175_v29, 0.0 }
 0x381   :  { %v3142_v62 = vpop.xlane.xlu0 %3141  ;;  %v3484_v6 = vsel %vm3409_vm11, %v3453_v48, 1.0  ;;  %v3332_v41 = vmul.f32 %v4169_v54, %v3178_v55 }
 0x382   :  { %4176 = vrsqrt.f32 %v3142_v62  ;;  %v3527_v51 = vmul.f32 %v3484_v6, %v7067_v49  ;;  %v3528_v52 = vmul.f32 %v3484_v6, %v7069_v31  ;;  %v3483_v19 = vsel %vm3408_vm12, %v3451_v56, 1.0 }
 0x383   :  { %v3525_v14 = vmul.f32 %v3483_v19, %v7071_v58  ;;  %v3526_v26 = vmul.f32 %v3483_v19, %v7073_v36  ;;  %v3334_v35 = vsel %vm3333_vm13, %v3178_v55, %v3332_v41  ;;  %vm3249_vm3 = vcmp.eq.f32.partialorder %v3142_v62, inf }
 0x384   :  { %3577 = vst [vmem:[#allocation5 + $0x120] sm:$0xff] %v3527_v51  ;;  %3578 = vst [vmem:[#allocation5 + $0x128] sm:$0xff] %v3528_v52  ;;  %v3337_v46 = vsel %vm3335_vm14, %v3336_v45, %v3334_v35  ;;  %v3252_v47 = vand.u32 2147483648, %v3142_v62  ;;  %vm3251_vm4 = vcmp.eq.f32.partialorder %v3142_v62, 0.0 }
 0x385   :  { %v4171_v23 = vpop.eup %4170  ;;  %3575 = vst [vmem:[#allocation5 + $0x110] sm:$0xff] %v3525_v14  ;;  %3576 = vst [vmem:[#allocation5 + $0x118] sm:$0xff] %v3526_v26  ;;  %v3386_v8 = vmax.f32 %v3337_v46, 1e-15 }
 0x386   :  { %v3429_v37 = vmul.f32 0.996, %v4171_v23 }
 0x387   :  { %4178 = vrcp.f32 %v3386_v8  ;;  %vm3411_vm5 = vcmp.gt.f32.partialorder %v3386_v8, 0.996 }
 0x388   :  { %v3472_v31 = vsel %vm3397_vm15, %v3429_v37, 1.0 }
 0x389   :  { %v4173_v49 = vpop.eup %4172  ;;  %v3184_v61 = vpop.xlane.xlu0 %3183  ;;  %v3503_v58 = vmul.f32 %v3472_v31, %v7097_v27  ;;  %v3504_v36 = vmul.f32 %v3472_v31, %v7099_v17 }
 0x38a   :  { %v4175_v16 = vpop.eup %4174  ;;  %v3325_v24 = vmul.f32 %v4173_v49, %v3175_v29  ;;  %4180 = vrsqrt.f32 %v3184_v61  ;;  %v3139_v28 = vpop.xlane.xlu1 %3138  ;;  %vm3347_vm6 = vcmp.eq.f32.partialorder %v3184_v61, inf  ;;  %v3350_v11 = vand.u32 2147483648, %v3184_v61 }
 0x38b   :  { %v3427_v9 = vmul.f32 0.996, %v4175_v16  ;;  %3553 = vst [vmem:[#allocation5 + $0x60] sm:$0xff] %v3503_v58  ;;  %3554 = vst [vmem:[#allocation5 + $0x68] sm:$0xff] %v3504_v36  ;;  %4182 = vrsqrt.f32 %v3139_v28  ;;  %vm3349_vm7 = vcmp.eq.f32.partialorder %v3184_v61, 0.0  ;;  %vm3242_vm8 = vcmp.eq.f32.partialorder %v3139_v28, inf }
 0x38c   :  { %v4177_v60 = vpop.eup %4176  ;;  %v3327_v21 = vsel %vm3326_vm0, %v3175_v29, %v3325_v24  ;;  %vm3244_vm9 = vcmp.eq.f32.partialorder %v3139_v28, 0.0  ;;  %v7840_v16 = vld [vmem:[#allocation71_spill] sm:$0xff]  ;;  %v7841_v36 = vld [vmem:[#allocation72_spill] sm:$0xff] }
 0x38d   :  { %v3471_v13 = vsel %vm3396_vm1, %v3427_v9, 1.0  ;;  %v3248_v12 = vmul.f32 %v4177_v60, %v3142_v62  ;;  %v3330_v55 = vsel %vm3328_vm2, %v3329_v7, %v3327_v21 }
 0x38e   :  { %v3501_v27 = vmul.f32 %v3471_v13, %v7109_v20  ;;  %v3502_v17 = vmul.f32 %v3471_v13, %v7111_v59  ;;  %v3385_v30 = vmax.f32 %v3330_v55, 1e-15 }
 0x38f   :  { %v3250_v53 = vsel %vm3249_vm3, %v3142_v62, %v3248_v12  ;;  %v3245_v62 = vand.u32 2147483648, %v3139_v28 }
 0x390   :  { %3551 = vst [vmem:[#allocation5 + $0x50] sm:$0xff] %v3501_v27  ;;  %3552 = vst [vmem:[#allocation5 + $0x58] sm:$0xff] %v3502_v17  ;;  %v3253_v4 = vsel %vm3251_vm4, %v3252_v47, %v3250_v53  ;;  %4184 = vrcp.f32 %v3385_v30  ;;  %vm3410_vm10 = vcmp.gt.f32.partialorder %v3385_v30, 0.996 }
 0x391   :  { %v3374_v42 = vmax.f32 %v3253_v4, 1e-15  ;;  %v3148_v32 = vpop.xlane.xlu0 %3147  ;;  %v4179_v50 = vpop.eup %4178  ;;  %v7842_v4 = vld [vmem:[#allocation81_spill] sm:$0xff] }
 0x392   :  { %4186 = vrsqrt.f32 %v3148_v32  ;;  %v3457_v44 = vmul.f32 0.996, %v4179_v50  ;;  %vm3263_vm11 = vcmp.eq.f32.partialorder %v3148_v32, inf  ;;  %v3266_v8 = vand.u32 2147483648, %v3148_v32 }
 0x393   :  { %4188 = vrcp.f32 %v3374_v42  ;;  %vm3399_vm12 = vcmp.gt.f32.partialorder %v3374_v42, 0.996  ;;  %vm3265_vm13 = vcmp.eq.f32.partialorder %v3148_v32, 0.0 }
 0x394   :  { %v4181_v22 = vpop.eup %4180  ;;  %v3486_v3 = vsel %vm3411_vm5, %v3457_v44, 1.0 }
 0x395   :  { %v3346_v20 = vmul.f32 %v4181_v22, %v3184_v61  ;;  %v4183_v63 = vpop.eup %4182  ;;  %v3531_v59 = vmul.f32 %v3486_v3, %v7125_v34  ;;  %v3532_v29 = vmul.f32 %v3486_v3, %v7127_v40  ;;  %v7844_v3 = vld [vmem:[#allocation73_spill] sm:$0xff] }
 0x396   :  { %v3181_v15 = vpop.xlane.xlu1 %3180  ;;  %v3241_v54 = vmul.f32 %v4183_v63, %v3139_v28  ;;  %v7845_v63 = vld [vmem:[#allocation75_spill] sm:$0xff] }
 0x397   :  { %v3348_v48 = vsel %vm3347_vm6, %v3184_v61, %v3346_v20  ;;  %4190 = vrsqrt.f32 %v3181_v15  ;;  %3581 = vst [vmem:[#allocation5 + $0x140] sm:$0xff] %v3531_v59  ;;  %3582 = vst [vmem:[#allocation5 + $0x148] sm:$0xff] %v3532_v29  ;;  %vm3340_vm14 = vcmp.eq.f32.partialorder %v3181_v15, inf  ;;  %vm3342_vm15 = vcmp.eq.f32.partialorder %v3181_v15, 0.0 }
 0x398   :  { %v3351_v56 = vsel %vm3349_vm7, %v3350_v11, %v3348_v48  ;;  %v3243_v41 = vsel %vm3242_vm8, %v3139_v28, %v3241_v54 }
 0x399   :  { %v3388_v6 = vmax.f32 %v3351_v56, 1e-15  ;;  %v3246_v52 = vsel %vm3244_vm9, %v3245_v62, %v3243_v41 }
 0x39a   :  { %v4185_v51 = vpop.eup %4184  ;;  %v3373_v40 = vmax.f32 %v3246_v52, 1e-15  ;;  %v7846_v52 = vld [vmem:[#allocation86_spill] sm:$0xff] }
 0x39b   :  { %v3455_v34 = vmul.f32 0.996, %v4185_v51  ;;  %4192 = vrcp.f32 %v3388_v6  ;;  %vm3413_vm0 = vcmp.gt.f32.partialorder %v3388_v6, 0.996 }
 0x39c   :  { %v4187_v19 = vpop.eup %4186  ;;  %4194 = vrcp.f32 %v3373_v40  ;;  %vm3398_vm1 = vcmp.gt.f32.partialorder %v3373_v40, 0.996  ;;  %v7847_v40 = vld [vmem:[#allocation87_spill] sm:$0xff] }
 0x39d   :  { %v4189_v45 = vpop.eup %4188  ;;  %v3485_v14 = vsel %vm3410_vm10, %v3455_v34, 1.0  ;;  %v3262_v26 = vmul.f32 %v4187_v19, %v3148_v32 }
 0x39e   :  { %v3433_v35 = vmul.f32 0.996, %v4189_v45  ;;  %v3529_v46 = vmul.f32 %v3485_v14, %v7149_v18  ;;  %v3530_v23 = vmul.f32 %v3485_v14, %v7151_v39  ;;  %v3343_v18 = vand.u32 2147483648, %v3181_v15 }
 0x39f   :  { %v3264_v37 = vsel %vm3263_vm11, %v3148_v32, %v3262_v26  ;;  %v7843_v32 = vld [vmem:[#allocation82_spill] sm:$0xff] }
 0x3a0   :  { %v3474_v49 = vsel %vm3399_vm12, %v3433_v35, 1.0  ;;  %3579 = vst [vmem:[#allocation5 + $0x130] sm:$0xff] %v3529_v46  ;;  %3580 = vst [vmem:[#allocation5 + $0x138] sm:$0xff] %v3530_v23  ;;  %v3267_v31 = vsel %vm3265_vm13, %v3266_v8, %v3264_v37 }
 0x3a1   :  { %v4191_v61 = vpop.eup %4190  ;;  %v3507_v58 = vmul.f32 %v3474_v49, %v7840_v16  ;;  %v3508_v24 = vmul.f32 %v3474_v49, %v7841_v36  ;;  %v3376_v28 = vmax.f32 %v3267_v31, 1e-15 }
 0x3a2   :  { %v3339_v9 = vmul.f32 %v4191_v61, %v3181_v15  ;;  %v3145_v7 = vpop.xlane.xlu1 %3144  ;;  %v7378_v60 = vpop.xlane.xlu0 %3153 }
 0x3a3   :  { %3557 = vst [vmem:[#allocation5 + $0x80] sm:$0xff] %v3507_v58  ;;  %3558 = vst [vmem:[#allocation5 + $0x88] sm:$0xff] %v3508_v24  ;;  %4196 = vrcp.f32 %v3376_v28  ;;  %vm3401_vm2 = vcmp.gt.f32.partialorder %v3376_v28, 0.996  ;;  %vm3256_vm3 = vcmp.eq.f32.partialorder %v3145_v7, inf  ;;  %vm3258_vm4 = vcmp.eq.f32.partialorder %v3145_v7, 0.0 }
 0x3a4   :  { %v3341_v39 = vsel %vm3340_vm14, %v3181_v15, %v3339_v9  ;;  %4198 = vrsqrt.f32 %v3145_v7  ;;  %v3259_v56 = vand.u32 2147483648, %v3145_v7  ;;  %vm3277_vm5 = vcmp.eq.f32.partialorder %v7378_v60, inf  ;;  %v7848_v9 = vld [vmem:[#allocation89_spill] sm:$0xff] }
 0x3a5   :  { %v4193_v21 = vpop.eup %4192  ;;  %v3344_v13 = vsel %vm3342_vm15, %v3343_v18, %v3341_v39  ;;  %4200 = vrsqrt.f32 %v7378_v60  ;;  %vm3279_vm6 = vcmp.eq.f32.partialorder %v7378_v60, 0.0  ;;  %v3280_v41 = vand.u32 2147483648, %v7378_v60  ;;  %v7849_v18 = vld [vmem:[#allocation90_spill] sm:$0xff] }
 0x3a6   :  { %v3461_v12 = vmul.f32 0.996, %v4193_v21  ;;  %v3387_v55 = vmax.f32 %v3344_v13, 1e-15  ;;  %v3151_v27 = vpop.xlane.xlu1 %3150  ;;  %v7381_v17 = vpop.xlane.xlu0 %3189 }
 0x3a7   :  { %v4195_v47 = vpop.eup %4194  ;;  %4202 = vrsqrt.f32 %v3151_v27  ;;  %vm3270_vm7 = vcmp.eq.f32.partialorder %v3151_v27, inf  ;;  %vm3272_vm8 = vcmp.eq.f32.partialorder %v3151_v27, 0.0  ;;  %v3273_v31 = vand.u32 2147483648, %v3151_v27 }
 0x3a8   :  { %v3488_v30 = vsel %vm3413_vm0, %v3461_v12, 1.0  ;;  %v3431_v53 = vmul.f32 0.996, %v4195_v47  ;;  %4204 = vrcp.f32 %v3387_v55  ;;  %vm3412_vm9 = vcmp.gt.f32.partialorder %v3387_v55, 0.996 }
 0x3a9   :  { %v3535_v42 = vmul.f32 %v3488_v30, %v7842_v4  ;;  %v3536_v50 = vmul.f32 %v3488_v30, %v7843_v32  ;;  %4206 = vrsqrt.f32 %v7381_v17  ;;  %vm3361_vm10 = vcmp.eq.f32.partialorder %v7381_v17, inf }
 0x3aa   :  { %v3473_v44 = vsel %vm3398_vm1, %v3431_v53, 1.0  ;;  %v7386_v22 = vpop.xlane.xlu1 %3186  ;;  %vm3363_vm11 = vcmp.eq.f32.partialorder %v7381_v17, 0.0 }
 0x3ab   :  { %3585 = vst [vmem:[#allocation5 + $0x160] sm:$0xff] %v3535_v42  ;;  %3586 = vst [vmem:[#allocation5 + $0x168] sm:$0xff] %v3536_v50  ;;  %v3505_v20 = vmul.f32 %v3473_v44, %v7844_v3  ;;  %v3506_v59 = vmul.f32 %v3473_v44, %v7845_v63  ;;  %4208 = vrsqrt.f32 %v7386_v22  ;;  %vm3354_vm12 = vcmp.eq.f32.partialorder %v7386_v22, inf }
 0x3ac   :  { %vm3356_vm13 = vcmp.eq.f32.partialorder %v7386_v22, 0.0 }
 0x3ad   :  { %v4197_v29 = vpop.eup %4196  ;;  %3555 = vst [vmem:[#allocation5 + $0x70] sm:$0xff] %v3505_v20  ;;  %3556 = vst [vmem:[#allocation5 + $0x78] sm:$0xff] %v3506_v59 }
 0x3ae   :  { %v4199_v11 = vpop.eup %4198  ;;  %v3437_v15 = vmul.f32 0.996, %v4197_v29 }
 0x3af   :  { %v4201_v48 = vpop.eup %4200  ;;  %v3255_v54 = vmul.f32 %v4199_v11, %v3145_v7 }
 0x3b0   :  { %v3476_v62 = vsel %vm3401_vm2, %v3437_v15, 1.0  ;;  %v3276_v6 = vmul.f32 %v4201_v48, %v7378_v60 }
 0x3b1   :  { %v4203_v51 = vpop.eup %4202  ;;  %v3511_v34 = vmul.f32 %v3476_v62, %v7846_v52  ;;  %v3512_v19 = vmul.f32 %v3476_v62, %v7847_v40  ;;  %v3257_v45 = vsel %vm3256_vm3, %v3145_v7, %v3255_v54 }
 0x3b2   :  { %v4205_v14 = vpop.eup %4204  ;;  %v3260_v26 = vsel %vm3258_vm4, %v3259_v56, %v3257_v45  ;;  %v3278_v35 = vsel %vm3277_vm5, %v7378_v60, %v3276_v6  ;;  %v3269_v46 = vmul.f32 %v4203_v51, %v3151_v27  ;;  %v3364_v60 = vand.u32 2147483648, %v7381_v17 }
 0x3b3   :  { %v4207_v23 = vpop.eup %4206  ;;  %3561 = vst [vmem:[#allocation5 + $0xa0] sm:$0xff] %v3511_v34  ;;  %3562 = vst [vmem:[#allocation5 + $0xa8] sm:$0xff] %v3512_v19  ;;  %v3459_v8 = vmul.f32 0.996, %v4205_v14  ;;  %v3375_v37 = vmax.f32 %v3260_v26, 1e-15  ;;  %v3281_v49 = vsel %vm3279_vm6, %v3280_v41, %v3278_v35 }
 0x3b4   :  { %v3378_v61 = vmax.f32 %v3281_v49, 1e-15  ;;  %v3271_v16 = vsel %vm3270_vm7, %v3151_v27, %v3269_v46  ;;  %v3360_v58 = vmul.f32 %v4207_v23, %v7381_v17  ;;  %v3357_v27 = vand.u32 2147483648, %v7386_v22 }
 0x3b5   :  { %v4209_v36 = vpop.eup %4208  ;;  %v3487_v24 = vsel %vm3412_vm9, %v3459_v8, 1.0  ;;  %4210 = vrcp.f32 %v3375_v37  ;;  %v3274_v28 = vsel %vm3272_vm8, %v3273_v31, %v3271_v16  ;;  %vm3400_vm14 = vcmp.gt.f32.partialorder %v3375_v37, 0.996 }
 0x3b6   :  { %v3533_v7 = vmul.f32 %v3487_v24, %v7848_v9  ;;  %v3534_v39 = vmul.f32 %v3487_v24, %v7849_v18  ;;  %4212 = vrcp.f32 %v3378_v61  ;;  %v3377_v21 = vmax.f32 %v3274_v28, 1e-15 }
 0x3b7   :  { %v3362_v13 = vsel %vm3361_vm10, %v7381_v17, %v3360_v58  ;;  %v3353_v12 = vmul.f32 %v4209_v36, %v7386_v22  ;;  %vm3403_vm15 = vcmp.gt.f32.partialorder %v3378_v61, 0.996 }
 0x3b8   :  { %3583 = vst [vmem:[#allocation5 + $0x150] sm:$0xff] %v3533_v7  ;;  %3584 = vst [vmem:[#allocation5 + $0x158] sm:$0xff] %v3534_v39  ;;  %v3365_v55 = vsel %vm3363_vm11, %v3364_v60, %v3362_v13  ;;  %4214 = vrcp.f32 %v3377_v21  ;;  %vm3402_vm0 = vcmp.gt.f32.partialorder %v3377_v21, 0.996 }
 0x3b9   :  { %v3390_v47 = vmax.f32 %v3365_v55, 1e-15  ;;  %v3355_v30 = vsel %vm3354_vm12, %v7386_v22, %v3353_v12 }
 0x3ba   :  { %v3358_v53 = vsel %vm3356_vm13, %v3357_v27, %v3355_v30 }
 0x3bb   :  { %4216 = vrcp.f32 %v3390_v47  ;;  %v3389_v4 = vmax.f32 %v3358_v53, 1e-15  ;;  %vm3415_vm1 = vcmp.gt.f32.partialorder %v3390_v47, 0.996 }
 0x3bd   :  { %4218 = vrcp.f32 %v3389_v4  ;;  %vm3414_vm2 = vcmp.gt.f32.partialorder %v3389_v4, 0.996 }
 0x3bf   :  { %v4211_v17 = vpop.eup %4210 }
 0x3c0   :  { %v4213_v42 = vpop.eup %4212  ;;  %v3435_v32 = vmul.f32 0.996, %v4211_v17 }
 0x3c1   :  { %v3441_v50 = vmul.f32 0.996, %v4213_v42 }
 0x3c2   :  { %v3475_v44 = vsel %vm3400_vm14, %v3435_v32, 1.0  ;;  %v4215_v3 = vpop.eup %4214 }
 0x3c3   :  { %v3509_v20 = vmul.f32 %v3475_v44, %v7253_v57  ;;  %v3510_v63 = vmul.f32 %v3475_v44, %v7255_v2  ;;  %v3478_v59 = vsel %vm3403_vm15, %v3441_v50, 1.0  ;;  %v3439_v11 = vmul.f32 0.996, %v4215_v3 }
 0x3c4   :  { %v3515_v29 = vmul.f32 %v3478_v59, %v7249_v25  ;;  %v3516_v22 = vmul.f32 %v3478_v59, %v7251_v38 }
 0x3c5   :  { %v4217_v15 = vpop.eup %4216  ;;  %3559 = vst [vmem:[#allocation5 + $0x90] sm:$0xff] %v3509_v20  ;;  %3560 = vst [vmem:[#allocation5 + $0x98] sm:$0xff] %v3510_v63  ;;  %v3477_v48 = vsel %vm3402_vm0, %v3439_v11, 1.0 }
 0x3c6   :  { %3565 = vst [vmem:[#allocation5 + $0xc0] sm:$0xff] %v3515_v29  ;;  %3566 = vst [vmem:[#allocation5 + $0xc8] sm:$0xff] %v3516_v22  ;;  %v3465_v54 = vmul.f32 0.996, %v4217_v15  ;;  %v3513_v62 = vmul.f32 %v3477_v48, %v7275_v5  ;;  %v3514_v57 = vmul.f32 %v3477_v48, %v7277_v10 }
 0x3c7   :  { %v4219_v56 = vpop.eup %4218 }
 0x3c8   :  { %v3490_v2 = vsel %vm3415_vm1, %v3465_v54, 1.0  ;;  %v3463_v6 = vmul.f32 0.996, %v4219_v56  ;;  %3563 = vst [vmem:[#allocation5 + $0xb0] sm:$0xff] %v3513_v62  ;;  %3564 = vst [vmem:[#allocation5 + $0xb8] sm:$0xff] %v3514_v57 }
 0x3c9   :  { %v3539_v25 = vmul.f32 %v3490_v2, %v7245_v33  ;;  %v3540_v38 = vmul.f32 %v3490_v2, %v7247_v0 }
 0x3ca   :  { %v3489_v41 = vsel %vm3414_vm2, %v3463_v6, 1.0 }
 0x3cb   :  { %3589 = vst [vmem:[#allocation5 + $0x180] sm:$0xff] %v3539_v25  ;;  %3590 = vst [vmem:[#allocation5 + $0x188] sm:$0xff] %v3540_v38  ;;  %v3537_v51 = vmul.f32 %v3489_v41, %v7283_v1  ;;  %v3538_v5 = vmul.f32 %v3489_v41, %v7285_v43 }
 0x3cd   :  { %3587 = vst [vmem:[#allocation5 + $0x170] sm:$0xff] %v3537_v51  ;;  %3588 = vst [vmem:[#allocation5 + $0x178] sm:$0xff] %v3538_v5 }
 0x3ce   :  { %4231 = shalt.err (!%p4228_p4)
}
 0x3cf   :  { %s4232_s25 = scalar_lea.hbm %s7438_s4, 6400 }
 0x3d0   :  { %p4233_p5 = scmp.ne.s32.totalorder %s7438_s4, %s4232_s25  ;;  %p4236_p6 = scmp.lt.u32.totalorder %s4232_s25, %s7438_s4 }
 0x3d2   :  { %p4238_p7 = pnand %p4236_p6, %p4233_p5 }
 0x3d4   :  { %4241 = shalt.err (!%p4238_p7)
}
 0x3d5   :  { %s4247_s29 = smov 256   ;;  %s4248_s30 = smov 16  }
 0x3d6   :  { %3602 = dma.vmem_to_hbm [thread:$0]  %s3597_s21, 6400, %s7438_s4, [#allocation6], %s4247_s29, %s4247_s29, %s4248_s30  }
 0x3d7   :  { %4242 = dma.done.wait [#allocation6], 6400  }
 0x3d8   :  { %4243 = vsyncadd [#allocation6], 4294960896 }
 0x3d9   :  { %3606 = vsyncpa [#allocation6], 1 }

</bundles_post_ra>
